<compile_context>
chip_gen: v5e
topology: v5e:2x2
jax: 0.10.0
libtpu: 0.0.40
codegen_flags: <defaults>
</compile_context>

<pallas_src>
import functools

import jax
import jax.numpy as jnp
from jax import lax
from jax.experimental import pallas as pl
from jax.experimental.pallas import tpu as pltpu


# ---------------------------------------------------------------------------
# Fused BasicBlock_v3 kernel (one image per grid step).
# ---------------------------------------------------------------------------
def _basic_block_kernel(x_ref, w1_ref, w2_ref, pre_ref, mid_ref, post_ref,
                        o_ref, zp1_ref, zp2_ref, *, H, W, cdt):
    Cin = x_ref.shape[-1]
    Cmid = w1_ref.shape[-1]
    Cout = w2_ref.shape[-1]

    x2 = x_ref[0].reshape(H * W, Cin)                         # (H*W, Cin) f32

    # ---- BN1 (pre-conv affine) + zero-pad into VMEM scratch -----------------
    s1 = pre_ref[0:1, :]
    b1 = pre_ref[1:2, :]
    z = x2 * s1 + b1
    zp1_ref[...] = jnp.zeros(zp1_ref.shape, zp1_ref.dtype)
    zp1_ref[1:H + 1, 1:W + 1, :] = z.reshape(H, W, Cin)

    # ---- conv1: 3x3, stride 1 == 9 shifted matmuls (bf16 MXU, f32 acc) ------
    acc = jnp.zeros((H * W, Cmid), jnp.float32)
    for dy in range(3):
        for dx in range(3):
            patch = zp1_ref[dy:dy + H, dx:dx + W, :].reshape(H * W, Cin)
            acc = acc + jnp.dot(patch.astype(cdt), w1_ref[dy, dx],
                                preferred_element_type=jnp.float32)

    # ---- BN2 + PReLU (f32 epilogue) ------------------------------------------
    s2 = mid_ref[0:1, :]
    b2 = mid_ref[1:2, :]
    a1 = mid_ref[2:3, :]
    y = acc * s2 + b2
    y = jnp.where(y > 0, y, a1 * y)

    # ---- zero-pad intermediate for conv2 -------------------------------------
    zp2_ref[...] = jnp.zeros(zp2_ref.shape, zp2_ref.dtype)
    zp2_ref[1:H + 1, 1:W + 1, :] = y.reshape(H, W, Cmid)

    # ---- conv2: 3x3, stride 1 -------------------------------------------------
    acc2 = jnp.zeros((H * W, Cout), jnp.float32)
    for dy in range(3):
        for dx in range(3):
            patch = zp2_ref[dy:dy + H, dx:dx + W, :].reshape(H * W, Cmid)
            acc2 = acc2 + jnp.dot(patch.astype(cdt), w2_ref[dy, dx],
                                  preferred_element_type=jnp.float32)

    # ---- BN3 + identity residual + PReLU --------------------------------------
    s3 = post_ref[0:1, :]
    b3 = post_ref[1:2, :]
    a2 = post_ref[2:3, :]
    out = acc2 * s3 + b3 + x2
    out = jnp.where(out > 0, out, a2 * out)
    o_ref[0] = out.reshape(H, W, Cout).astype(o_ref.dtype)


# ---------------------------------------------------------------------------
# Host-side wrapper: BN folding, bf16 weight cast, pallas_call.
# ---------------------------------------------------------------------------
def fold_bn(gamma, beta, mean, var, eps=1e-5):
    s = gamma * lax.rsqrt(var + eps)
    return s, beta - mean * s


def basic_block_forward(x_nchw, p, compute_dtype=jnp.bfloat16):
    """Eval-mode BasicBlock_v3 forward. x_nchw: (N, C, H, W) f32 -> (N, C, H, W)."""
    N, Cin, H, W = x_nchw.shape
    Cmid = p["w1"].shape[-1]
    Cout = p["w2"].shape[-1]
    assert Cout == Cin, "identity residual requires planes == inplanes (no downsample)"

    x = jnp.transpose(x_nchw, (0, 2, 3, 1))                   # NHWC

    s1, b1 = fold_bn(*p["bn1"])
    s2, b2 = fold_bn(*p["bn2"])
    s3, b3 = fold_bn(*p["bn3"])
    a1 = jnp.broadcast_to(jnp.asarray(p["a1"], jnp.float32), (Cmid,))
    a2 = jnp.broadcast_to(jnp.asarray(p["a2"], jnp.float32), (Cout,))
    pre = jnp.stack([s1, b1], axis=0)                         # (2, Cin)
    mid = jnp.stack([s2, b2, a1], axis=0)                     # (3, Cmid)
    post = jnp.stack([s3, b3, a2], axis=0)                    # (3, Cout)

    w1 = p["w1"].astype(compute_dtype)                        # (3, 3, Cin, Cmid)  HWIO
    w2 = p["w2"].astype(compute_dtype)                        # (3, 3, Cmid, Cout) HWIO

    out = pl.pallas_call(
        functools.partial(_basic_block_kernel, H=H, W=W, cdt=compute_dtype),
        grid=(N,),
        in_specs=[
            pl.BlockSpec((1, H, W, Cin), lambda n: (n, 0, 0, 0)),
            pl.BlockSpec((3, 3, Cin, Cmid), lambda n: (0, 0, 0, 0)),
            pl.BlockSpec((3, 3, Cmid, Cout), lambda n: (0, 0, 0, 0)),
            pl.BlockSpec((2, Cin), lambda n: (0, 0)),
            pl.BlockSpec((3, Cmid), lambda n: (0, 0)),
            pl.BlockSpec((3, Cout), lambda n: (0, 0)),
        ],
        out_specs=pl.BlockSpec((1, H, W, Cout), lambda n: (n, 0, 0, 0)),
        out_shape=jax.ShapeDtypeStruct((N, H, W, Cout), jnp.float32),
        scratch_shapes=[
            pltpu.VMEM((H + 2, W + 2, Cin), jnp.float32),     # zero-padded BN1(x)
            pltpu.VMEM((H + 2, W + 2, Cmid), jnp.float32),    # zero-padded conv1 output
        ],
        compiler_params=pltpu.CompilerParams(
            dimension_semantics=("parallel",),
            vmem_limit_bytes=32 * 1024 * 1024,
        ),
    )(x, w1, w2, pre, mid, post)
    return jnp.transpose(out, (0, 3, 1, 2))                   # back to NCHW


# ---------------------------------------------------------------------------
# Parameters
# ---------------------------------------------------------------------------
def init_params(key, inplanes=128, planes=128):
    ks = jax.random.split(key, 5)

    def conv_w(k, shape, fan_in):
        return jax.random.normal(k, shape, jnp.float32) * jnp.sqrt(2.0 / fan_in)

    def bn(k, c):
        k1, k2, k3, k4 = jax.random.split(k, 4)
        gamma = 1.0 + 0.1 * jax.random.normal(k1, (c,), jnp.float32)
        beta = 0.1 * jax.random.normal(k2, (c,), jnp.float32)
        mean = 0.1 * jax.random.normal(k3, (c,), jnp.float32)
        var = jax.random.uniform(k4, (c,), jnp.float32, minval=0.5, maxval=1.5)
        return gamma, beta, mean, var

    return {
        "w1": conv_w(ks[0], (3, 3, inplanes, planes), 9 * inplanes),   # HWIO
        "w2": conv_w(ks[1], (3, 3, planes, planes), 9 * planes),       # HWIO
        "bn1": bn(ks[2], inplanes),
        "bn2": bn(ks[3], planes),
        "bn3": bn(ks[4], planes),
        "a1": 0.25,   # nn.PReLU() default single shared parameter
        "a2": 0.25,
    }


# ---------------------------------------------------------------------------
# Pure-JAX reference (lax.conv, f32 HIGHEST precision) for validation.
# ---------------------------------------------------------------------------
def reference_forward(x_nchw, p):
    x = jnp.transpose(x_nchw, (0, 2, 3, 1))

    def bn(y, bnp):
        s, b = fold_bn(*bnp)
        return y * s + b

    def prelu(y, a):
        return jnp.where(y > 0, y, a * y)

    def conv(y, w):
        return lax.conv_general_dilated(
            y, w, window_strides=(1, 1), padding=[(1, 1), (1, 1)],
            dimension_numbers=("NHWC", "HWIO", "NHWC"),
            precision=lax.Precision.HIGHEST)

    out = bn(x, p["bn1"])
    out = conv(out, p["w1"])
    out = prelu(bn(out, p["bn2"]), p["a1"])
    out = conv(out, p["w2"])
    out = bn(out, p["bn3"])
    out = prelu(out + x, p["a2"])
    return jnp.transpose(out, (0, 3, 1, 2))


if __name__ == "__main__":
    key = jax.random.PRNGKey(0)
    kx, kp = jax.random.split(key)

    # Small, lane-dense test shape: batch=2, channels=128, spatial=16x16.
    N, C, H, W = 2, 128, 16, 16
    x = jax.random.normal(kx, (N, C, H, W), jnp.float32)
    params = init_params(kp, inplanes=C, planes=C)

    out = jax.jit(basic_block_forward)(x, params)
    out = jax.block_until_ready(out)
    assert out.shape == (N, C, H, W), out.shape

    ref = reference_forward(x, params)
    rel = float(jnp.linalg.norm(out - ref) / jnp.linalg.norm(ref))
    assert rel < 3e-2, f"relative L2 error vs reference: {rel}"
    print("KERNEL_OK")
</pallas_src>

<mosaic_0001>
module attributes {stable_mosaic.version = 11 : i64} {
  func.func @_basic_block_kernel(%arg0: i32, %arg1: memref<1x16x16x128xf32, #tpu.memory_space<vmem>>, %arg2: memref<3x3x128x128xbf16, #tpu.memory_space<vmem>>, %arg3: memref<3x3x128x128xbf16, #tpu.memory_space<vmem>>, %arg4: memref<2x128xf32, #tpu.memory_space<vmem>>, %arg5: memref<3x128xf32, #tpu.memory_space<vmem>>, %arg6: memref<3x128xf32, #tpu.memory_space<vmem>>, %arg7: memref<1x16x16x128xf32, #tpu.memory_space<vmem>>, %arg8: memref<18x18x128xf32, #tpu.memory_space<vmem>>, %arg9: memref<18x18x128xf32, #tpu.memory_space<vmem>>) attributes {dimension_semantics = [#tpu.dimension_semantics<parallel>], iteration_bounds = array<i64: 2>, scalar_prefetch = 0 : i64, scratch_operands = 2 : i64, tpu.core_type = #tpu.core_type<tc>, window_params = [{transform_indices = @transform_0, window_bounds = array<i64: 1, 16, 16, 128>}, {pipeline_mode = #tpu.pipeline_mode<synchronous>, transform_indices = @transform_1, window_bounds = array<i64: 3, 3, 128, 128>}, {pipeline_mode = #tpu.pipeline_mode<synchronous>, transform_indices = @transform_2, window_bounds = array<i64: 3, 3, 128, 128>}, {pipeline_mode = #tpu.pipeline_mode<synchronous>, transform_indices = @transform_3, window_bounds = array<i64: 2, 128>}, {pipeline_mode = #tpu.pipeline_mode<synchronous>, transform_indices = @transform_4, window_bounds = array<i64: 3, 128>}, {pipeline_mode = #tpu.pipeline_mode<synchronous>, transform_indices = @transform_5, window_bounds = array<i64: 3, 128>}, {transform_indices = @transform_6, window_bounds = array<i64: 1, 16, 16, 128>}]} {
    %c0 = arith.constant 0 : index
    %c0_0 = arith.constant 0 : index
    %c0_1 = arith.constant 0 : index
    %c0_2 = arith.constant 0 : index
    %0 = vector.load %arg1[%c0, %c0_0, %c0_1, %c0_2] : memref<1x16x16x128xf32, #tpu.memory_space<vmem>>, vector<1x16x16x128xf32>
    %1 = vector.shape_cast %0 : vector<1x16x16x128xf32> to vector<16x16x128xf32>
    %2 = vector.shape_cast %1 : vector<16x16x128xf32> to vector<256x128xf32>
    %c0_3 = arith.constant 0 : index
    %c0_4 = arith.constant 0 : index
    %3 = vector.load %arg4[%c0_3, %c0_4] : memref<2x128xf32, #tpu.memory_space<vmem>>, vector<1x128xf32>
    %c1 = arith.constant 1 : index
    %c0_5 = arith.constant 0 : index
    %4 = vector.load %arg4[%c1, %c0_5] : memref<2x128xf32, #tpu.memory_space<vmem>>, vector<1x128xf32>
    %5 = vector.broadcast %3 : vector<1x128xf32> to vector<256x128xf32>
    %6 = arith.mulf %2, %5 : vector<256x128xf32>
    %7 = vector.broadcast %4 : vector<1x128xf32> to vector<256x128xf32>
    %8 = arith.addf %6, %7 : vector<256x128xf32>
    %cst = arith.constant 0.000000e+00 : f32
    %9 = vector.broadcast %cst : f32 to vector<18x18x128xf32>
    %c0_6 = arith.constant 0 : index
    %c0_7 = arith.constant 0 : index
    %c0_8 = arith.constant 0 : index
    %10 = vector.load %arg8[%c0_6, %c0_7, %c0_8] : memref<18x18x128xf32, #tpu.memory_space<vmem>>, vector<18x18x128xf32>
    tpu.vector_store %arg8[%c0_6, %c0_7, %c0_8], %9 {strides = array<i32>} : memref<18x18x128xf32, #tpu.memory_space<vmem>>, vector<18x18x128xf32>,
    %11 = vector.shape_cast %8 : vector<256x128xf32> to vector<16x16x128xf32>
    %c1_9 = arith.constant 1 : index
    %c1_10 = arith.constant 1 : index
    %c0_11 = arith.constant 0 : index
    %12 = vector.load %arg8[%c1_9, %c1_10, %c0_11] : memref<18x18x128xf32, #tpu.memory_space<vmem>>, vector<16x16x128xf32>
    tpu.vector_store %arg8[%c1_9, %c1_10, %c0_11], %11 {strides = array<i32>} : memref<18x18x128xf32, #tpu.memory_space<vmem>>, vector<16x16x128xf32>,
    %cst_12 = arith.constant 0.000000e+00 : f32
    %13 = vector.broadcast %cst_12 : f32 to vector<256x128xf32>
    %c0_13 = arith.constant 0 : index
    %c0_14 = arith.constant 0 : index
    %c0_15 = arith.constant 0 : index
    %14 = vector.load %arg8[%c0_13, %c0_14, %c0_15] : memref<18x18x128xf32, #tpu.memory_space<vmem>>, vector<16x16x128xf32>
    %15 = vector.shape_cast %14 : vector<16x16x128xf32> to vector<256x128xf32>
    %16 = arith.truncf %15 : vector<256x128xf32> to vector<256x128xbf16>
    %c0_16 = arith.constant 0 : index
    %c0_17 = arith.constant 0 : index
    %c0_18 = arith.constant 0 : index
    %c0_19 = arith.constant 0 : index
    %17 = vector.load %arg2[%c0_16, %c0_17, %c0_18, %c0_19] : memref<3x3x128x128xbf16, #tpu.memory_space<vmem>>, vector<1x1x128x128xbf16>
    %18 = vector.shape_cast %17 : vector<1x1x128x128xbf16> to vector<128x128xbf16>
    %cst_20 = arith.constant dense<0.000000e+00> : vector<256x128xf32>
    %19 = tpu.matmul %16, %18, %cst_20 {dimension_numbers = #tpu.dot_dimension_numbers<[1], [0], [0], [1], [0, 0, 1, 1], [], []>} : vector<256x128xbf16>, vector<128x128xbf16>, vector<256x128xf32> -> vector<256x128xf32>
    %20 = arith.addf %13, %19 : vector<256x128xf32>
    %c0_21 = arith.constant 0 : index
    %c1_22 = arith.constant 1 : index
    %c0_23 = arith.constant 0 : index
    %21 = vector.load %arg8[%c0_21, %c1_22, %c0_23] : memref<18x18x128xf32, #tpu.memory_space<vmem>>, vector<16x16x128xf32>
    %22 = vector.shape_cast %21 : vector<16x16x128xf32> to vector<256x128xf32>
    %23 = arith.truncf %22 : vector<256x128xf32> to vector<256x128xbf16>
    %c0_24 = arith.constant 0 : index
    %c1_25 = arith.constant 1 : index
    %c0_26 = arith.constant 0 : index
    %c0_27 = arith.constant 0 : index
    %24 = vector.load %arg2[%c0_24, %c1_25, %c0_26, %c0_27] : memref<3x3x128x128xbf16, #tpu.memory_space<vmem>>, vector<1x1x128x128xbf16>
    %25 = vector.shape_cast %24 : vector<1x1x128x128xbf16> to vector<128x128xbf16>
    %cst_28 = arith.constant dense<0.000000e+00> : vector<256x128xf32>
    %26 = tpu.matmul %23, %25, %cst_28 {dimension_numbers = #tpu.dot_dimension_numbers<[1], [0], [0], [1], [0, 0, 1, 1], [], []>} : vector<256x128xbf16>, vector<128x128xbf16>, vector<256x128xf32> -> vector<256x128xf32>
    %27 = arith.addf %20, %26 : vector<256x128xf32>
    %c0_29 = arith.constant 0 : index
    %c2 = arith.constant 2 : index
    %c0_30 = arith.constant 0 : index
    %28 = vector.load %arg8[%c0_29, %c2, %c0_30] : memref<18x18x128xf32, #tpu.memory_space<vmem>>, vector<16x16x128xf32>
    %29 = vector.shape_cast %28 : vector<16x16x128xf32> to vector<256x128xf32>
    %30 = arith.truncf %29 : vector<256x128xf32> to vector<256x128xbf16>
    %c0_31 = arith.constant 0 : index
    %c2_32 = arith.constant 2 : index
    %c0_33 = arith.constant 0 : index
    %c0_34 = arith.constant 0 : index
    %31 = vector.load %arg2[%c0_31, %c2_32, %c0_33, %c0_34] : memref<3x3x128x128xbf16, #tpu.memory_space<vmem>>, vector<1x1x128x128xbf16>
    %32 = vector.shape_cast %31 : vector<1x1x128x128xbf16> to vector<128x128xbf16>
    %cst_35 = arith.constant dense<0.000000e+00> : vector<256x128xf32>
    %33 = tpu.matmul %30, %32, %cst_35 {dimension_numbers = #tpu.dot_dimension_numbers<[1], [0], [0], [1], [0, 0, 1, 1], [], []>} : vector<256x128xbf16>, vector<128x128xbf16>, vector<256x128xf32> -> vector<256x128xf32>
    %34 = arith.addf %27, %33 : vector<256x128xf32>
    %c1_36 = arith.constant 1 : index
    %c0_37 = arith.constant 0 : index
    %c0_38 = arith.constant 0 : index
    %35 = vector.load %arg8[%c1_36, %c0_37, %c0_38] : memref<18x18x128xf32, #tpu.memory_space<vmem>>, vector<16x16x128xf32>
    %36 = vector.shape_cast %35 : vector<16x16x128xf32> to vector<256x128xf32>
    %37 = arith.truncf %36 : vector<256x128xf32> to vector<256x128xbf16>
    %c1_39 = arith.constant 1 : index
    %c0_40 = arith.constant 0 : index
    %c0_41 = arith.constant 0 : index
    %c0_42 = arith.constant 0 : index
    %38 = vector.load %arg2[%c1_39, %c0_40, %c0_41, %c0_42] : memref<3x3x128x128xbf16, #tpu.memory_space<vmem>>, vector<1x1x128x128xbf16>
    %39 = vector.shape_cast %38 : vector<1x1x128x128xbf16> to vector<128x128xbf16>
    %cst_43 = arith.constant dense<0.000000e+00> : vector<256x128xf32>
    %40 = tpu.matmul %37, %39, %cst_43 {dimension_numbers = #tpu.dot_dimension_numbers<[1], [0], [0], [1], [0, 0, 1, 1], [], []>} : vector<256x128xbf16>, vector<128x128xbf16>, vector<256x128xf32> -> vector<256x128xf32>
    %41 = arith.addf %34, %40 : vector<256x128xf32>
    %c1_44 = arith.constant 1 : index
    %c1_45 = arith.constant 1 : index
    %c0_46 = arith.constant 0 : index
    %42 = vector.load %arg8[%c1_44, %c1_45, %c0_46] : memref<18x18x128xf32, #tpu.memory_space<vmem>>, vector<16x16x128xf32>
    %43 = vector.shape_cast %42 : vector<16x16x128xf32> to vector<256x128xf32>
    %44 = arith.truncf %43 : vector<256x128xf32> to vector<256x128xbf16>
    %c1_47 = arith.constant 1 : index
    %c1_48 = arith.constant 1 : index
    %c0_49 = arith.constant 0 : index
    %c0_50 = arith.constant 0 : index
    %45 = vector.load %arg2[%c1_47, %c1_48, %c0_49, %c0_50] : memref<3x3x128x128xbf16, #tpu.memory_space<vmem>>, vector<1x1x128x128xbf16>
    %46 = vector.shape_cast %45 : vector<1x1x128x128xbf16> to vector<128x128xbf16>
    %cst_51 = arith.constant dense<0.000000e+00> : vector<256x128xf32>
    %47 = tpu.matmul %44, %46, %cst_51 {dimension_numbers = #tpu.dot_dimension_numbers<[1], [0], [0], [1], [0, 0, 1, 1], [], []>} : vector<256x128xbf16>, vector<128x128xbf16>, vector<256x128xf32> -> vector<256x128xf32>
    %48 = arith.addf %41, %47 : vector<256x128xf32>
    %c1_52 = arith.constant 1 : index
    %c2_53 = arith.constant 2 : index
    %c0_54 = arith.constant 0 : index
    %49 = vector.load %arg8[%c1_52, %c2_53, %c0_54] : memref<18x18x128xf32, #tpu.memory_space<vmem>>, vector<16x16x128xf32>
    %50 = vector.shape_cast %49 : vector<16x16x128xf32> to vector<256x128xf32>
    %51 = arith.truncf %50 : vector<256x128xf32> to vector<256x128xbf16>
    %c1_55 = arith.constant 1 : index
    %c2_56 = arith.constant 2 : index
    %c0_57 = arith.constant 0 : index
    %c0_58 = arith.constant 0 : index
    %52 = vector.load %arg2[%c1_55, %c2_56, %c0_57, %c0_58] : memref<3x3x128x128xbf16, #tpu.memory_space<vmem>>, vector<1x1x128x128xbf16>
    %53 = vector.shape_cast %52 : vector<1x1x128x128xbf16> to vector<128x128xbf16>
    %cst_59 = arith.constant dense<0.000000e+00> : vector<256x128xf32>
    %54 = tpu.matmul %51, %53, %cst_59 {dimension_numbers = #tpu.dot_dimension_numbers<[1], [0], [0], [1], [0, 0, 1, 1], [], []>} : vector<256x128xbf16>, vector<128x128xbf16>, vector<256x128xf32> -> vector<256x128xf32>
    %55 = arith.addf %48, %54 : vector<256x128xf32>
    %c2_60 = arith.constant 2 : index
    %c0_61 = arith.constant 0 : index
    %c0_62 = arith.constant 0 : index
    %56 = vector.load %arg8[%c2_60, %c0_61, %c0_62] : memref<18x18x128xf32, #tpu.memory_space<vmem>>, vector<16x16x128xf32>
    %57 = vector.shape_cast %56 : vector<16x16x128xf32> to vector<256x128xf32>
    %58 = arith.truncf %57 : vector<256x128xf32> to vector<256x128xbf16>
    %c2_63 = arith.constant 2 : index
    %c0_64 = arith.constant 0 : index
    %c0_65 = arith.constant 0 : index
    %c0_66 = arith.constant 0 : index
    %59 = vector.load %arg2[%c2_63, %c0_64, %c0_65, %c0_66] : memref<3x3x128x128xbf16, #tpu.memory_space<vmem>>, vector<1x1x128x128xbf16>
    %60 = vector.shape_cast %59 : vector<1x1x128x128xbf16> to vector<128x128xbf16>
    %cst_67 = arith.constant dense<0.000000e+00> : vector<256x128xf32>
    %61 = tpu.matmul %58, %60, %cst_67 {dimension_numbers = #tpu.dot_dimension_numbers<[1], [0], [0], [1], [0, 0, 1, 1], [], []>} : vector<256x128xbf16>, vector<128x128xbf16>, vector<256x128xf32> -> vector<256x128xf32>
    %62 = arith.addf %55, %61 : vector<256x128xf32>
    %c2_68 = arith.constant 2 : index
    %c1_69 = arith.constant 1 : index
    %c0_70 = arith.constant 0 : index
    %63 = vector.load %arg8[%c2_68, %c1_69, %c0_70] : memref<18x18x128xf32, #tpu.memory_space<vmem>>, vector<16x16x128xf32>
    %64 = vector.shape_cast %63 : vector<16x16x128xf32> to vector<256x128xf32>
    %65 = arith.truncf %64 : vector<256x128xf32> to vector<256x128xbf16>
    %c2_71 = arith.constant 2 : index
    %c1_72 = arith.constant 1 : index
    %c0_73 = arith.constant 0 : index
    %c0_74 = arith.constant 0 : index
    %66 = vector.load %arg2[%c2_71, %c1_72, %c0_73, %c0_74] : memref<3x3x128x128xbf16, #tpu.memory_space<vmem>>, vector<1x1x128x128xbf16>
    %67 = vector.shape_cast %66 : vector<1x1x128x128xbf16> to vector<128x128xbf16>
    %cst_75 = arith.constant dense<0.000000e+00> : vector<256x128xf32>
    %68 = tpu.matmul %65, %67, %cst_75 {dimension_numbers = #tpu.dot_dimension_numbers<[1], [0], [0], [1], [0, 0, 1, 1], [], []>} : vector<256x128xbf16>, vector<128x128xbf16>, vector<256x128xf32> -> vector<256x128xf32>
    %69 = arith.addf %62, %68 : vector<256x128xf32>
    %c2_76 = arith.constant 2 : index
    %c2_77 = arith.constant 2 : index
    %c0_78 = arith.constant 0 : index
    %70 = vector.load %arg8[%c2_76, %c2_77, %c0_78] : memref<18x18x128xf32, #tpu.memory_space<vmem>>, vector<16x16x128xf32>
    %71 = vector.shape_cast %70 : vector<16x16x128xf32> to vector<256x128xf32>
    %72 = arith.truncf %71 : vector<256x128xf32> to vector<256x128xbf16>
    %c2_79 = arith.constant 2 : index
    %c2_80 = arith.constant 2 : index
    %c0_81 = arith.constant 0 : index
    %c0_82 = arith.constant 0 : index
    %73 = vector.load %arg2[%c2_79, %c2_80, %c0_81, %c0_82] : memref<3x3x128x128xbf16, #tpu.memory_space<vmem>>, vector<1x1x128x128xbf16>
    %74 = vector.shape_cast %73 : vector<1x1x128x128xbf16> to vector<128x128xbf16>
    %cst_83 = arith.constant dense<0.000000e+00> : vector<256x128xf32>
    %75 = tpu.matmul %72, %74, %cst_83 {dimension_numbers = #tpu.dot_dimension_numbers<[1], [0], [0], [1], [0, 0, 1, 1], [], []>} : vector<256x128xbf16>, vector<128x128xbf16>, vector<256x128xf32> -> vector<256x128xf32>
    %76 = arith.addf %69, %75 : vector<256x128xf32>
    %c0_84 = arith.constant 0 : index
    %c0_85 = arith.constant 0 : index
    %77 = vector.load %arg5[%c0_84, %c0_85] : memref<3x128xf32, #tpu.memory_space<vmem>>, vector<1x128xf32>
    %c1_86 = arith.constant 1 : index
    %c0_87 = arith.constant 0 : index
    %78 = vector.load %arg5[%c1_86, %c0_87] : memref<3x128xf32, #tpu.memory_space<vmem>>, vector<1x128xf32>
    %c2_88 = arith.constant 2 : index
    %c0_89 = arith.constant 0 : index
    %79 = vector.load %arg5[%c2_88, %c0_89] : memref<3x128xf32, #tpu.memory_space<vmem>>, vector<1x128xf32>
    %80 = vector.broadcast %77 : vector<1x128xf32> to vector<256x128xf32>
    %81 = arith.mulf %76, %80 : vector<256x128xf32>
    %82 = vector.broadcast %78 : vector<1x128xf32> to vector<256x128xf32>
    %83 = arith.addf %81, %82 : vector<256x128xf32>
    %cst_90 = arith.constant 0.000000e+00 : f32
    %84 = vector.broadcast %cst_90 : f32 to vector<256x128xf32>
    %85 = arith.cmpf ogt, %83, %84 : vector<256x128xf32>
    %86 = vector.broadcast %79 : vector<1x128xf32> to vector<256x128xf32>
    %87 = arith.mulf %86, %83 : vector<256x128xf32>
    %88 = arith.select %85, %83, %87 : vector<256x128xi1>, vector<256x128xf32>
    %cst_91 = arith.constant 0.000000e+00 : f32
    %89 = vector.broadcast %cst_91 : f32 to vector<18x18x128xf32>
    %c0_92 = arith.constant 0 : index
    %c0_93 = arith.constant 0 : index
    %c0_94 = arith.constant 0 : index
    %90 = vector.load %arg9[%c0_92, %c0_93, %c0_94] : memref<18x18x128xf32, #tpu.memory_space<vmem>>, vector<18x18x128xf32>
    tpu.vector_store %arg9[%c0_92, %c0_93, %c0_94], %89 {strides = array<i32>} : memref<18x18x128xf32, #tpu.memory_space<vmem>>, vector<18x18x128xf32>,
    %91 = vector.shape_cast %88 : vector<256x128xf32> to vector<16x16x128xf32>
    %c1_95 = arith.constant 1 : index
    %c1_96 = arith.constant 1 : index
    %c0_97 = arith.constant 0 : index
    %92 = vector.load %arg9[%c1_95, %c1_96, %c0_97] : memref<18x18x128xf32, #tpu.memory_space<vmem>>, vector<16x16x128xf32>
    tpu.vector_store %arg9[%c1_95, %c1_96, %c0_97], %91 {strides = array<i32>} : memref<18x18x128xf32, #tpu.memory_space<vmem>>, vector<16x16x128xf32>,
    %cst_98 = arith.constant 0.000000e+00 : f32
    %93 = vector.broadcast %cst_98 : f32 to vector<256x128xf32>
    %c0_99 = arith.constant 0 : index
    %c0_100 = arith.constant 0 : index
    %c0_101 = arith.constant 0 : index
    %94 = vector.load %arg9[%c0_99, %c0_100, %c0_101] : memref<18x18x128xf32, #tpu.memory_space<vmem>>, vector<16x16x128xf32>
    %95 = vector.shape_cast %94 : vector<16x16x128xf32> to vector<256x128xf32>
    %96 = arith.truncf %95 : vector<256x128xf32> to vector<256x128xbf16>
    %c0_102 = arith.constant 0 : index
    %c0_103 = arith.constant 0 : index
    %c0_104 = arith.constant 0 : index
    %c0_105 = arith.constant 0 : index
    %97 = vector.load %arg3[%c0_102, %c0_103, %c0_104, %c0_105] : memref<3x3x128x128xbf16, #tpu.memory_space<vmem>>, vector<1x1x128x128xbf16>
    %98 = vector.shape_cast %97 : vector<1x1x128x128xbf16> to vector<128x128xbf16>
    %cst_106 = arith.constant dense<0.000000e+00> : vector<256x128xf32>
    %99 = tpu.matmul %96, %98, %cst_106 {dimension_numbers = #tpu.dot_dimension_numbers<[1], [0], [0], [1], [0, 0, 1, 1], [], []>} : vector<256x128xbf16>, vector<128x128xbf16>, vector<256x128xf32> -> vector<256x128xf32>
    %100 = arith.addf %93, %99 : vector<256x128xf32>
    %c0_107 = arith.constant 0 : index
    %c1_108 = arith.constant 1 : index
    %c0_109 = arith.constant 0 : index
    %101 = vector.load %arg9[%c0_107, %c1_108, %c0_109] : memref<18x18x128xf32, #tpu.memory_space<vmem>>, vector<16x16x128xf32>
    %102 = vector.shape_cast %101 : vector<16x16x128xf32> to vector<256x128xf32>
    %103 = arith.truncf %102 : vector<256x128xf32> to vector<256x128xbf16>
    %c0_110 = arith.constant 0 : index
    %c1_111 = arith.constant 1 : index
    %c0_112 = arith.constant 0 : index
    %c0_113 = arith.constant 0 : index
    %104 = vector.load %arg3[%c0_110, %c1_111, %c0_112, %c0_113] : memref<3x3x128x128xbf16, #tpu.memory_space<vmem>>, vector<1x1x128x128xbf16>
    %105 = vector.shape_cast %104 : vector<1x1x128x128xbf16> to vector<128x128xbf16>
    %cst_114 = arith.constant dense<0.000000e+00> : vector<256x128xf32>
    %106 = tpu.matmul %103, %105, %cst_114 {dimension_numbers = #tpu.dot_dimension_numbers<[1], [0], [0], [1], [0, 0, 1, 1], [], []>} : vector<256x128xbf16>, vector<128x128xbf16>, vector<256x128xf32> -> vector<256x128xf32>
    %107 = arith.addf %100, %106 : vector<256x128xf32>
    %c0_115 = arith.constant 0 : index
    %c2_116 = arith.constant 2 : index
    %c0_117 = arith.constant 0 : index
    %108 = vector.load %arg9[%c0_115, %c2_116, %c0_117] : memref<18x18x128xf32, #tpu.memory_space<vmem>>, vector<16x16x128xf32>
    %109 = vector.shape_cast %108 : vector<16x16x128xf32> to vector<256x128xf32>
    %110 = arith.truncf %109 : vector<256x128xf32> to vector<256x128xbf16>
    %c0_118 = arith.constant 0 : index
    %c2_119 = arith.constant 2 : index
    %c0_120 = arith.constant 0 : index
    %c0_121 = arith.constant 0 : index
    %111 = vector.load %arg3[%c0_118, %c2_119, %c0_120, %c0_121] : memref<3x3x128x128xbf16, #tpu.memory_space<vmem>>, vector<1x1x128x128xbf16>
    %112 = vector.shape_cast %111 : vector<1x1x128x128xbf16> to vector<128x128xbf16>
    %cst_122 = arith.constant dense<0.000000e+00> : vector<256x128xf32>
    %113 = tpu.matmul %110, %112, %cst_122 {dimension_numbers = #tpu.dot_dimension_numbers<[1], [0], [0], [1], [0, 0, 1, 1], [], []>} : vector<256x128xbf16>, vector<128x128xbf16>, vector<256x128xf32> -> vector<256x128xf32>
    %114 = arith.addf %107, %113 : vector<256x128xf32>
    %c1_123 = arith.constant 1 : index
    %c0_124 = arith.constant 0 : index
    %c0_125 = arith.constant 0 : index
    %115 = vector.load %arg9[%c1_123, %c0_124, %c0_125] : memref<18x18x128xf32, #tpu.memory_space<vmem>>, vector<16x16x128xf32>
    %116 = vector.shape_cast %115 : vector<16x16x128xf32> to vector<256x128xf32>
    %117 = arith.truncf %116 : vector<256x128xf32> to vector<256x128xbf16>
    %c1_126 = arith.constant 1 : index
    %c0_127 = arith.constant 0 : index
    %c0_128 = arith.constant 0 : index
    %c0_129 = arith.constant 0 : index
    %118 = vector.load %arg3[%c1_126, %c0_127, %c0_128, %c0_129] : memref<3x3x128x128xbf16, #tpu.memory_space<vmem>>, vector<1x1x128x128xbf16>
    %119 = vector.shape_cast %118 : vector<1x1x128x128xbf16> to vector<128x128xbf16>
    %cst_130 = arith.constant dense<0.000000e+00> : vector<256x128xf32>
    %120 = tpu.matmul %117, %119, %cst_130 {dimension_numbers = #tpu.dot_dimension_numbers<[1], [0], [0], [1], [0, 0, 1, 1], [], []>} : vector<256x128xbf16>, vector<128x128xbf16>, vector<256x128xf32> -> vector<256x128xf32>
    %121 = arith.addf %114, %120 : vector<256x128xf32>
    %c1_131 = arith.constant 1 : index
    %c1_132 = arith.constant 1 : index
    %c0_133 = arith.constant 0 : index
    %122 = vector.load %arg9[%c1_131, %c1_132, %c0_133] : memref<18x18x128xf32, #tpu.memory_space<vmem>>, vector<16x16x128xf32>
    %123 = vector.shape_cast %122 : vector<16x16x128xf32> to vector<256x128xf32>
    %124 = arith.truncf %123 : vector<256x128xf32> to vector<256x128xbf16>
    %c1_134 = arith.constant 1 : index
    %c1_135 = arith.constant 1 : index
    %c0_136 = arith.constant 0 : index
    %c0_137 = arith.constant 0 : index
    %125 = vector.load %arg3[%c1_134, %c1_135, %c0_136, %c0_137] : memref<3x3x128x128xbf16, #tpu.memory_space<vmem>>, vector<1x1x128x128xbf16>
    %126 = vector.shape_cast %125 : vector<1x1x128x128xbf16> to vector<128x128xbf16>
    %cst_138 = arith.constant dense<0.000000e+00> : vector<256x128xf32>
    %127 = tpu.matmul %124, %126, %cst_138 {dimension_numbers = #tpu.dot_dimension_numbers<[1], [0], [0], [1], [0, 0, 1, 1], [], []>} : vector<256x128xbf16>, vector<128x128xbf16>, vector<256x128xf32> -> vector<256x128xf32>
    %128 = arith.addf %121, %127 : vector<256x128xf32>
    %c1_139 = arith.constant 1 : index
    %c2_140 = arith.constant 2 : index
    %c0_141 = arith.constant 0 : index
    %129 = vector.load %arg9[%c1_139, %c2_140, %c0_141] : memref<18x18x128xf32, #tpu.memory_space<vmem>>, vector<16x16x128xf32>
    %130 = vector.shape_cast %129 : vector<16x16x128xf32> to vector<256x128xf32>
    %131 = arith.truncf %130 : vector<256x128xf32> to vector<256x128xbf16>
    %c1_142 = arith.constant 1 : index
    %c2_143 = arith.constant 2 : index
    %c0_144 = arith.constant 0 : index
    %c0_145 = arith.constant 0 : index
    %132 = vector.load %arg3[%c1_142, %c2_143, %c0_144, %c0_145] : memref<3x3x128x128xbf16, #tpu.memory_space<vmem>>, vector<1x1x128x128xbf16>
    %133 = vector.shape_cast %132 : vector<1x1x128x128xbf16> to vector<128x128xbf16>
    %cst_146 = arith.constant dense<0.000000e+00> : vector<256x128xf32>
    %134 = tpu.matmul %131, %133, %cst_146 {dimension_numbers = #tpu.dot_dimension_numbers<[1], [0], [0], [1], [0, 0, 1, 1], [], []>} : vector<256x128xbf16>, vector<128x128xbf16>, vector<256x128xf32> -> vector<256x128xf32>
    %135 = arith.addf %128, %134 : vector<256x128xf32>
    %c2_147 = arith.constant 2 : index
    %c0_148 = arith.constant 0 : index
    %c0_149 = arith.constant 0 : index
    %136 = vector.load %arg9[%c2_147, %c0_148, %c0_149] : memref<18x18x128xf32, #tpu.memory_space<vmem>>, vector<16x16x128xf32>
    %137 = vector.shape_cast %136 : vector<16x16x128xf32> to vector<256x128xf32>
    %138 = arith.truncf %137 : vector<256x128xf32> to vector<256x128xbf16>
    %c2_150 = arith.constant 2 : index
    %c0_151 = arith.constant 0 : index
    %c0_152 = arith.constant 0 : index
    %c0_153 = arith.constant 0 : index
    %139 = vector.load %arg3[%c2_150, %c0_151, %c0_152, %c0_153] : memref<3x3x128x128xbf16, #tpu.memory_space<vmem>>, vector<1x1x128x128xbf16>
    %140 = vector.shape_cast %139 : vector<1x1x128x128xbf16> to vector<128x128xbf16>
    %cst_154 = arith.constant dense<0.000000e+00> : vector<256x128xf32>
    %141 = tpu.matmul %138, %140, %cst_154 {dimension_numbers = #tpu.dot_dimension_numbers<[1], [0], [0], [1], [0, 0, 1, 1], [], []>} : vector<256x128xbf16>, vector<128x128xbf16>, vector<256x128xf32> -> vector<256x128xf32>
    %142 = arith.addf %135, %141 : vector<256x128xf32>
    %c2_155 = arith.constant 2 : index
    %c1_156 = arith.constant 1 : index
    %c0_157 = arith.constant 0 : index
    %143 = vector.load %arg9[%c2_155, %c1_156, %c0_157] : memref<18x18x128xf32, #tpu.memory_space<vmem>>, vector<16x16x128xf32>
    %144 = vector.shape_cast %143 : vector<16x16x128xf32> to vector<256x128xf32>
    %145 = arith.truncf %144 : vector<256x128xf32> to vector<256x128xbf16>
    %c2_158 = arith.constant 2 : index
    %c1_159 = arith.constant 1 : index
    %c0_160 = arith.constant 0 : index
    %c0_161 = arith.constant 0 : index
    %146 = vector.load %arg3[%c2_158, %c1_159, %c0_160, %c0_161] : memref<3x3x128x128xbf16, #tpu.memory_space<vmem>>, vector<1x1x128x128xbf16>
    %147 = vector.shape_cast %146 : vector<1x1x128x128xbf16> to vector<128x128xbf16>
    %cst_162 = arith.constant dense<0.000000e+00> : vector<256x128xf32>
    %148 = tpu.matmul %145, %147, %cst_162 {dimension_numbers = #tpu.dot_dimension_numbers<[1], [0], [0], [1], [0, 0, 1, 1], [], []>} : vector<256x128xbf16>, vector<128x128xbf16>, vector<256x128xf32> -> vector<256x128xf32>
    %149 = arith.addf %142, %148 : vector<256x128xf32>
    %c2_163 = arith.constant 2 : index
    %c2_164 = arith.constant 2 : index
    %c0_165 = arith.constant 0 : index
    %150 = vector.load %arg9[%c2_163, %c2_164, %c0_165] : memref<18x18x128xf32, #tpu.memory_space<vmem>>, vector<16x16x128xf32>
    %151 = vector.shape_cast %150 : vector<16x16x128xf32> to vector<256x128xf32>
    %152 = arith.truncf %151 : vector<256x128xf32> to vector<256x128xbf16>
    %c2_166 = arith.constant 2 : index
    %c2_167 = arith.constant 2 : index
    %c0_168 = arith.constant 0 : index
    %c0_169 = arith.constant 0 : index
    %153 = vector.load %arg3[%c2_166, %c2_167, %c0_168, %c0_169] : memref<3x3x128x128xbf16, #tpu.memory_space<vmem>>, vector<1x1x128x128xbf16>
    %154 = vector.shape_cast %153 : vector<1x1x128x128xbf16> to vector<128x128xbf16>
    %cst_170 = arith.constant dense<0.000000e+00> : vector<256x128xf32>
    %155 = tpu.matmul %152, %154, %cst_170 {dimension_numbers = #tpu.dot_dimension_numbers<[1], [0], [0], [1], [0, 0, 1, 1], [], []>} : vector<256x128xbf16>, vector<128x128xbf16>, vector<256x128xf32> -> vector<256x128xf32>
    %156 = arith.addf %149, %155 : vector<256x128xf32>
    %c0_171 = arith.constant 0 : index
    %c0_172 = arith.constant 0 : index
    %157 = vector.load %arg6[%c0_171, %c0_172] : memref<3x128xf32, #tpu.memory_space<vmem>>, vector<1x128xf32>
    %c1_173 = arith.constant 1 : index
    %c0_174 = arith.constant 0 : index
    %158 = vector.load %arg6[%c1_173, %c0_174] : memref<3x128xf32, #tpu.memory_space<vmem>>, vector<1x128xf32>
    %c2_175 = arith.constant 2 : index
    %c0_176 = arith.constant 0 : index
    %159 = vector.load %arg6[%c2_175, %c0_176] : memref<3x128xf32, #tpu.memory_space<vmem>>, vector<1x128xf32>
    %160 = vector.broadcast %157 : vector<1x128xf32> to vector<256x128xf32>
    %161 = arith.mulf %156, %160 : vector<256x128xf32>
    %162 = vector.broadcast %158 : vector<1x128xf32> to vector<256x128xf32>
    %163 = arith.addf %161, %162 : vector<256x128xf32>
    %164 = arith.addf %163, %2 : vector<256x128xf32>
    %cst_177 = arith.constant 0.000000e+00 : f32
    %165 = vector.broadcast %cst_177 : f32 to vector<256x128xf32>
    %166 = arith.cmpf ogt, %164, %165 : vector<256x128xf32>
    %167 = vector.broadcast %159 : vector<1x128xf32> to vector<256x128xf32>
    %168 = arith.mulf %167, %164 : vector<256x128xf32>
    %169 = arith.select %166, %164, %168 : vector<256x128xi1>, vector<256x128xf32>
    %170 = vector.shape_cast %169 : vector<256x128xf32> to vector<16x16x128xf32>
    %c0_178 = arith.constant 0 : index
    %c0_179 = arith.constant 0 : index
    %c0_180 = arith.constant 0 : index
    %c0_181 = arith.constant 0 : index
    %171 = vector.load %arg7[%c0_178, %c0_179, %c0_180, %c0_181] : memref<1x16x16x128xf32, #tpu.memory_space<vmem>>, vector<1x16x16x128xf32>
    %172 = vector.shape_cast %171 : vector<1x16x16x128xf32> to vector<16x16x128xf32>
    %173 = vector.shape_cast %170 : vector<16x16x128xf32> to vector<1x16x16x128xf32>
    tpu.vector_store %arg7[%c0_178, %c0_179, %c0_180, %c0_181], %173 {strides = array<i32>} : memref<1x16x16x128xf32, #tpu.memory_space<vmem>>, vector<1x16x16x128xf32>,
    return
  }
  func.func @transform_0(%arg0: i32) -> (i32, i32, i32, i32) {
    %c0_i32 = arith.constant 0 : i32
    %c0_i32_0 = arith.constant 0 : i32
    %c0_i32_1 = arith.constant 0 : i32
    %c0_i32_2 = arith.constant 0 : i32
    return %arg0, %c0_i32, %c0_i32_0, %c0_i32_1 : i32, i32, i32, i32
  }
  func.func @transform_1(%arg0: i32) -> (i32, i32, i32, i32) {
    %c0_i32 = arith.constant 0 : i32
    %c0_i32_0 = arith.constant 0 : i32
    %c0_i32_1 = arith.constant 0 : i32
    %c0_i32_2 = arith.constant 0 : i32
    %c0_i32_3 = arith.constant 0 : i32
    return %c0_i32, %c0_i32_0, %c0_i32_1, %c0_i32_2 : i32, i32, i32, i32
  }
  func.func @transform_2(%arg0: i32) -> (i32, i32, i32, i32) {
    %c0_i32 = arith.constant 0 : i32
    %c0_i32_0 = arith.constant 0 : i32
    %c0_i32_1 = arith.constant 0 : i32
    %c0_i32_2 = arith.constant 0 : i32
    %c0_i32_3 = arith.constant 0 : i32
    return %c0_i32, %c0_i32_0, %c0_i32_1, %c0_i32_2 : i32, i32, i32, i32
  }
  func.func @transform_3(%arg0: i32) -> (i32, i32) {
    %c0_i32 = arith.constant 0 : i32
    %c0_i32_0 = arith.constant 0 : i32
    %c0_i32_1 = arith.constant 0 : i32
    return %c0_i32, %c0_i32_0 : i32, i32
  }
  func.func @transform_4(%arg0: i32) -> (i32, i32) {
    %c0_i32 = arith.constant 0 : i32
    %c0_i32_0 = arith.constant 0 : i32
    %c0_i32_1 = arith.constant 0 : i32
    return %c0_i32, %c0_i32_0 : i32, i32
  }
  func.func @transform_5(%arg0: i32) -> (i32, i32) {
    %c0_i32 = arith.constant 0 : i32
    %c0_i32_0 = arith.constant 0 : i32
    %c0_i32_1 = arith.constant 0 : i32
    return %c0_i32, %c0_i32_0 : i32, i32
  }
  func.func @transform_6(%arg0: i32) -> (i32, i32, i32, i32) {
    %c0_i32 = arith.constant 0 : i32
    %c0_i32_0 = arith.constant 0 : i32
    %c0_i32_1 = arith.constant 0 : i32
    %c0_i32_2 = arith.constant 0 : i32
    return %arg0, %c0_i32, %c0_i32_0, %c0_i32_1 : i32, i32, i32, i32
  }
}

</mosaic_0001>

<bundles_post_ra>
// kernel: basic_block_forward.1
= control target key start
LH: loop header
LB: loop body
LE: loop exit
PB: predicated region body
PF: predicated region fallthrough
CT: control target
= control target key end

     0   :  { %11 = vsyncpa [#allocation5], 0  ;;  %s8571_s0 = inlined_call_operand.vmem [shape: f32[2,16,16,128], index: 0, kind: input, shape index: {}]   ;;  %s8572_s1 = inlined_call_operand.vmem [shape: bf16[3,3,128,128], index: 1, kind: input, shape index: {}]   ;;  %s8573_s2 = inlined_call_operand.vmem [shape: bf16[3,3,128,128], index: 2, kind: input, shape index: {}]   ;;  %s8574_s3 = inlined_call_operand.vmem [shape: f32[2,128], index: 3, kind: input, shape index: {}]   ;;  %s8575_s4 = inlined_call_operand.vmem [shape: f32[3,128], index: 4, kind: input, shape index: {}]   ;;  %s8576_s5 = inlined_call_operand.vmem [shape: f32[3,128], index: 5, kind: input, shape index: {}]   ;;  %s8577_s6 = inlined_call_operand.hbm [shape: f32[2,16,16,128], index: 6, kind: output, shape index: {}]  }
   0x1   :  { %13 = vsyncpa [#allocation5 + $0x1], 0  ;;  %s6280_s21 = smov 0   ;;  %s6282_s22 = smov 0  }
   0x2   :  { %s6284_s23 = smov 0   ;;  %s6286_s24 = smov 0  }
   0x3 LB: > { %s6301_s25 = sadd.s32 4294967295, %s6239_s24   ;;  %s5082_s26 = sadd.s32 4294967294, %s6239_s24   ;;  %s6239_s24 = sphi %s6286_s24, %s8601_s24   ;;  %s6235_s23 = sphi %s6284_s23, %s8600_s23   ;;  %s6231_s22 = sphi %s6282_s22, %s8599_s22   ;;  %s6227_s21 = sphi %s6280_s21, %s8598_s21  }
   0x4   : > { %s6305_s27 = sadd.s32 1, %s6239_s24   ;;  %s157_s28 = sadd.s32 1, %s6235_s23 }
   0x5   : > { %s154_s29 = ssub.s32 %s6239_s24, %s6305_s27  ;;  %p167_p0 = scmp.ne.s32.totalorder %s6235_s23, %s6231_s22 }
   0x6   : > { %p155_p1 = scmp.eq.s32.totalorder %s154_s29, 0  ;;  %p168_p2 = scmp.eq.s32.totalorder %s6301_s25, 1 }
   0x7   : > { %p173_p3 = scmp.ne.s32.totalorder %s6231_s22, %s6227_s21  ;;  %p174_p4 = scmp.eq.s32.totalorder %s5082_s26, 1 }
   0x8   : > { %s6316_s30 = scalar_select %p155_p1, %s6235_s23, %s157_s28  }
   0x9   : > { %p6318_p5 = por %p168_p2, %p167_p0  ;;  %p6322_p6 = por %p174_p4, %p173_p3 }
   0xa   : > { %p5085_p7 = scmp.ge.s32.totalorder %s6239_s24, 1  ;;  %p215_p8 = scmp.lt.s32.totalorder %s6239_s24, 3 }
   0xc   : > { %p216_p9 = pnand %p5085_p7, %p215_p8 }
   0xe   : > { %219 = sbr.rel (%p216_p9) target bundleno = 1561 (0x619), region = 44 }
  0x13   : > { %v5942_v0 = vld [vmem:[%s8572_s1 + $0x78] sm:$0xff]  ;;  %v6241_v2 = vmov 0.0   ;;  %v5941_v3 = vld [vmem:[%s8572_s1 + $0x70] sm:$0xff]  ;;  %v5940_v5 = vld [vmem:[%s8572_s1 + $0x68] sm:$0xff]  ;;  %p245_p10 = scmp.lt.s32.totalorder %s6301_s25, 1  ;;  %v6242_v35 = vmov 0.0|0.0  }
  0x14   : > { %v5934_v1 = vld [vmem:[%s8572_s1 + $0x38] sm:$0xff]  ;;  %350 = vst [vmem:[#allocation2] sm:$0xff] %v6241_v2  ;;  %614 = vmatpush.bf16.msra.mxu0 %v5942_v0  ;;  %6072 = vmatpush.bf16.msra.mxu2 %v5942_v0  ;;  %v5933_v4 = vld [vmem:[%s8572_s1 + $0x30] sm:$0xff]  ;;  %v5932_v6 = vld [vmem:[%s8572_s1 + $0x28] sm:$0xff]  ;;  %s242_s16 = sand.u32 1, %s6231_s22   ;;  %s6071_s26 = sshll.u32 %s6301_s25, 8 }
  0x15   : > { %351 = vst [vmem:[#allocation2 + $0x8] sm:$0xff] %v6241_v2  ;;  %6080 = vmatpush.bf16.msra.mxu3 %v5934_v1  ;;  %751 = vmatpush.bf16.msra.mxu1 %v5934_v1  ;;  %v5939_v7 = vld [vmem:[%s8572_s1 + $0x60] sm:$0xff]  ;;  %v5938_v9 = vld [vmem:[%s8572_s1 + $0x58] sm:$0xff]  ;;  %v5937_v11 = vld [vmem:[%s8572_s1 + $0x50] sm:$0xff]  ;;  %s246_s11 = scalar_select %p245_p10, %s6301_s25, 1 }
  0x16   : > { %352 = vst [vmem:[#allocation2 + $0x10] sm:$0x3] %v6241_v2  ;;  %v5931_v8 = vld [vmem:[%s8572_s1 + $0x20] sm:$0xff]  ;;  %v5930_v10 = vld [vmem:[%s8572_s1 + $0x18] sm:$0xff]  ;;  %v5929_v12 = vld [vmem:[%s8572_s1 + $0x10] sm:$0xff]  ;;  %s5086_s19 = sshll.u32 %s242_s16, 8  ;;  %s5016_s9 = scalar_lea.hbm %s8577_s6, %s6071_s26 }
  0x17   : > { %353 = vst [vmem:[#allocation2 + $0x18] sm:$0xff] %v6241_v2  ;;  %v5936_v13 = vld [vmem:[%s8572_s1 + $0x48] sm:$0xff]  ;;  %v5935_v15 = vld [vmem:[%s8572_s1 + $0x40] sm:$0xff]  ;;  %s5926_s12 = sshll.u32 %s246_s11, 8  ;;  %v5950_v29 = vld [vmem:[%s8572_s1 + $0xb8] sm:$0xff]  ;;  %s8261_s20 = scalar_lea.vmem [#allocation4], %s5086_s19 }
  0x18   : > { %354 = vst [vmem:[#allocation2 + $0x20] sm:$0xff] %v6241_v2  ;;  %615 = vmatpush.bf16.msra.mxu0 %v5941_v3  ;;  %6073 = vmatpush.bf16.msra.mxu2 %v5941_v3  ;;  %v5928_v14 = vld [vmem:[%s8572_s1 + $0x8] sm:$0xff]  ;;  %v5927_v18 = vld [vmem:[%s8572_s1] sm:$0xff]  ;;  %s6447_s15 = scalar_lea.vmem %s8571_s0, %s5926_s12  ;;  %v5958_v30 = vld [vmem:[%s8572_s1 + $0xf8] sm:$0xff]  ;;  %s5017_s10 = sshll.u32 %s8261_s20, 4  ;;  %s5018_s10 = int_to_ptr.vmem [resolvable:$true] %s5017_s10 }
  0x19   : > { %355 = vst [vmem:[#allocation2 + $0x28] sm:$0x3] %v6241_v2  ;;  %6081 = vmatpush.bf16.msra.mxu3 %v5933_v4  ;;  %752 = vmatpush.bf16.msra.mxu1 %v5933_v4  ;;  %v6454_v20 = vld [vmem:[%s8574_s3] ss:$0 sm:$0xff]  ;;  %v264_v21 = vld [vmem:[%s6447_s15 + $0x70] sm:$0xff]  ;;  %v265_v22 = vld [vmem:[%s6447_s15 + $0x78] sm:$0xff] }
  0x1a   : > { %356 = vst [vmem:[#allocation2 + $0x30] sm:$0xff] %v6241_v2  ;;  %v299_v23 = vmul.f32 %v6454_v20, %v264_v21  ;;  %v300_v24 = vmul.f32 %v6454_v20, %v265_v22  ;;  %v6467_v25 = vld [vmem:[%s8574_s3 + $0x1] ss:$0 sm:$0xff]  ;;  %v5966_v31 = vld [vmem:[%s8572_s1 + $0x138] sm:$0xff]  ;;  %v251_v33 = vld [vmem:[%s6447_s15 + $0x8] sm:$0xff]  ;;  %s5019_s11 = sshll.u32 %s5016_s9, 4  ;;  %s5020_s11 = int_to_ptr.hbm [resolvable:$true] %s5019_s11 }
  0x1b   : > { %357 = vst [vmem:[#allocation2 + $0x38] sm:$0xff] %v6241_v2  ;;  %v250_v32 = vld [vmem:[%s6447_s15] sm:$0xff]  ;;  %v286_v37 = vmul.f32 %v6454_v20, %v251_v33  ;;  %v267_v38 = vld [vmem:[%s6447_s15 + $0x88] sm:$0xff]  ;;  %v5949_v47 = vld [vmem:[%s8572_s1 + $0xb0] sm:$0xff]  ;;  %s5005_s25 = scalar_lea.sflag [#allocation5], %s242_s16  ;;  %s6191_s12 = sshra.s32 %s5020_s11, 4  ;;  %s6192_s12 = int_to_ptr.hbm [resolvable:$true] %s6191_s12 }
  0x1c   : > { %358 = vst [vmem:[#allocation2 + $0x40] sm:$0x3] %v6241_v2  ;;  %616 = vmatpush.bf16.msra.mxu0 %v5940_v5  ;;  %6074 = vmatpush.bf16.msra.mxu2 %v5940_v5  ;;  %v501_v16 = vld [vmem:[#allocation2 + $0x1] sm:$0xff]  ;;  %v6474_v26 = vadd.f32 %v6467_v25, %v299_v23  ;;  %v6477_v27 = vadd.f32 %v6467_v25, %v300_v24  ;;  %v5957_v48 = vld [vmem:[%s8572_s1 + $0xf0] sm:$0xff]  ;;  %v253_v51 = vld [vmem:[%s6447_s15 + $0x18] sm:$0xff]  ;;  %s6193_s13 = scalar_lea.hbm %s6192_s12, 256  ;;  %p6198_p0 = scmp.lt.s32.totalorder %s6192_s12, %s8577_s6 }
  0x1d   : > { %359 = vst [vmem:[#allocation2 + $0x48] sm:$0xff] %v6241_v2  ;;  %6082 = vmatpush.bf16.msra.mxu3 %v5932_v6  ;;  %753 = vmatpush.bf16.msra.mxu1 %v5932_v6  ;;  %v502_v17 = vld [vmem:[#allocation2 + $0x9] sm:$0xff]  ;;  %v266_v34 = vld [vmem:[%s6447_s15 + $0x80] sm:$0xff]  ;;  %v285_v36 = vmul.f32 %v6454_v20, %v250_v32  ;;  %v302_v40 = vmul.f32 %v6454_v20, %v267_v38  ;;  %v269_v55 = vld [vmem:[%s6447_s15 + $0x98] sm:$0xff]  ;;  %p6194_p11 = scmp.ne.s32.totalorder %s6192_s12, %s6193_s13 }
  0x1e   : > { %360 = vst [vmem:[#allocation2 + $0x50] sm:$0xff] %v6241_v2  ;;  %v533_v19 = vpack.c.bf16 %v502_v17, %v501_v16  ;;  %v541_v28 = vpack.c.bf16 %v6477_v27, %v6474_v26  ;;  %v301_v39 = vmul.f32 %v6454_v20, %v266_v34  ;;  %v319_v42 = vadd.f32 %v6467_v25, %v286_v37  ;;  %v5965_v49 = vld [vmem:[%s8572_s1 + $0x130] sm:$0xff]  ;;  %v5948_v6 = vld [vmem:[%s8572_s1 + $0xa8] sm:$0xff]  ;;  %v5955_v32 = vld [vmem:[%s8572_s1 + $0xe0] sm:$0xff] }
  0x1f   : > { %361 = vst [vmem:[#allocation2 + $0x58] sm:$0x3] %v6241_v2  ;;  %v318_v41 = vadd.f32 %v6467_v25, %v285_v36  ;;  %v335_v44 = vadd.f32 %v6467_v25, %v302_v40  ;;  %v252_v50 = vld [vmem:[%s6447_s15 + $0x10] sm:$0xff]  ;;  %v288_v54 = vmul.f32 %v6454_v20, %v253_v51  ;;  %v304_v57 = vmul.f32 %v6454_v20, %v269_v55  ;;  %v5963_v33 = vld [vmem:[%s8572_s1 + $0x120] sm:$0xff]  ;;  %v5946_v55 = vld [vmem:[%s8572_s1 + $0x98] sm:$0xff]  ;;  %p6195_p12 = pnand %p6194_p11, %p6318_p5 }
  0x20   : > { %362 = vst [vmem:[#allocation2 + $0x60] sm:$0xff] %v6241_v2  ;;  %617 = vmatpush.bf16.msra.mxu0 %v5939_v7  ;;  %6075 = vmatpush.bf16.msra.mxu2 %v5939_v7  ;;  %v334_v43 = vadd.f32 %v6467_v25, %v301_v39  ;;  %v268_v52 = vld [vmem:[%s6447_s15 + $0x90] sm:$0xff]  ;;  %v287_v53 = vmul.f32 %v6454_v20, %v252_v50  ;;  %v5956_v7 = vld [vmem:[%s8572_s1 + $0xe8] sm:$0xff]  ;;  %v273_v39 = vld [vmem:[%s6447_s15 + $0xb8] sm:$0xff] }
  0x21   : > { %363 = vst [vmem:[#allocation2 + $0x68] sm:$0xff] %v6241_v2  ;;  %6083 = vmatpush.bf16.msra.mxu3 %v5931_v8  ;;  %754 = vmatpush.bf16.msra.mxu1 %v5931_v8  ;;  %v6520_v45 = vpack.c.bf16 %v319_v42, %v318_v41  ;;  %v303_v56 = vmul.f32 %v6454_v20, %v268_v52  ;;  %v5964_v8 = vld [vmem:[%s8572_s1 + $0x128] sm:$0xff]  ;;  %v256_v34 = vld [vmem:[%s6447_s15 + $0x30] sm:$0xff]  ;;  %p6196_p13 = pneg %p6195_p12 }
  0x22   : > { %364 = vst [vmem:[#allocation2 + $0x70] sm:$0x3] %v6241_v2  ;;  %v542_v46 = vpack.c.bf16 %v335_v44, %v334_v43  ;;  %v320_v58 = vadd.f32 %v6467_v25, %v287_v53  ;;  %v321_v59 = vadd.f32 %v6467_v25, %v288_v54  ;;  %v337_v61 = vadd.f32 %v6467_v25, %v304_v57  ;;  %v272_v38 = vld [vmem:[%s6447_s15 + $0xb0] sm:$0xff]  ;;  %v5962_v57 = vld [vmem:[%s8572_s1 + $0x118] sm:$0xff] }
  0x23   : > { %365 = vst [vmem:[#allocation2 + $0x78] sm:$0xff] %v6241_v2  ;;  %v336_v60 = vadd.f32 %v6467_v25, %v303_v56  ;;  %v291_v36 = vmul.f32 %v6454_v20, %v256_v34  ;;  %v307_v40 = vmul.f32 %v6454_v20, %v272_v38  ;;  %v5954_v56 = vld [vmem:[%s8572_s1 + $0xd8] sm:$0xff] }
  0x24   : > { %366 = vst [vmem:[#allocation2 + $0x80] sm:$0xff] %v6241_v2  ;;  %618 = vmatpush.bf16.msra.mxu0 %v5938_v9  ;;  %6076 = vmatpush.bf16.msra.mxu2 %v5938_v9  ;;  %v6560_v62 = vpack.c.bf16 %v321_v59, %v320_v58  ;;  %v254_v9 = vld [vmem:[%s6447_s15 + $0x20] sm:$0xff] }
  0x25   : > { %367 = vst [vmem:[#allocation2 + $0x88] sm:$0x3] %v6241_v2  ;;  %6084 = vmatpush.bf16.msra.mxu3 %v5930_v10  ;;  %755 = vmatpush.bf16.msra.mxu1 %v5930_v10  ;;  %v543_v63 = vpack.c.bf16 %v337_v61, %v336_v60  ;;  %v255_v10 = vld [vmem:[%s6447_s15 + $0x28] sm:$0xff] }
  0x26   : > { %368 = vst [vmem:[#allocation2 + $0x90] sm:$0xff] %v6241_v2 }
  0x27   : > { %369 = vst [vmem:[#allocation2 + $0x98] sm:$0xff] %v6241_v2 }
  0x28   : > { %370 = vst [vmem:[#allocation2 + $0xa0] sm:$0x3] %v6241_v2  ;;  %619 = vmatpush.bf16.msra.mxu0 %v5937_v11  ;;  %6077 = vmatpush.bf16.msra.mxu2 %v5937_v11  ;;  %v289_v11 = vmul.f32 %v6454_v20, %v254_v9 }
  0x29   : > { %371 = vst [vmem:[#allocation2 + $0xa8] sm:$0xff] %v6241_v2  ;;  %6085 = vmatpush.bf16.msra.mxu3 %v5929_v12  ;;  %756 = vmatpush.bf16.msra.mxu1 %v5929_v12  ;;  %v270_v12 = vld [vmem:[%s6447_s15 + $0xa0] sm:$0xff] }
  0x2a   : > { %372 = vst [vmem:[#allocation2 + $0xb0] sm:$0xff] %v6241_v2  ;;  %v322_v16 = vadd.f32 %v6467_v25, %v289_v11 }
  0x2b   : > { %373 = vst [vmem:[#allocation2 + $0xb8] sm:$0x3] %v6241_v2 }
  0x2c   : > { %374 = vst [vmem:[#allocation2 + $0xc0] sm:$0xff] %v6241_v2  ;;  %620 = vmatpush.bf16.msra.mxu0 %v5936_v13  ;;  %6078 = vmatpush.bf16.msra.mxu2 %v5936_v13  ;;  %v290_v13 = vmul.f32 %v6454_v20, %v255_v10 }
  0x2d   : > { %375 = vst [vmem:[#allocation2 + $0xc8] sm:$0xff] %v6241_v2  ;;  %6086 = vmatpush.bf16.msra.mxu3 %v5928_v14  ;;  %757 = vmatpush.bf16.msra.mxu1 %v5928_v14  ;;  %v271_v14 = vld [vmem:[%s6447_s15 + $0xa8] sm:$0xff] }
  0x2e   : > { %376 = vst [vmem:[#allocation2 + $0xd0] sm:$0x3] %v6241_v2  ;;  %v306_v17 = vmul.f32 %v6454_v20, %v271_v14 }
  0x2f   : > { %377 = vst [vmem:[#allocation2 + $0xd8] sm:$0xff] %v6241_v2 }
  0x30   : > { %378 = vst [vmem:[#allocation2 + $0xe0] sm:$0xff] %v6241_v2  ;;  %621 = vmatpush.bf16.msra.mxu0 %v5935_v15  ;;  %6079 = vmatpush.bf16.msra.mxu2 %v5935_v15  ;;  %v305_v15 = vmul.f32 %v6454_v20, %v270_v12  ;;  %v339_v21 = vadd.f32 %v6467_v25, %v306_v17  ;;  %v5953_v17 = vld [vmem:[%s8572_s1 + $0xd0] sm:$0xff] }
  0x31   : > { %379 = vst [vmem:[#allocation2 + $0xe8] sm:$0x3] %v6241_v2  ;;  %6087 = vmatpush.bf16.msra.mxu3 %v5927_v18  ;;  %758 = vmatpush.bf16.msra.mxu1 %v5927_v18  ;;  %v323_v18 = vadd.f32 %v6467_v25, %v290_v13 }
  0x32   : > { %380 = vst [vmem:[#allocation2 + $0xf0] sm:$0xff] %v6241_v2 }
  0x33   : > { %381 = vst [vmem:[#allocation2 + $0xf8] sm:$0xff] %v6241_v2  ;;  %622 = vmatmul.bf16.vlgmr.msra.gmra.mxu0 %v533_v19  ;;  %662 = vmatmul.bf16.vlgmr.msra.gmra.mxu2 %v541_v28  ;;  %v338_v19 = vadd.f32 %v6467_v25, %v305_v15  ;;  %v6587_v22 = vpack.c.bf16 %v323_v18, %v322_v16 }
  0x34   : > { %382 = vst [vmem:[#allocation2 + $0x100] sm:$0x3] %v6241_v2  ;;  %953 = vmatpush.bf16.msrb.mxu2 %v5950_v29  ;;  %759 = vmatmul.bf16.vlgmr.msra.gmra.mxu1 %v6242_v35  ;;  %v257_v35 = vld [vmem:[%s6447_s15 + $0x38] sm:$0xff] }
  0x35   : > { %383 = vst [vmem:[#allocation2 + $0x108] sm:$0xff] %v6241_v2  ;;  %1187 = vmatpush.bf16.msrb.mxu3 %v5958_v30  ;;  %1421 = vmatpush.bf16.msrb.mxu0 %v5966_v31  ;;  %v544_v23 = vpack.c.bf16 %v339_v21, %v338_v19  ;;  %v5947_v31 = vld [vmem:[%s8572_s1 + $0xa0] sm:$0xff]  ;;  %v292_v37 = vmul.f32 %v6454_v20, %v257_v35 }
  0x36   : > { %384 = vst [vmem:[#allocation2 + $0x110] sm:$0xff] %v6241_v2 }
  0x37   : > { %385 = vst [vmem:[#allocation2 + $0x118] sm:$0x3] %v6241_v2 }
  0x38   : > { %386 = vst [vmem:[#allocation2 + $0x120] sm:$0xff] %v6241_v2  ;;  %954 = vmatpush.bf16.msrb.mxu2 %v5949_v47 }
  0x39   : > { %387 = vst [vmem:[#allocation2 + $0x128] sm:$0xff] %v6241_v2  ;;  %1188 = vmatpush.bf16.msrb.mxu3 %v5957_v48  ;;  %1422 = vmatpush.bf16.msrb.mxu0 %v5965_v49 }
  0x3a   : > { %388 = vst [vmem:[#allocation2 + $0x130] sm:$0x3] %v6241_v2 }
  0x3b   : > { %389 = vst [vmem:[#allocation2 + $0x138] sm:$0xff] %v6241_v2 }
  0x3c   : > { %390 = vst [vmem:[#allocation2 + $0x140] sm:$0xff] %v6241_v2  ;;  %955 = vmatpush.bf16.msrb.mxu2 %v5948_v6 }
  0x3d   : > { %391 = vst [vmem:[#allocation2 + $0x148] sm:$0x3] %v6241_v2  ;;  %1189 = vmatpush.bf16.msrb.mxu3 %v5956_v7  ;;  %1423 = vmatpush.bf16.msrb.mxu0 %v5964_v8 }
  0x3e   : > { %392 = vst [vmem:[#allocation2 + $0x150] sm:$0xff] %v6241_v2 }
  0x3f   : > { %393 = vst [vmem:[#allocation2 + $0x158] sm:$0xff] %v6241_v2 }
  0x40   : > { %394 = vst [vmem:[#allocation2 + $0x160] sm:$0x3] %v6241_v2  ;;  %956 = vmatpush.bf16.msrb.mxu2 %v5947_v31 }
  0x41   : > { %395 = vst [vmem:[#allocation2 + $0x168] sm:$0xff] %v6241_v2  ;;  %1190 = vmatpush.bf16.msrb.mxu3 %v5955_v32  ;;  %1424 = vmatpush.bf16.msrb.mxu0 %v5963_v33 }
  0x42   : > { %396 = vst [vmem:[#allocation2 + $0x170] sm:$0xff] %v6241_v2 }
  0x43   : > { %397 = vst [vmem:[#allocation2 + $0x178] sm:$0x3] %v6241_v2  ;;  %627 = vmatmul.bf16.gmra.mxu0 %v6520_v45  ;;  %667 = vmatmul.bf16.gmra.mxu2 %v542_v46 }
  0x44   : > { %398 = vst [vmem:[#allocation2 + $0x180] sm:$0xff] %v6241_v2  ;;  %957 = vmatpush.bf16.msrb.mxu2 %v5946_v55 }
  0x45   : > { %399 = vst [vmem:[#allocation2 + $0x188] sm:$0xff] %v6241_v2  ;;  %1191 = vmatpush.bf16.msrb.mxu3 %v5954_v56  ;;  %1425 = vmatpush.bf16.msrb.mxu0 %v5962_v57 }
  0x46   : > { %400 = vst [vmem:[#allocation2 + $0x190] sm:$0x3] %v6241_v2 }
  0x47   : > { %401 = vst [vmem:[#allocation2 + $0x198] sm:$0xff] %v6241_v2 }
  0x48   : > { %402 = vst [vmem:[#allocation2 + $0x1a0] sm:$0xff] %v6241_v2 }
  0x49   : > { %403 = vst [vmem:[#allocation2 + $0x1a8] sm:$0x3] %v6241_v2  ;;  %1192 = vmatpush.bf16.msrb.mxu3 %v5953_v17 }
  0x4a   : > { %2645 = vst [vmem:[#allocation3] sm:$0xff] %v6241_v2 }
  0x4b   : > { %2646 = vst [vmem:[#allocation3 + $0x8] sm:$0xff] %v6241_v2 }
  0x4c   : > { %2647 = vst [vmem:[#allocation3 + $0x10] sm:$0x3] %v6241_v2 }
  0x4d   : > { %2648 = vst [vmem:[#allocation3 + $0x18] sm:$0xff] %v6241_v2 }
  0x4e   : > { %2649 = vst [vmem:[#allocation3 + $0x20] sm:$0xff] %v6241_v2 }
  0x4f   : > { %2650 = vst [vmem:[#allocation3 + $0x28] sm:$0x3] %v6241_v2 }
  0x50   : > { %2651 = vst [vmem:[#allocation3 + $0x30] sm:$0xff] %v6241_v2 }
  0x51   : > { %2652 = vst [vmem:[#allocation3 + $0x38] sm:$0xff] %v6241_v2 }
  0x52   : > { %2653 = vst [vmem:[#allocation3 + $0x40] sm:$0x3] %v6241_v2 }
  0x53   : > { %2654 = vst [vmem:[#allocation3 + $0x48] sm:$0xff] %v6241_v2  ;;  %632 = vmatmul.bf16.gmra.mxu0 %v6560_v62  ;;  %672 = vmatmul.bf16.gmra.mxu2 %v543_v63  ;;  %v274_v63 = vld [vmem:[%s6447_s15 + $0xc0] sm:$0xff] }
  0x54   : > { %2655 = vst [vmem:[#allocation3 + $0x50] sm:$0xff] %v6241_v2 }
  0x55   : > { %2656 = vst [vmem:[#allocation3 + $0x58] sm:$0x3] %v6241_v2 }
  0x56   : > { %2657 = vst [vmem:[#allocation3 + $0x60] sm:$0xff] %v6241_v2 }
  0x57   : > { %2658 = vst [vmem:[#allocation3 + $0x68] sm:$0xff] %v6241_v2 }
  0x58   : > { %2659 = vst [vmem:[#allocation3 + $0x70] sm:$0x3] %v6241_v2 }
  0x59   : > { %2660 = vst [vmem:[#allocation3 + $0x78] sm:$0xff] %v6241_v2 }
  0x5a   : > { %2661 = vst [vmem:[#allocation3 + $0x80] sm:$0xff] %v6241_v2 }
  0x5b   : > { %2662 = vst [vmem:[#allocation3 + $0x88] sm:$0x3] %v6241_v2 }
  0x5c   : > { %2663 = vst [vmem:[#allocation3 + $0x90] sm:$0xff] %v6241_v2 }
  0x5d   : > { %2664 = vst [vmem:[#allocation3 + $0x98] sm:$0xff] %v6241_v2 }
  0x5e   : > { %2665 = vst [vmem:[#allocation3 + $0xa0] sm:$0x3] %v6241_v2 }
  0x5f   : > { %2666 = vst [vmem:[#allocation3 + $0xa8] sm:$0xff] %v6241_v2 }
  0x60   : > { %2667 = vst [vmem:[#allocation3 + $0xb0] sm:$0xff] %v6241_v2 }
  0x61   : > { %2668 = vst [vmem:[#allocation3 + $0xb8] sm:$0x3] %v6241_v2 }
  0x62   : > { %2669 = vst [vmem:[#allocation3 + $0xc0] sm:$0xff] %v6241_v2 }
  0x63   : > { %2670 = vst [vmem:[#allocation3 + $0xc8] sm:$0xff] %v6241_v2  ;;  %637 = vmatmul.bf16.gmra.mxu0 %v6587_v22  ;;  %677 = vmatmul.bf16.gmra.mxu2 %v544_v23 }
  0x64   : > { %2671 = vst [vmem:[#allocation3 + $0xd0] sm:$0x3] %v6241_v2 }
  0x65   : > { %2672 = vst [vmem:[#allocation3 + $0xd8] sm:$0xff] %v6241_v2 }
  0x66   : > { %2673 = vst [vmem:[#allocation3 + $0xe0] sm:$0xff] %v6241_v2 }
  0x67   : > { %2674 = vst [vmem:[#allocation3 + $0xe8] sm:$0x3] %v6241_v2 }
  0x68   : > { %2675 = vst [vmem:[#allocation3 + $0xf0] sm:$0xff] %v6241_v2 }
  0x69   : > { %2676 = vst [vmem:[#allocation3 + $0xf8] sm:$0xff] %v6241_v2 }
  0x6a   : > { %2677 = vst [vmem:[#allocation3 + $0x100] sm:$0x3] %v6241_v2 }
  0x6b   : > { %2678 = vst [vmem:[#allocation3 + $0x108] sm:$0xff] %v6241_v2 }
  0x6c   : > { %2679 = vst [vmem:[#allocation3 + $0x110] sm:$0xff] %v6241_v2 }
  0x6d   : > { %2680 = vst [vmem:[#allocation3 + $0x118] sm:$0x3] %v6241_v2 }
  0x6e   : > { %2681 = vst [vmem:[#allocation3 + $0x120] sm:$0xff] %v6241_v2 }
  0x6f   : > { %2682 = vst [vmem:[#allocation3 + $0x128] sm:$0xff] %v6241_v2 }
  0x70   : > { %2683 = vst [vmem:[#allocation3 + $0x130] sm:$0x3] %v6241_v2 }
  0x71   : > { %2684 = vst [vmem:[#allocation3 + $0x138] sm:$0xff] %v6241_v2 }
  0x72   : > { %2685 = vst [vmem:[#allocation3 + $0x140] sm:$0xff] %v6241_v2 }
  0x73   : > { %2686 = vst [vmem:[#allocation3 + $0x148] sm:$0x3] %v6241_v2 }
  0x74   : > { %2687 = vst [vmem:[#allocation3 + $0x150] sm:$0xff] %v6241_v2 }
  0x75   : > { %2688 = vst [vmem:[#allocation3 + $0x158] sm:$0xff] %v6241_v2 }
  0x76   : > { %2689 = vst [vmem:[#allocation3 + $0x160] sm:$0x3] %v6241_v2 }
  0x77   : > { %2690 = vst [vmem:[#allocation3 + $0x168] sm:$0xff] %v6241_v2 }
  0x78   : > { %2691 = vst [vmem:[#allocation3 + $0x170] sm:$0xff] %v6241_v2 }
  0x79   : > { %2692 = vst [vmem:[#allocation3 + $0x178] sm:$0x3] %v6241_v2 }
  0x7a   : > { %2693 = vst [vmem:[#allocation3 + $0x180] sm:$0xff] %v6241_v2 }
  0x7b   : > { %2694 = vst [vmem:[#allocation3 + $0x188] sm:$0xff] %v6241_v2 }
  0x7c   : > { %2695 = vst [vmem:[#allocation3 + $0x190] sm:$0x3] %v6241_v2 }
  0x7d   : > { %2696 = vst [vmem:[#allocation3 + $0x198] sm:$0xff] %v6241_v2 }
  0x7e   : > { %2697 = vst [vmem:[#allocation3 + $0x1a0] sm:$0xff] %v6241_v2 }
  0x7f   : > { %2698 = vst [vmem:[#allocation3 + $0x1a8] sm:$0x3] %v6241_v2 }
  0x80   : > { %419 = vst [vmem:[#allocation2 + $0xc1] sm:$0xff] %v6474_v26 }
  0x81   : > { %420 = vst [vmem:[#allocation2 + $0xc9] sm:$0xff] %v6477_v27 }
  0x82   : > { %405 = vst [vmem:[#allocation2 + $0x19] sm:$0xff] %v318_v41  ;;  %v308_v41 = vmul.f32 %v6454_v20, %v273_v39 }
  0x83   : > { %406 = vst [vmem:[#allocation2 + $0x21] sm:$0xff] %v319_v42  ;;  %v324_v42 = vadd.f32 %v6467_v25, %v291_v36 }
  0x84   : > { %421 = vst [vmem:[#allocation2 + $0xd9] sm:$0xff] %v334_v43  ;;  %v325_v43 = vadd.f32 %v6467_v25, %v292_v37  ;;  %v341_v46 = vadd.f32 %v6467_v25, %v308_v41 }
  0x85   : > { %422 = vst [vmem:[#allocation2 + $0xe1] sm:$0xff] %v335_v44  ;;  %v340_v44 = vadd.f32 %v6467_v25, %v307_v40 }
  0x86   : > { %407 = vst [vmem:[#allocation2 + $0x31] sm:$0xff] %v320_v58  ;;  %v6614_v47 = vpack.c.bf16 %v325_v43, %v324_v42  ;;  %v258_v58 = vld [vmem:[%s6447_s15 + $0x40] sm:$0xff] }
  0x87   : > { %v453_v0 = vld [vmem:[#allocation2 + $0xc0] sm:$0xff]  ;;  %408 = vst [vmem:[#allocation2 + $0x39] sm:$0xff] %v321_v59  ;;  %v545_v48 = vpack.c.bf16 %v341_v46, %v340_v44  ;;  %v259_v59 = vld [vmem:[%s6447_s15 + $0x48] sm:$0xff] }
  0x88   : > { %v454_v1 = vld [vmem:[#allocation2 + $0xc8] sm:$0xff]  ;;  %423 = vst [vmem:[#allocation2 + $0xf1] sm:$0xff] %v336_v60  ;;  %642 = vmatmul.bf16.gmra.mxu0 %v6614_v47  ;;  %v293_v60 = vmul.f32 %v6454_v20, %v258_v58 }
  0x89   : > { %v477_v2 = vpack.c.bf16 %v454_v1, %v453_v0  ;;  %v439_v3 = vld [vmem:[#allocation2 + $0x18] sm:$0xff]  ;;  %424 = vst [vmem:[#allocation2 + $0xf9] sm:$0xff] %v337_v61  ;;  %682 = vmatmul.bf16.gmra.mxu2 %v545_v48  ;;  %v294_v61 = vmul.f32 %v6454_v20, %v259_v59  ;;  %v275_v0 = vld [vmem:[%s6447_s15 + $0xc8] sm:$0xff]  ;;  %v309_v1 = vmul.f32 %v6454_v20, %v274_v63 }
  0x8a   : > { %v440_v4 = vld [vmem:[#allocation2 + $0x20] sm:$0xff]  ;;  %409 = vst [vmem:[#allocation2 + $0x49] sm:$0xff] %v322_v16  ;;  %v5945_v16 = vld [vmem:[%s8572_s1 + $0x90] sm:$0xff]  ;;  %v5974_v48 = vld [vmem:[%s8572_s1 + $0x178] sm:$0xff] }
  0x8b   : > { %799 = vmatmul.bf16.vlgmr.msra.gmra.mxu3 %v477_v2  ;;  %v6563_v5 = vpack.c.bf16 %v440_v4, %v439_v3  ;;  %410 = vst [vmem:[#allocation2 + $0x51] sm:$0xff] %v323_v18  ;;  %v455_v24 = vld [vmem:[#allocation2 + $0xd8] sm:$0xff]  ;;  %v310_v2 = vmul.f32 %v6454_v20, %v275_v0  ;;  %v326_v3 = vadd.f32 %v6467_v25, %v293_v60  ;;  %v5961_v18 = vld [vmem:[%s8572_s1 + $0x110] sm:$0xff] }
  0x8c   : > { %425 = vst [vmem:[#allocation2 + $0x109] sm:$0xff] %v338_v19  ;;  %v456_v26 = vld [vmem:[#allocation2 + $0xe0] sm:$0xff]  ;;  %v327_v4 = vadd.f32 %v6467_v25, %v294_v61  ;;  %v342_v6 = vadd.f32 %v6467_v25, %v309_v1  ;;  %v260_v19 = vld [vmem:[%s6447_s15 + $0x50] sm:$0xff]  ;;  %958 = vmatpush.bf16.msrb.mxu2 %v5945_v16  ;;  %1426 = vmatpush.bf16.msrb.mxu0 %v5961_v18 }
  0x8d   : > { %764 = vmatmul.bf16.gmra.mxu1 %v6563_v5  ;;  %426 = vst [vmem:[#allocation2 + $0x111] sm:$0xff] %v339_v21  ;;  %v441_v27 = vld [vmem:[#allocation2 + $0x30] sm:$0xff]  ;;  %v478_v29 = vpack.c.bf16 %v456_v26, %v455_v24  ;;  %v343_v7 = vadd.f32 %v6467_v25, %v310_v2  ;;  %v261_v21 = vld [vmem:[%s6447_s15 + $0x58] sm:$0xff]  ;;  %v295_v23 = vmul.f32 %v6454_v20, %v260_v19 }
  0x8e   : > { %v442_v28 = vld [vmem:[#allocation2 + $0x38] sm:$0xff]  ;;  %411 = vst [vmem:[#allocation2 + $0x61] sm:$0xff] %v324_v42  ;;  %v6641_v8 = vpack.c.bf16 %v327_v4, %v326_v3  ;;  %v296_v24 = vmul.f32 %v6454_v20, %v261_v21  ;;  %v276_v26 = vld [vmem:[%s6447_s15 + $0xd0] sm:$0xff]  ;;  %1655 = vmatpush.bf16.msrb.mxu1 %v5974_v48 }
  0x8f   : > { %v6590_v30 = vpack.c.bf16 %v442_v28, %v441_v27  ;;  %412 = vst [vmem:[#allocation2 + $0x69] sm:$0xff] %v325_v43  ;;  %v457_v49 = vld [vmem:[#allocation2 + $0xf0] sm:$0xff]  ;;  %v546_v9 = vpack.c.bf16 %v343_v7, %v342_v6  ;;  %v277_v27 = vld [vmem:[%s6447_s15 + $0xd8] sm:$0xff]  ;;  %v311_v28 = vmul.f32 %v6454_v20, %v276_v26  ;;  %v328_v31 = vadd.f32 %v6467_v25, %v295_v23  ;;  %v5944_v43 = vld [vmem:[%s8572_s1 + $0x88] sm:$0xff] }
  0x90   : > { %427 = vst [vmem:[#allocation2 + $0x121] sm:$0xff] %v340_v44  ;;  %v458_v50 = vld [vmem:[#allocation2 + $0xf8] sm:$0xff]  ;;  %v329_v32 = vadd.f32 %v6467_v25, %v296_v24  ;;  %v5952_v44 = vld [vmem:[%s8572_s1 + $0xc8] sm:$0xff]  ;;  %959 = vmatpush.bf16.msrb.mxu2 %v5944_v43 }
  0x91   : > { %428 = vst [vmem:[#allocation2 + $0x129] sm:$0xff] %v341_v46  ;;  %v443_v51 = vld [vmem:[#allocation2 + $0x48] sm:$0xff]  ;;  %v479_v53 = vpack.c.bf16 %v458_v50, %v457_v49  ;;  %v344_v33 = vadd.f32 %v6467_v25, %v311_v28  ;;  %v262_v49 = vld [vmem:[%s6447_s15 + $0x60] sm:$0xff]  ;;  %1193 = vmatpush.bf16.msrb.mxu3 %v5952_v44  ;;  %v5970_v19 = vld [vmem:[%s8572_s1 + $0x158] sm:$0xff] }
  0x92   : > { %v444_v52 = vld [vmem:[#allocation2 + $0x50] sm:$0xff]  ;;  %413 = vst [vmem:[#allocation2 + $0x79] sm:$0xff] %v326_v3  ;;  %v6668_v35 = vpack.c.bf16 %v329_v32, %v328_v31  ;;  %v5960_v46 = vld [vmem:[%s8572_s1 + $0x108] sm:$0xff]  ;;  %v1542_v43 = vld [vmem:[#allocation2 + $0x1a] sm:$0xff] }
  0x93   : > { %v6617_v54 = vpack.c.bf16 %v444_v52, %v443_v51  ;;  %414 = vst [vmem:[#allocation2 + $0x81] sm:$0xff] %v327_v4  ;;  %v459_v10 = vld [vmem:[#allocation2 + $0x108] sm:$0xff]  ;;  %v297_v51 = vmul.f32 %v6454_v20, %v262_v49  ;;  %v278_v52 = vld [vmem:[%s6447_s15 + $0xe0] sm:$0xff]  ;;  %1427 = vmatpush.bf16.msrb.mxu0 %v5960_v46 }
  0x94   : > { %429 = vst [vmem:[#allocation2 + $0x139] sm:$0xff] %v342_v6  ;;  %v460_v11 = vld [vmem:[#allocation2 + $0x110] sm:$0xff]  ;;  %v263_v50 = vld [vmem:[%s6447_s15 + $0x68] sm:$0xff]  ;;  %v313_v56 = vmul.f32 %v6454_v20, %v278_v52 }
  0x95   : > { %430 = vst [vmem:[#allocation2 + $0x141] sm:$0xff] %v343_v7  ;;  %v445_v12 = vld [vmem:[#allocation2 + $0x60] sm:$0xff]  ;;  %v480_v14 = vpack.c.bf16 %v460_v11, %v459_v10  ;;  %v298_v55 = vmul.f32 %v6454_v20, %v263_v50  ;;  %v330_v58 = vadd.f32 %v6467_v25, %v297_v51  ;;  %v5972_v10 = vld [vmem:[%s8572_s1 + $0x168] sm:$0xff] }
  0x96   : > { %v446_v13 = vld [vmem:[#allocation2 + $0x68] sm:$0xff]  ;;  %415 = vst [vmem:[#allocation2 + $0x91] sm:$0xff] %v328_v31  ;;  %v346_v60 = vadd.f32 %v6467_v25, %v313_v56  ;;  %v5943_v7 = vld [vmem:[%s8572_s1 + $0x80] sm:$0xff] }
  0x97   : > { %v6644_v15 = vpack.c.bf16 %v446_v13, %v445_v12  ;;  %416 = vst [vmem:[#allocation2 + $0x99] sm:$0xff] %v329_v32  ;;  %v461_v37 = vld [vmem:[#allocation2 + $0x120] sm:$0xff]  ;;  %v331_v59 = vadd.f32 %v6467_v25, %v298_v55  ;;  %960 = vmatpush.bf16.msrb.mxu2 %v5943_v7  ;;  %v841_v13 = vld [vmem:[#allocation2 + $0xa] sm:$0xff]  ;;  %v5990_v32 = vld [vmem:[%s8572_s1 + $0x1f8] sm:$0xff] }
  0x98   : > { %647 = vmatmul.bf16.gmra.mxu0 %v6641_v8  ;;  %431 = vst [vmem:[#allocation2 + $0x151] sm:$0xff] %v344_v33  ;;  %v462_v38 = vld [vmem:[#allocation2 + $0x128] sm:$0xff]  ;;  %v5959_v11 = vld [vmem:[%s8572_s1 + $0x100] sm:$0xff]  ;;  %v1544_v55 = vld [vmem:[#allocation2 + $0x32] sm:$0xff] }
  0x99   : > { %687 = vmatmul.bf16.gmra.mxu2 %v546_v9  ;;  %v447_v39 = vld [vmem:[#allocation2 + $0x78] sm:$0xff]  ;;  %v481_v41 = vpack.c.bf16 %v462_v38, %v461_v37  ;;  %417 = vst [vmem:[#allocation2 + $0xa9] sm:$0xff] %v330_v58  ;;  %v6698_v63 = vpack.c.bf16 %v331_v59, %v330_v58  ;;  %v5951_v9 = vld [vmem:[%s8572_s1 + $0xc0] sm:$0xff]  ;;  %1428 = vmatpush.bf16.msrb.mxu0 %v5959_v11 }
  0x9a   : > { %v448_v40 = vld [vmem:[#allocation2 + $0x80] sm:$0xff]  ;;  %418 = vst [vmem:[#allocation2 + $0xb1] sm:$0xff] %v331_v59  ;;  %1194 = vmatpush.bf16.msrb.mxu3 %v5951_v9  ;;  %v5998_v37 = vld [vmem:[%s8572_s1 + $0x238] sm:$0xff] }
  0x9b   : > { %804 = vmatmul.bf16.gmra.mxu3 %v478_v29  ;;  %v312_v29 = vmul.f32 %v6454_v20, %v277_v27  ;;  %v6671_v42 = vpack.c.bf16 %v448_v40, %v447_v39  ;;  %433 = vst [vmem:[#allocation2 + $0x169] sm:$0xff] %v346_v60  ;;  %v463_v1 = vld [vmem:[#allocation2 + $0x138] sm:$0xff]  ;;  %v840_v12 = vld [vmem:[#allocation2 + $0x2] sm:$0xff] }
  0x9c   : > { %v464_v2 = vld [vmem:[#allocation2 + $0x140] sm:$0xff]  ;;  %v872_v16 = vpack.c.bf16 %v841_v13, %v840_v12  ;;  %v1547_v7 = vld [vmem:[#allocation2 + $0x52] sm:$0xff] }
  0x9d   : > { %769 = vmatmul.bf16.gmra.mxu1 %v6590_v30  ;;  %v345_v34 = vadd.f32 %v6467_v25, %v312_v29  ;;  %v482_v4 = vpack.c.bf16 %v464_v2, %v463_v1  ;;  %v5969_v29 = vld [vmem:[%s8572_s1 + $0x150] sm:$0xff]  ;;  %v5967_v38 = vld [vmem:[%s8572_s1 + $0x140] sm:$0xff]  ;;  %2358 = vmatpush.bf16.msra.mxu0 %v5998_v37  ;;  %v5988_v37 = vld [vmem:[%s8572_s1 + $0x1e8] sm:$0xff] }
  0x9e   : > { %v450_v3 = vld [vmem:[#allocation2 + $0x98] sm:$0xff]  ;;  %2124 = vmatpush.bf16.msra.mxu3 %v5990_v32  ;;  %v1543_v44 = vld [vmem:[#allocation2 + $0x22] sm:$0xff] }
  0x9f   : > { %v547_v36 = vpack.c.bf16 %v345_v34, %v344_v33  ;;  %432 = vst [vmem:[#allocation2 + $0x159] sm:$0xff] %v345_v34  ;;  %v465_v17 = vld [vmem:[#allocation2 + $0x150] sm:$0xff]  ;;  %v5968_v34 = vld [vmem:[%s8572_s1 + $0x148] sm:$0xff]  ;;  %v1574_v46 = vpack.c.bf16 %v1543_v44, %v1542_v43  ;;  %v1545_v56 = vld [vmem:[#allocation2 + $0x3a] sm:$0xff] }
  0xa0   : > { %v451_v23 = vld [vmem:[#allocation2 + $0xa8] sm:$0xff] }
  0xa1   : > { %v452_v24 = vld [vmem:[#allocation2 + $0xb0] sm:$0xff] }
  0xa2   : > { %v6726_v27 = vpack.c.bf16 %v452_v24, %v451_v23  ;;  %v467_v39 = vld [vmem:[#allocation2 + $0x168] sm:$0xff] }
  0xa3   : > { %v1548_v24 = vld [vmem:[#allocation2 + $0x62] sm:$0xff] }
  0xa6   : > { %v466_v18 = vld [vmem:[#allocation2 + $0x158] sm:$0xff] }
  0xa7   : > { %v483_v26 = vpack.c.bf16 %v466_v18, %v465_v17 }
  0xa8   : > { %652 = vmatmul.bf16.gmra.mxu0 %v6668_v35 }
  0xa9   : > { %692 = vmatmul.bf16.gmra.mxu2 %v547_v36 }
  0xab   : > { %809 = vmatmul.bf16.gmra.mxu3 %v479_v53  ;;  %v279_v53 = vld [vmem:[%s6447_s15 + $0xe8] sm:$0xff] }
  0xac   : > { %v314_v57 = vmul.f32 %v6454_v20, %v279_v53  ;;  %v449_v20 = vld [vmem:[#allocation2 + $0x90] sm:$0xff] }
  0xad   : > { %774 = vmatmul.bf16.gmra.mxu1 %v6617_v54  ;;  %v6701_v6 = vpack.c.bf16 %v450_v3, %v449_v20 }
  0xae   : > { %v347_v61 = vadd.f32 %v6467_v25, %v314_v57  ;;  %v5973_v25 = vld [vmem:[%s8572_s1 + $0x170] sm:$0xff]  ;;  %v1575_v57 = vpack.c.bf16 %v1545_v56, %v1544_v55 }
  0xaf   : > { %1656 = vmatpush.bf16.msrb.mxu1 %v5973_v25  ;;  %v1546_v25 = vld [vmem:[#allocation2 + $0x4a] sm:$0xff] }
  0xb0   : > { %v548_v0 = vpack.c.bf16 %v347_v61, %v346_v60  ;;  %434 = vst [vmem:[#allocation2 + $0x171] sm:$0xff] %v347_v61  ;;  %v623_v21 = vpop.f32.mrf.mxu0  ;;  %v5981_v60 = vld [vmem:[%s8572_s1 + $0x1b0] sm:$0xff]  ;;  %v1576_v9 = vpack.c.bf16 %v1547_v7, %v1546_v25 }
  0xb1   : > { %v760_v28 = vpop.f32.mrf.mxu1  ;;  %v5989_v61 = vld [vmem:[%s8572_s1 + $0x1f0] sm:$0xff] }
  0xb2   : > { %v6731_v31 = vadd.f32 %v760_v28, %v623_v21  ;;  %2125 = vmatpush.bf16.msra.mxu3 %v5989_v61 }
  0xb3   : > { %1657 = vmatpush.bf16.msrb.mxu1 %v5972_v10 }
  0xb6   : > { %v663_v33 = vpop.f32.mrf.mxu2  ;;  %2126 = vmatpush.bf16.msra.mxu3 %v5988_v37 }
  0xb8   : > { %657 = vmatmul.bf16.gmra.mxu0 %v6698_v63  ;;  %v6743_v36 = vpop.f32.mrf.mxu0 }
  0xb9   : > { %697 = vmatmul.bf16.gmra.mxu2 %v548_v0  ;;  %v6752_v52 = vpop.f32.mrf.mxu1 }
  0xbb   : > { %814 = vmatmul.bf16.gmra.mxu3 %v480_v14  ;;  %v5971_v14 = vld [vmem:[%s8572_s1 + $0x160] sm:$0xff] }
  0xbc   : > { %1658 = vmatpush.bf16.msrb.mxu1 %v5971_v14 }
  0xbd   : > { %779 = vmatmul.bf16.gmra.mxu1 %v6644_v15 }
  0xbe   : > { %v665_v40 = vpop.f32.mrf.mxu2 }
  0xc0   : > { %1659 = vmatpush.bf16.msrb.mxu1 %v5970_v19  ;;  %v628_v49 = vpop.f32.mrf.mxu0 }
  0xc4   : > { %1660 = vmatpush.bf16.msrb.mxu1 %v5969_v29 }
  0xc6   : > { %v668_v50 = vpop.f32.mrf.mxu2 }
  0xc8   : > { %1429 = vmatmul.bf16.vlgmr.msrb.gmra.mxu0 %v6520_v45  ;;  %v5982_v45 = vld [vmem:[%s8572_s1 + $0x1b8] sm:$0xff]  ;;  %1661 = vmatpush.bf16.msrb.mxu1 %v5968_v34  ;;  %v630_v51 = vpop.f32.mrf.mxu0  ;;  %v5980_v34 = vld [vmem:[%s8572_s1 + $0x1a8] sm:$0xff] }
  0xc9   : > { %961 = vmatmul.bf16.vlgmr.msrb.gmra.mxu2 %v872_v16 }
  0xca   : > { %1890 = vmatpush.bf16.msra.mxu2 %v5982_v45 }
  0xcb   : > { %819 = vmatmul.bf16.gmra.mxu3 %v481_v41  ;;  %v468_v41 = vld [vmem:[#allocation2 + $0x170] sm:$0xff] }
  0xcc   : > { %1662 = vmatpush.bf16.msrb.mxu1 %v5967_v38  ;;  %v484_v48 = vpack.c.bf16 %v468_v41, %v467_v39 }
  0xcd   : > { %784 = vmatmul.bf16.gmra.mxu1 %v6671_v42 }
  0xce   : > { %v670_v53 = vpop.f32.mrf.mxu2  ;;  %1891 = vmatpush.bf16.msra.mxu2 %v5981_v60 }
  0xd0   : > { %v633_v58 = vpop.f32.mrf.mxu0 }
  0xd2   : > { %1892 = vmatpush.bf16.msra.mxu2 %v5980_v34  ;;  %v1323_v34 = vld [vmem:[#allocation2 + $0xc9] sm:$0xff] }
  0xd6   : > { %v673_v0 = vpop.f32.mrf.mxu2 }
  0xd8   : > { %1434 = vmatmul.bf16.gmra.mxu0 %v6560_v62  ;;  %v635_v2 = vpop.f32.mrf.mxu0 }
  0xd9   : > { %966 = vmatmul.bf16.gmra.mxu2 %v1574_v46 }
  0xdb   : > { %824 = vmatmul.bf16.gmra.mxu3 %v482_v4 }
  0xdd   : > { %789 = vmatmul.bf16.gmra.mxu1 %v6701_v6 }
  0xde   : > { %v675_v4 = vpop.f32.mrf.mxu2 }
  0xe0   : > { %v638_v12 = vpop.f32.mrf.mxu0 }
  0xe6   : > { %v678_v16 = vpop.f32.mrf.mxu2 }
  0xe8   : > { %1439 = vmatmul.bf16.gmra.mxu0 %v6587_v22  ;;  %v640_v19 = vpop.f32.mrf.mxu0 }
  0xe9   : > { %971 = vmatmul.bf16.gmra.mxu2 %v1575_v57 }
  0xeb   : > { %829 = vmatmul.bf16.gmra.mxu3 %v483_v26  ;;  %v1549_v26 = vld [vmem:[#allocation2 + $0x6a] sm:$0xff] }
  0xec   : > { %v1577_v28 = vpack.c.bf16 %v1549_v26, %v1548_v24  ;;  %v1555_v24 = vld [vmem:[#allocation2 + $0xb2] sm:$0xff] }
  0xed   : > { %794 = vmatmul.bf16.gmra.mxu1 %v6726_v27 }
  0xf8   : > { %1444 = vmatmul.bf16.gmra.mxu0 %v6614_v47  ;;  %v680_v47 = vpop.f32.mrf.mxu2 }
  0xf9   : > { %976 = vmatmul.bf16.gmra.mxu2 %v1576_v9 }
  0xfb   : > { %834 = vmatmul.bf16.gmra.mxu3 %v484_v48  ;;  %v1551_v48 = vld [vmem:[#allocation2 + $0x82] sm:$0xff] }
  0xfd   : > { %1663 = vmatmul.bf16.vlgmr.msrb.gmra.mxu1 %v1574_v46  ;;  %v1550_v46 = vld [vmem:[#allocation2 + $0x7a] sm:$0xff] }
 0x108   : > { %1449 = vmatmul.bf16.gmra.mxu0 %v6641_v8 }
 0x109   : > { %981 = vmatmul.bf16.gmra.mxu2 %v1577_v28 }
 0x10a   : > { %v765_v59 = vpop.f32.mrf.mxu1 }
 0x10b   : > { %1195 = vmatmul.bf16.vlgmr.msrb.gmra.mxu3 %v6563_v5  ;;  %v6756_v62 = vadd.f32 %v765_v59, %v628_v49  ;;  %v5997_v5 = vld [vmem:[%s8572_s1 + $0x230] sm:$0xff]  ;;  %v1578_v49 = vpack.c.bf16 %v1551_v48, %v1550_v46 }
 0x10c   : > { %2359 = vmatpush.bf16.msra.mxu0 %v5997_v5  ;;  %v683_v8 = vpop.f32.mrf.mxu2 }
 0x10d   : > { %1668 = vmatmul.bf16.gmra.mxu1 %v1575_v57 }
 0x10e   : > { %v800_v22 = vpop.f32.mrf.mxu3 }
 0x10f   : > { %v6764_v1 = vadd.f32 %v800_v22, %v663_v33  ;;  %v1552_v22 = vld [vmem:[#allocation2 + $0x92] sm:$0xff] }
 0x112   : > { %v767_v20 = vpop.f32.mrf.mxu1 }
 0x113   : > { %v6769_v3 = vadd.f32 %v767_v20, %v630_v51 }
 0x114   : > { %v685_v44 = vpop.f32.mrf.mxu2 }
 0x116   : > { %v802_v10 = vpop.f32.mrf.mxu3 }
 0x117   : > { %v6772_v11 = vadd.f32 %v802_v10, %v665_v40  ;;  %v5987_v10 = vld [vmem:[%s8572_s1 + $0x1e0] sm:$0xff] }
 0x118   : > { %1454 = vmatmul.bf16.gmra.mxu0 %v6668_v35  ;;  %2127 = vmatpush.bf16.msra.mxu3 %v5987_v10 }
 0x119   : > { %986 = vmatmul.bf16.gmra.mxu2 %v1578_v49 }
 0x11a   : > { %v770_v13 = vpop.f32.mrf.mxu1 }
 0x11b   : > { %1200 = vmatmul.bf16.gmra.mxu3 %v6590_v30  ;;  %v6775_v14 = vadd.f32 %v770_v13, %v633_v58  ;;  %v643_v30 = vpop.f32.mrf.mxu0 }
 0x11c   : > { %v688_v57 = vpop.f32.mrf.mxu2 }
 0x11d   : > { %1673 = vmatmul.bf16.gmra.mxu1 %v1576_v9  ;;  %v5979_v9 = vld [vmem:[%s8572_s1 + $0x1a0] sm:$0xff] }
 0x11e   : > { %v805_v17 = vpop.f32.mrf.mxu3  ;;  %1893 = vmatpush.bf16.msra.mxu2 %v5979_v9 }
 0x11f   : > { %v6777_v18 = vadd.f32 %v805_v17, %v668_v50 }
 0x122   : > { %v772_v21 = vpop.f32.mrf.mxu1 }
 0x123   : > { %v6779_v23 = vadd.f32 %v772_v21, %v635_v2  ;;  %v645_v40 = vpop.f32.mrf.mxu0  ;;  %v1553_v2 = vld [vmem:[#allocation2 + $0x9a] sm:$0xff] }
 0x124   : > { %v690_v35 = vpop.f32.mrf.mxu2  ;;  %v1579_v5 = vpack.c.bf16 %v1553_v2, %v1552_v22  ;;  %v1325_v22 = vld [vmem:[#allocation2 + $0xe1] sm:$0xff] }
 0x126   : > { %v807_v29 = vpop.f32.mrf.mxu3 }
 0x127   : > { %v6782_v45 = vadd.f32 %v807_v29, %v670_v53 }
 0x128   : > { %1459 = vmatmul.bf16.gmra.mxu0 %v6698_v63 }
 0x129   : > { %991 = vmatmul.bf16.gmra.mxu2 %v1579_v5 }
 0x12a   : > { %v775_v32 = vpop.f32.mrf.mxu1 }
 0x12b   : > { %1205 = vmatmul.bf16.gmra.mxu3 %v6617_v54  ;;  %v6785_v33 = vadd.f32 %v775_v32, %v638_v12  ;;  %v5996_v54 = vld [vmem:[%s8572_s1 + $0x228] sm:$0xff]  ;;  %v648_v53 = vpop.f32.mrf.mxu0 }
 0x12c   : > { %2360 = vmatpush.bf16.msra.mxu0 %v5996_v54  ;;  %v693_v63 = vpop.f32.mrf.mxu2  ;;  %v1322_v32 = vld [vmem:[#allocation2 + $0xc1] sm:$0xff] }
 0x12d   : > { %1678 = vmatmul.bf16.gmra.mxu1 %v1577_v28  ;;  %v1347_v37 = vpack.c.bf16 %v1323_v34, %v1322_v32 }
 0x12e   : > { %v810_v38 = vpop.f32.mrf.mxu3 }
 0x12f   : > { %v6793_v39 = vadd.f32 %v810_v38, %v673_v0 }
 0x132   : > { %v777_v41 = vpop.f32.mrf.mxu1 }
 0x133   : > { %v6798_v43 = vadd.f32 %v777_v41, %v640_v19  ;;  %v650_v60 = vpop.f32.mrf.mxu0 }
 0x134   : > { %v695_v21 = vpop.f32.mrf.mxu2 }
 0x136   : > { %v812_v50 = vpop.f32.mrf.mxu3 }
 0x137   : > { %v6801_v51 = vadd.f32 %v812_v50, %v675_v4  ;;  %v1556_v50 = vld [vmem:[#allocation2 + $0xc2] sm:$0xff] }
 0x138   : > { %1464 = vmatmul.bf16.gmra.mxu0 %v1347_v37  ;;  %v1326_v37 = vld [vmem:[#allocation2 + $0xf1] sm:$0xff] }
 0x13a   : > { %v780_v55 = vpop.f32.mrf.mxu1 }
 0x13b   : > { %1210 = vmatmul.bf16.gmra.mxu3 %v6644_v15  ;;  %v6804_v56 = vadd.f32 %v780_v55, %v643_v30  ;;  %v653_v15 = vpop.f32.mrf.mxu0 }
 0x13d   : > { %1683 = vmatmul.bf16.gmra.mxu1 %v1578_v49 }
 0x13e   : > { %v815_v58 = vpop.f32.mrf.mxu3 }
 0x13f   : > { %v6806_v59 = vadd.f32 %v815_v58, %v678_v16 }
 0x142   : > { %v782_v61 = vpop.f32.mrf.mxu1 }
 0x143   : > { %v6808_v0 = vadd.f32 %v782_v61, %v645_v40  ;;  %v655_v16 = vpop.f32.mrf.mxu0  ;;  %v698_v40 = vpop.f32.mrf.mxu2  ;;  %v1324_v61 = vld [vmem:[#allocation2 + $0xd9] sm:$0xff] }
 0x144   : > { %v1348_v2 = vpack.c.bf16 %v1325_v22, %v1324_v61  ;;  %v1090_v22 = vld [vmem:[#allocation2 + $0xd8] sm:$0xff] }
 0x146   : > { %v817_v20 = vpop.f32.mrf.mxu3 }
 0x147   : > { %v6811_v4 = vadd.f32 %v817_v20, %v680_v47  ;;  %v1554_v47 = vld [vmem:[#allocation2 + $0xaa] sm:$0xff]  ;;  %v5978_v20 = vld [vmem:[%s8572_s1 + $0x198] sm:$0xff] }
 0x148   : > { %v1580_v26 = vpack.c.bf16 %v1555_v24, %v1554_v47  ;;  %1469 = vmatmul.bf16.gmra.mxu0 %v1348_v2  ;;  %1894 = vmatpush.bf16.msra.mxu2 %v5978_v20  ;;  %v1089_v24 = vld [vmem:[#allocation2 + $0xc8] sm:$0xff] }
 0x14a   : > { %v785_v25 = vpop.f32.mrf.mxu1  ;;  %996 = vmatmul.bf16.gmra.mxu2 %v1580_v26 }
 0x14b   : > { %1215 = vmatmul.bf16.gmra.mxu3 %v6671_v42  ;;  %v6814_v7 = vadd.f32 %v785_v25, %v648_v53  ;;  %v5995_v42 = vld [vmem:[%s8572_s1 + $0x220] sm:$0xff]  ;;  %v658_v30 = vpop.f32.mrf.mxu0  ;;  %v6838_v49 = vpop.f32.mrf.mxu2  ;;  %v1557_v53 = vld [vmem:[#allocation2 + $0xca] sm:$0xff] }
 0x14c   : > { %2361 = vmatpush.bf16.msra.mxu0 %v5995_v42  ;;  %v1581_v55 = vpack.c.bf16 %v1557_v53, %v1556_v50  ;;  %v1088_v42 = vld [vmem:[#allocation2 + $0xc0] sm:$0xff] }
 0x14d   : > { %1688 = vmatmul.bf16.gmra.mxu1 %v1579_v5 }
 0x14e   : > { %v820_v12 = vpop.f32.mrf.mxu3 }
 0x14f   : > { %v6822_v13 = vadd.f32 %v820_v12, %v683_v8  ;;  %v763_v12 = vadd.f32 %v6752_v52, %v6743_v36  ;;  %v1113_v36 = vpack.c.bf16 %v1089_v24, %v1088_v42  ;;  %v1328_v42 = vld [vmem:[#allocation2 + $0x109] sm:$0xff] }
 0x152   : > { %v787_v17 = vpop.f32.mrf.mxu1 }
 0x153   : > { %v6827_v19 = vadd.f32 %v787_v17, %v650_v60  ;;  %v660_v46 = vpop.f32.mrf.mxu0 }
 0x156   : > { %v822_v28 = vpop.f32.mrf.mxu3 }
 0x157   : > { %v6829_v29 = vadd.f32 %v822_v28, %v685_v44  ;;  %v1558_v28 = vld [vmem:[#allocation2 + $0xda] sm:$0xff] }
 0x15a   : > { %v790_v8 = vpop.f32.mrf.mxu1  ;;  %1001 = vmatmul.bf16.gmra.mxu2 %v1581_v55 }
 0x15b   : > { %1220 = vmatmul.bf16.gmra.mxu3 %v6701_v6  ;;  %v6832_v38 = vadd.f32 %v790_v8, %v653_v15  ;;  %v6842_v6 = vpop.f32.mrf.mxu0  ;;  %v962_v15 = vpop.f32.mrf.mxu2  ;;  %v1327_v8 = vld [vmem:[#allocation2 + $0xf9] sm:$0xff] }
 0x15c   : > { %v6854_v25 = vadd.f32 %v962_v15, %v6731_v31  ;;  %v5994_v31 = vld [vmem:[%s8572_s1 + $0x218] sm:$0xff] }
 0x15d   : > { %1693 = vmatmul.bf16.gmra.mxu1 %v1580_v26  ;;  %2362 = vmatpush.bf16.msra.mxu0 %v5994_v31  ;;  %v1329_v31 = vld [vmem:[#allocation2 + $0x111] sm:$0xff] }
 0x15e   : > { %v825_v54 = vpop.f32.mrf.mxu3 }
 0x15f   : > { %v6834_v41 = vadd.f32 %v825_v54, %v688_v57  ;;  %v1349_v54 = vpack.c.bf16 %v1327_v8, %v1326_v37 }
 0x161   : > { %1474 = vmatmul.bf16.gmra.mxu0 %v1349_v54 }
 0x162   : > { %v792_v48 = vpop.f32.mrf.mxu1 }
 0x163   : > { %v6836_v44 = vadd.f32 %v792_v48, %v655_v16  ;;  %v6858_v10 = vpop.f32.mrf.mxu0  ;;  %v964_v47 = vpop.f32.mrf.mxu2 }
 0x164   : > { %v6867_v26 = vadd.f32 %v964_v47, %v763_v12  ;;  %v1350_v47 = vpack.c.bf16 %v1329_v31, %v1328_v42  ;;  %v1331_v42 = vld [vmem:[#allocation2 + $0x129] sm:$0xff] }
 0x166   : > { %v827_v58 = vpop.f32.mrf.mxu3 }
 0x167   : > { %v6840_v60 = vadd.f32 %v827_v58, %v690_v35  ;;  %v5986_v35 = vld [vmem:[%s8572_s1 + $0x1d8] sm:$0xff] }
 0x168   : > { %2128 = vmatpush.bf16.msra.mxu3 %v5986_v35  ;;  %v1561_v35 = vld [vmem:[#allocation2 + $0xfa] sm:$0xff] }
 0x16a   : > { %v795_v57 = vpop.f32.mrf.mxu1 }
 0x16b   : > { %1225 = vmatmul.bf16.gmra.mxu3 %v6726_v27  ;;  %v6845_v5 = vadd.f32 %v795_v57, %v658_v30  ;;  %v6873_v52 = vpop.f32.mrf.mxu0  ;;  %v967_v48 = vpop.f32.mrf.mxu2  ;;  %v1091_v57 = vld [vmem:[#allocation2 + $0xe0] sm:$0xff] }
 0x16c   : > { %v6877_v50 = vadd.f32 %v967_v48, %v6756_v62  ;;  %v1560_v62 = vld [vmem:[#allocation2 + $0xf2] sm:$0xff]  ;;  %v1114_v12 = vpack.c.bf16 %v1091_v57, %v1090_v22  ;;  %v1562_v57 = vld [vmem:[#allocation2 + $0x10a] sm:$0xff] }
 0x16d   : > { %1698 = vmatmul.bf16.gmra.mxu1 %v1581_v55  ;;  %v6014_v55 = vld [vmem:[%s8573_s2 + $0x78] sm:$0xff]  ;;  %v6890_v15 = vpack.c.bf16 %v1561_v35, %v1560_v62 }
 0x16e   : > { %v830_v9 = vpop.f32.mrf.mxu3  ;;  %2909 = vmatpush.bf16.msra.mxu1 %v6014_v55  ;;  %v1093_v22 = vld [vmem:[#allocation2 + $0xf8] sm:$0xff] }
 0x16f   : > { %v6856_v27 = vadd.f32 %v830_v9, %v693_v63  ;;  %v1559_v63 = vld [vmem:[#allocation2 + $0xe2] sm:$0xff]  ;;  %v1563_v62 = vld [vmem:[#allocation2 + $0x112] sm:$0xff] }
 0x170   : > { %v6869_v30 = vpack.c.bf16 %v1559_v63, %v1558_v28 }
 0x171   : > { %1479 = vmatmul.bf16.gmra.mxu0 %v1350_v47 }
 0x172   : > { %v797_v16 = vpop.f32.mrf.mxu1  ;;  %1006 = vmatmul.bf16.gmra.mxu2 %v6869_v30 }
 0x173   : > { %v6862_v17 = vadd.f32 %v797_v16, %v660_v46  ;;  %v6885_v58 = vpop.f32.mrf.mxu0  ;;  %v969_v2 = vpop.f32.mrf.mxu2 }
 0x174   : > { %v6888_v20 = vadd.f32 %v969_v2, %v6769_v3  ;;  %v5977_v3 = vld [vmem:[%s8572_s1 + $0x190] sm:$0xff] }
 0x175   : > { %1895 = vmatpush.bf16.msra.mxu2 %v5977_v3 }
 0x176   : > { %v832_v32 = vpop.f32.mrf.mxu3 }
 0x177   : > { %v6871_v34 = vadd.f32 %v832_v32, %v695_v21 }
 0x17a   : > { %v1664_v46 = vpop.f32.mrf.mxu1 }
 0x17b   : > { %1230 = vmatmul.bf16.gmra.mxu3 %v1113_v36  ;;  %v6895_v16 = vpop.f32.mrf.mxu0  ;;  %v972_v28 = vpop.f32.mrf.mxu2 }
 0x17c   : > { %v6905_v63 = vadd.f32 %v972_v28, %v6775_v14  ;;  %v5993_v14 = vld [vmem:[%s8572_s1 + $0x210] sm:$0xff] }
 0x17d   : > { %1703 = vmatmul.bf16.gmra.mxu1 %v6869_v30  ;;  %2363 = vmatpush.bf16.msra.mxu0 %v5993_v14  ;;  %v1094_v14 = vld [vmem:[#allocation2 + $0x108] sm:$0xff] }
 0x17e   : > { %v835_v53 = vpop.f32.mrf.mxu3 }
 0x17f   : > { %v6880_v21 = vadd.f32 %v835_v53, %v698_v40  ;;  %v1092_v53 = vld [vmem:[#allocation2 + $0xf0] sm:$0xff] }
 0x182   : > { %v1666_v61 = vpop.f32.mrf.mxu1  ;;  %1011 = vmatmul.bf16.gmra.mxu2 %v6890_v15 }
 0x183   : > { %v6909_v37 = vpop.f32.mrf.mxu0  ;;  %v974_v55 = vpop.f32.mrf.mxu2 }
 0x184   : > { %v6918_v2 = vadd.f32 %v974_v55, %v6779_v23 }
 0x186   : > { %v837_v40 = vpop.f32.mrf.mxu3 }
 0x187   : > { %v6893_v9 = vadd.f32 %v837_v40, %v6838_v49  ;;  %v5985_v49 = vld [vmem:[%s8572_s1 + $0x1d0] sm:$0xff]  ;;  %v1115_v40 = vpack.c.bf16 %v1093_v22, %v1092_v53 }
 0x188   : > { %2129 = vmatpush.bf16.msra.mxu3 %v5985_v49 }
 0x18a   : > { %v1669_v24 = vpop.f32.mrf.mxu1 }
 0x18b   : > { %1235 = vmatmul.bf16.gmra.mxu3 %v1114_v12  ;;  %v1330_v12 = vld [vmem:[#allocation2 + $0x121] sm:$0xff]  ;;  %v977_v49 = vpop.f32.mrf.mxu2 }
 0x18c   : > { %v1351_v47 = vpack.c.bf16 %v1331_v42, %v1330_v12  ;;  %v6927_v28 = vadd.f32 %v977_v49, %v6785_v33  ;;  %v1095_v33 = vld [vmem:[#allocation2 + $0x110] sm:$0xff]  ;;  %v1333_v12 = vld [vmem:[#allocation2 + $0x141] sm:$0xff] }
 0x18d   : > { %1708 = vmatmul.bf16.gmra.mxu1 %v6890_v15 }
 0x18e   : > { %v1196_v32 = vpop.f32.mrf.mxu3  ;;  %1484 = vmatmul.bf16.gmra.mxu0 %v1351_v47 }
 0x18f   : > { %v1276_v36 = vadd.f32 %v1196_v32, %v6854_v25  ;;  %v1584_v25 = vpack.c.bf16 %v1563_v62, %v1562_v57  ;;  %v1564_v57 = vld [vmem:[#allocation2 + $0x122] sm:$0xff] }
 0x191   : > { %v1510_v8 = vadd.f32 %v6842_v6, %v1276_v36  ;;  %v6013_v36 = vld [vmem:[%s8573_s2 + $0x70] sm:$0xff] }
 0x192   : > { %v1671_v54 = vpop.f32.mrf.mxu1  ;;  %1016 = vmatmul.bf16.gmra.mxu2 %v1584_v25  ;;  %2910 = vmatpush.bf16.msra.mxu1 %v6013_v36 }
 0x193   : > { %v6912_v48 = vadd.f32 %v1664_v46, %v1510_v8  ;;  %v6921_v46 = vpop.f32.mrf.mxu0  ;;  %v979_v55 = vpop.f32.mrf.mxu2 }
 0x194   : > { %v6939_v22 = vadd.f32 %v979_v55, %v6798_v43  ;;  %v5976_v43 = vld [vmem:[%s8572_s1 + $0x188] sm:$0xff]  ;;  %v1096_v55 = vld [vmem:[#allocation2 + $0x120] sm:$0xff] }
 0x195   : > { %1896 = vmatpush.bf16.msra.mxu2 %v5976_v43 }
 0x196   : > { %v1198_v35 = vpop.f32.mrf.mxu3 }
 0x197   : > { %v1277_v6 = vadd.f32 %v1198_v35, %v6867_v26 }
 0x199   : > { %v1511_v31 = vadd.f32 %v6858_v10, %v1277_v6  ;;  %v1116_v6 = vpack.c.bf16 %v1095_v33, %v1094_v14  ;;  %v5992_v33 = vld [vmem:[%s8572_s1 + $0x208] sm:$0xff] }
 0x19a   : > { %v1674_v3 = vpop.f32.mrf.mxu1  ;;  %2364 = vmatpush.bf16.msra.mxu0 %v5992_v33  ;;  %v1098_v33 = vld [vmem:[#allocation2 + $0x138] sm:$0xff] }
 0x19b   : > { %1240 = vmatmul.bf16.gmra.mxu3 %v1115_v40  ;;  %v6924_v23 = vadd.f32 %v1666_v61, %v1511_v31  ;;  %v6933_v8 = vpop.f32.mrf.mxu0  ;;  %v982_v49 = vpop.f32.mrf.mxu2 }
 0x19d   : > { %1713 = vmatmul.bf16.gmra.mxu1 %v1584_v25 }
 0x19e   : > { %v1201_v26 = vpop.f32.mrf.mxu3 }
 0x19f   : > { %v1278_v32 = vadd.f32 %v1201_v26, %v6877_v50  ;;  %v1565_v50 = vld [vmem:[#allocation2 + $0x12a] sm:$0xff]  ;;  %v6954_v26 = vadd.f32 %v982_v49, %v6804_v56 }
 0x1a0   : > { %v1585_v62 = vpack.c.bf16 %v1565_v50, %v1564_v57  ;;  %v1097_v57 = vld [vmem:[#allocation2 + $0x128] sm:$0xff] }
 0x1a1   : > { %v1512_v10 = vadd.f32 %v6873_v52, %v1278_v32  ;;  %v1332_v52 = vld [vmem:[#allocation2 + $0x139] sm:$0xff] }
 0x1a2   : > { %v1676_v61 = vpop.f32.mrf.mxu1  ;;  %1021 = vmatmul.bf16.gmra.mxu2 %v1585_v62  ;;  %v1352_v42 = vpack.c.bf16 %v1333_v12, %v1332_v52  ;;  %v1334_v52 = vld [vmem:[#allocation2 + $0x151] sm:$0xff]  ;;  %v1335_v12 = vld [vmem:[#allocation2 + $0x159] sm:$0xff] }
 0x1a3   : > { %v6936_v53 = vadd.f32 %v1669_v24, %v1512_v10  ;;  %v6942_v40 = vpop.f32.mrf.mxu0  ;;  %v984_v56 = vpop.f32.mrf.mxu2 }
 0x1a4   : > { %1489 = vmatmul.bf16.gmra.mxu0 %v1352_v42  ;;  %v6966_v50 = vadd.f32 %v984_v56, %v6808_v0  ;;  %v1353_v42 = vpack.c.bf16 %v1335_v12, %v1334_v52  ;;  %v1099_v56 = vld [vmem:[#allocation2 + $0x140] sm:$0xff] }
 0x1a6   : > { %v1203_v25 = vpop.f32.mrf.mxu3 }
 0x1a7   : > { %v1279_v35 = vadd.f32 %v1203_v25, %v6888_v20  ;;  %v5984_v20 = vld [vmem:[%s8572_s1 + $0x1c8] sm:$0xff] }
 0x1a8   : > { %2130 = vmatpush.bf16.msra.mxu3 %v5984_v20  ;;  %v1567_v25 = vld [vmem:[#allocation2 + $0x142] sm:$0xff] }
 0x1a9   : > { %v1513_v24 = vadd.f32 %v6885_v58, %v1279_v35 }
 0x1aa   : > { %v1679_v31 = vpop.f32.mrf.mxu1 }
 0x1ab   : > { %1245 = vmatmul.bf16.gmra.mxu3 %v1116_v6  ;;  %v6945_v47 = vadd.f32 %v1671_v54, %v1513_v24  ;;  %v6957_v32 = vpop.f32.mrf.mxu0  ;;  %v1117_v6 = vpack.c.bf16 %v1097_v57, %v1096_v55  ;;  %v987_v20 = vpop.f32.mrf.mxu2 }
 0x1ac   : > { %v6975_v49 = vadd.f32 %v987_v20, %v6814_v7 }
 0x1ad   : > { %1718 = vmatmul.bf16.gmra.mxu1 %v1585_v62  ;;  %v1566_v62 = vld [vmem:[#allocation2 + $0x13a] sm:$0xff] }
 0x1ae   : > { %v1206_v58 = vpop.f32.mrf.mxu3 }
 0x1af   : > { %v1280_v54 = vadd.f32 %v1206_v58, %v6905_v63  ;;  %v1586_v63 = vpack.c.bf16 %v1567_v25, %v1566_v62  ;;  %v1569_v62 = vld [vmem:[#allocation2 + $0x15a] sm:$0xff] }
 0x1b1   : > { %v1514_v36 = vadd.f32 %v6895_v16, %v1280_v54  ;;  %v6012_v54 = vld [vmem:[%s8573_s2 + $0x68] sm:$0xff] }
 0x1b2   : > { %v1681_v10 = vpop.f32.mrf.mxu1  ;;  %1026 = vmatmul.bf16.gmra.mxu2 %v1586_v63  ;;  %2911 = vmatpush.bf16.msra.mxu1 %v6012_v54 }
 0x1b3   : > { %v6960_v14 = vadd.f32 %v1674_v3, %v1514_v36  ;;  %v6969_v3 = vpop.f32.mrf.mxu0  ;;  %v989_v7 = vpop.f32.mrf.mxu2 }
 0x1b4   : > { %1494 = vmatmul.bf16.gmra.mxu0 %v1353_v42  ;;  %v6989_v57 = vadd.f32 %v989_v7, %v6827_v19  ;;  %v5983_v42 = vld [vmem:[%s8572_s1 + $0x1c0] sm:$0xff] }
 0x1b5   : > { %2131 = vmatpush.bf16.msra.mxu3 %v5983_v42 }
 0x1b6   : > { %v1208_v35 = vpop.f32.mrf.mxu3 }
 0x1b7   : > { %v1281_v16 = vadd.f32 %v1208_v35, %v6918_v2 }
 0x1b9   : > { %v1515_v24 = vadd.f32 %v6909_v37, %v1281_v16  ;;  %v1118_v16 = vpack.c.bf16 %v1099_v56, %v1098_v33 }
 0x1ba   : > { %v1684_v43 = vpop.f32.mrf.mxu1 }
 0x1bb   : > { %1250 = vmatmul.bf16.gmra.mxu3 %v1117_v6  ;;  %v6972_v0 = vadd.f32 %v1676_v61, %v1515_v24  ;;  %v6981_v36 = vpop.f32.mrf.mxu0  ;;  %v1337_v6 = vld [vmem:[#allocation2 + $0x171] sm:$0xff]  ;;  %v992_v20 = vpop.f32.mrf.mxu2 }
 0x1bd   : > { %1723 = vmatmul.bf16.gmra.mxu1 %v1586_v63 }
 0x1be   : > { %v1211_v2 = vpop.f32.mrf.mxu3 }
 0x1bf   : > { %v1282_v58 = vadd.f32 %v1211_v2, %v6927_v28  ;;  %v1568_v28 = vld [vmem:[#allocation2 + $0x152] sm:$0xff]  ;;  %v7004_v2 = vadd.f32 %v992_v20, %v6832_v38  ;;  %v6139_v38 = vld [vmem:[%s8574_s3 + $0x1] ss:$0 sm:$0xff] }
 0x1c0   : > { %v1587_v25 = vpack.c.bf16 %v1569_v62, %v1568_v28 }
 0x1c1   : > { %v1516_v37 = vadd.f32 %v6921_v46, %v1282_v58  ;;  %v280_v58 = vld [vmem:[%s6447_s15 + $0xf0] sm:$0xff] }
 0x1c2   : > { %v6984_v61 = vpop.f32.mrf.mxu1  ;;  %1031 = vmatmul.bf16.gmra.mxu2 %v1587_v25 }
 0x1c3   : > { %v6986_v55 = vadd.f32 %v1679_v31, %v1516_v37  ;;  %v6992_v46 = vpop.f32.mrf.mxu0  ;;  %v1336_v31 = vld [vmem:[#allocation2 + $0x169] sm:$0xff] }
 0x1c4   : > { %v1354_v12 = vpack.c.bf16 %v1337_v6, %v1336_v31  ;;  %v994_v31 = vpop.f32.mrf.mxu2  ;;  %v1101_v6 = vld [vmem:[#allocation2 + $0x158] sm:$0xff] }
 0x1c6   : > { %v1213_v63 = vpop.f32.mrf.mxu3  ;;  %1499 = vmatmul.bf16.gmra.mxu0 %v1354_v12  ;;  %v1570_v12 = vld [vmem:[#allocation2 + $0x16a] sm:$0xff] }
 0x1c7   : > { %v1283_v35 = vadd.f32 %v1213_v63, %v6939_v22  ;;  %v5975_v22 = vld [vmem:[%s8572_s1 + $0x180] sm:$0xff] }
 0x1c8   : > { %1897 = vmatpush.bf16.msra.mxu2 %v5975_v22  ;;  %v1571_v22 = vld [vmem:[#allocation2 + $0x172] sm:$0xff] }
 0x1c9   : > { %v1517_v52 = vadd.f32 %v6933_v8, %v1283_v35  ;;  %v281_v8 = vld [vmem:[%s6447_s15 + $0xf8] sm:$0xff]  ;;  %v1588_v42 = vpack.c.bf16 %v1571_v22, %v1570_v12 }
 0x1ca   : > { %v1689_v24 = vpop.f32.mrf.mxu1 }
 0x1cb   : > { %1255 = vmatmul.bf16.gmra.mxu3 %v1118_v16  ;;  %v6995_v19 = vadd.f32 %v1681_v10, %v1517_v52  ;;  %v6138_v10 = vld [vmem:[%s8574_s3] ss:$0 sm:$0xff]  ;;  %v7012_v56 = vpop.f32.mrf.mxu0  ;;  %v1100_v16 = vld [vmem:[#allocation2 + $0x150] sm:$0xff]  ;;  %v1055_v52 = vadd.f32 %v994_v31, %v6836_v44 }
 0x1cc   : > { %v315_v54 = vmul.f32 %v6138_v10, %v280_v58  ;;  %v316_v37 = vmul.f32 %v6138_v10, %v281_v8  ;;  %v1119_v58 = vpack.c.bf16 %v1101_v6, %v1100_v16  ;;  %v1103_v16 = vld [vmem:[#allocation2 + $0x170] sm:$0xff] }
 0x1cd   : > { %1728 = vmatmul.bf16.gmra.mxu1 %v1587_v25 }
 0x1ce   : > { %v1216_v33 = vpop.f32.mrf.mxu3  ;;  %v348_v28 = vadd.f32 %v6139_v38, %v315_v54  ;;  %v349_v62 = vadd.f32 %v6139_v38, %v316_v37  ;;  %v997_v37 = vpop.f32.mrf.mxu2 }
 0x1cf   : > { %v1284_v7 = vadd.f32 %v1216_v33, %v6954_v26  ;;  %v5991_v26 = vld [vmem:[%s8572_s1 + $0x200] sm:$0xff]  ;;  %v7033_v44 = vadd.f32 %v997_v37, %v6845_v5  ;;  %v1102_v5 = vld [vmem:[#allocation2 + $0x168] sm:$0xff] }
 0x1d0   : > { %435 = vst [vmem:[#allocation2 + $0x181] sm:$0xff] %v348_v28  ;;  %2365 = vmatpush.bf16.msra.mxu0 %v5991_v26  ;;  %v1355_v10 = vpack.c.bf16 %v349_v62, %v348_v28  ;;  %v1120_v22 = vpack.c.bf16 %v1103_v16, %v1102_v5 }
 0x1d1   : > { %v1518_v25 = vadd.f32 %v6942_v40, %v1284_v7  ;;  %436 = vst [vmem:[#allocation2 + $0x189] sm:$0xff] %v349_v62 }
 0x1d2   : > { %v7018_v63 = vpop.f32.mrf.mxu1  ;;  %1036 = vmatmul.bf16.gmra.mxu2 %v1588_v42 }
 0x1d3   : > { %v7020_v35 = vadd.f32 %v1684_v43, %v1518_v25  ;;  %v7027_v43 = vpop.f32.mrf.mxu0 }
 0x1d6   : > { %v1218_v40 = vpop.f32.mrf.mxu3  ;;  %1504 = vmatmul.bf16.gmra.mxu0 %v1355_v10  ;;  %v999_v25 = vpop.f32.mrf.mxu2  ;;  %v2246_v10 = vld [vmem:[#allocation2 + $0x3a] sm:$0xff] }
 0x1d7   : > { %v1285_v20 = vadd.f32 %v1218_v40, %v6966_v50  ;;  %v6011_v50 = vld [vmem:[%s8573_s2 + $0x60] sm:$0xff]  ;;  %v1057_v26 = vadd.f32 %v999_v25, %v6862_v17  ;;  %v1778_v40 = vld [vmem:[#allocation2 + $0x38] sm:$0xff] }
 0x1d8   : > { %2912 = vmatpush.bf16.msra.mxu1 %v6011_v50  ;;  %v1573_v6 = vld [vmem:[#allocation2 + $0x18a] sm:$0xff] }
 0x1d9   : > { %v7030_v8 = vadd.f32 %v6957_v32, %v1285_v20 }
 0x1da   : > { %v1694_v54 = vpop.f32.mrf.mxu1 }
 0x1db   : > { %1260 = vmatmul.bf16.gmra.mxu3 %v1119_v58  ;;  %v7039_v38 = vpop.f32.mrf.mxu0  ;;  %v2245_v58 = vld [vmem:[#allocation2 + $0x32] sm:$0xff] }
 0x1dd   : > { %1733 = vmatmul.bf16.gmra.mxu1 %v1588_v42  ;;  %v1777_v42 = vld [vmem:[#allocation2 + $0x30] sm:$0xff] }
 0x1de   : > { %v1221_v33 = vpop.f32.mrf.mxu3  ;;  %v1002_v17 = vpop.f32.mrf.mxu2 }
 0x1df   : > { %v1286_v7 = vadd.f32 %v1221_v33, %v6975_v49  ;;  %v1572_v49 = vld [vmem:[#allocation2 + $0x182] sm:$0xff]  ;;  %v2277_v33 = vpack.c.bf16 %v2246_v10, %v2245_v58  ;;  %v2247_v10 = vld [vmem:[#allocation2 + $0x4a] sm:$0xff] }
 0x1e0   : > { %v1589_v37 = vpack.c.bf16 %v1573_v6, %v1572_v49  ;;  %v1104_v49 = vld [vmem:[#allocation2 + $0x180] sm:$0xff]  ;;  %v1105_v6 = vld [vmem:[#allocation2 + $0x188] sm:$0xff] }
 0x1e1   : > { %v1520_v32 = vadd.f32 %v6969_v3, %v1286_v7  ;;  %v1809_v3 = vpack.c.bf16 %v1778_v40, %v1777_v42  ;;  %v1779_v40 = vld [vmem:[#allocation2 + $0x48] sm:$0xff] }
 0x1e2   : > { %v7042_v28 = vpop.f32.mrf.mxu1 }
 0x1e3   : > { %v7044_v62 = vadd.f32 %v1689_v24, %v1520_v32  ;;  %v7048_v20 = vpop.f32.mrf.mxu0  ;;  %1898 = vmatmul.bf16.vlgmr.msra.gmra.mxu2 %v1809_v3  ;;  %v1780_v3 = vld [vmem:[#allocation2 + $0x50] sm:$0xff] }
 0x1e6   : > { %v1223_v31 = vpop.f32.mrf.mxu3  ;;  %2366 = vmatmul.bf16.vlgmr.msra.gmra.mxu0 %v2277_v33 }
 0x1e7   : > { %v1287_v12 = vadd.f32 %v1223_v31, %v6989_v57  ;;  %v1058_v57 = vadd.f32 %v1002_v17, %v6764_v1  ;;  %v1004_v31 = vpop.f32.mrf.mxu2  ;;  %v1121_v1 = vpack.c.bf16 %v1105_v6, %v1104_v49 }
 0x1e9   : > { %v7051_v24 = vadd.f32 %v6981_v36, %v1287_v12  ;;  %v1059_v12 = vadd.f32 %v1004_v31, %v6772_v11 }
 0x1ea   : > { %v1699_v7 = vpop.f32.mrf.mxu1 }
 0x1eb   : > { %1265 = vmatmul.bf16.gmra.mxu3 %v1120_v22  ;;  %v7055_v25 = vpop.f32.mrf.mxu0 }
 0x1ed   : > { %1738 = vmatmul.bf16.gmra.mxu1 %v1589_v37  ;;  %v2248_v37 = vld [vmem:[#allocation2 + $0x52] sm:$0xff] }
 0x1ee   : > { %v1226_v50 = vpop.f32.mrf.mxu3 }
 0x1ef   : > { %v1288_v32 = vadd.f32 %v1226_v50, %v7004_v2  ;;  %v1810_v2 = vpack.c.bf16 %v1780_v3, %v1779_v40  ;;  %v1781_v3 = vld [vmem:[#allocation2 + $0x60] sm:$0xff] }
 0x1f1   : > { %v1522_v5 = vadd.f32 %v6992_v46, %v1288_v32  ;;  %v6010_v32 = vld [vmem:[%s8573_s2 + $0x58] sm:$0xff] }
 0x1f2   : > { %v7058_v16 = vpop.f32.mrf.mxu1  ;;  %2913 = vmatpush.bf16.msra.mxu1 %v6010_v32 }
 0x1f3   : > { %v7060_v36 = vadd.f32 %v1694_v54, %v1522_v5  ;;  %v7063_v58 = vpop.f32.mrf.mxu0  ;;  %v2278_v54 = vpack.c.bf16 %v2248_v37, %v2247_v10  ;;  %1903 = vmatmul.bf16.gmra.mxu2 %v1810_v2  ;;  %v1782_v2 = vld [vmem:[#allocation2 + $0x68] sm:$0xff] }
 0x1f4   : > { %v1811_v37 = vpack.c.bf16 %v1782_v2, %v1781_v3 }
 0x1f5   : > { %v1007_v17 = vpop.f32.mrf.mxu2 }
 0x1f6   : > { %v1228_v22 = vpop.f32.mrf.mxu3  ;;  %2371 = vmatmul.bf16.gmra.mxu0 %v2278_v54  ;;  %v1060_v11 = vadd.f32 %v1007_v17, %v6777_v18  ;;  %v2249_v54 = vld [vmem:[#allocation2 + $0x62] sm:$0xff] }
 0x1f7   : > { %v1289_v42 = vadd.f32 %v1228_v22, %v1055_v52  ;;  %v2011_v22 = vld [vmem:[#allocation2 + $0x31] sm:$0xff] }
 0x1f9   : > { %v7066_v46 = vadd.f32 %v7012_v56, %v1289_v42  ;;  %v2012_v42 = vld [vmem:[#allocation2 + $0x39] sm:$0xff] }
 0x1fa   : > { %v1704_v33 = vpop.f32.mrf.mxu1  ;;  %v2043_v40 = vpack.c.bf16 %v2012_v42, %v2011_v22 }
 0x1fb   : > { %1270 = vmatmul.bf16.gmra.mxu3 %v1121_v1  ;;  %v7073_v5 = vpop.f32.mrf.mxu0 }
 0x1fd   : > { %v1009_v6 = vpop.f32.mrf.mxu2 }
 0x1fe   : > { %v1231_v52 = vpop.f32.mrf.mxu3  ;;  %v1061_v18 = vadd.f32 %v1009_v6, %v6782_v45 }
 0x1ff   : > { %v1290_v50 = vadd.f32 %v1231_v52, %v7033_v44 }
 0x201   : > { %v1524_v56 = vadd.f32 %v7027_v43, %v1290_v50  ;;  %v2250_v43 = vld [vmem:[#allocation2 + $0x6a] sm:$0xff] }
 0x202   : > { %v7076_v31 = vpop.f32.mrf.mxu1 }
 0x203   : > { %v7078_v49 = vadd.f32 %v1699_v7, %v1524_v56  ;;  %v7081_v10 = vpop.f32.mrf.mxu0  ;;  %v2279_v7 = vpack.c.bf16 %v2250_v43, %v2249_v54  ;;  %1908 = vmatmul.bf16.gmra.mxu2 %v1811_v37  ;;  %v1783_v54 = vld [vmem:[#allocation2 + $0x78] sm:$0xff] }
 0x205   : > { %v1012_v50 = vpop.f32.mrf.mxu2 }
 0x206   : > { %v1233_v1 = vpop.f32.mrf.mxu3  ;;  %2376 = vmatmul.bf16.gmra.mxu0 %v2279_v7  ;;  %v1062_v45 = vadd.f32 %v1012_v50, %v6793_v39  ;;  %v1784_v39 = vld [vmem:[#allocation2 + $0x80] sm:$0xff] }
 0x207   : > { %v1291_v44 = vadd.f32 %v1233_v1, %v1057_v26  ;;  %v2013_v1 = vld [vmem:[#allocation2 + $0x49] sm:$0xff]  ;;  %v2251_v7 = vld [vmem:[#allocation2 + $0x7a] sm:$0xff] }
 0x208   : > { %v2252_v50 = vld [vmem:[#allocation2 + $0x82] sm:$0xff] }
 0x209   : > { %v7084_v17 = vadd.f32 %v7039_v38, %v1291_v44  ;;  %v2014_v44 = vld [vmem:[#allocation2 + $0x51] sm:$0xff] }
 0x20a   : > { %v1709_v52 = vpop.f32.mrf.mxu1  ;;  %v2044_v37 = vpack.c.bf16 %v2014_v44, %v2013_v1 }
 0x20b   : > { %2132 = vmatmul.bf16.vlgmr.msra.gmra.mxu3 %v2043_v40  ;;  %v7087_v56 = vpop.f32.mrf.mxu0 }
 0x20d   : > { %v1014_v38 = vpop.f32.mrf.mxu2 }
 0x20e   : > { %v1236_v26 = vpop.f32.mrf.mxu3  ;;  %v1063_v3 = vadd.f32 %v1014_v38, %v6801_v51  ;;  %v6009_v38 = vld [vmem:[%s8573_s2 + $0x50] sm:$0xff] }
 0x20f   : > { %v1292_v32 = vadd.f32 %v1236_v26, %v1058_v57  ;;  %v1812_v57 = vpack.c.bf16 %v1784_v39, %v1783_v54  ;;  %2914 = vmatpush.bf16.msra.mxu1 %v6009_v38 }
 0x211   : > { %v1526_v6 = vadd.f32 %v7048_v20, %v1292_v32 }
 0x212   : > { %v7090_v22 = vpop.f32.mrf.mxu1 }
 0x213   : > { %v7092_v42 = vadd.f32 %v1704_v33, %v1526_v6  ;;  %v7095_v43 = vpop.f32.mrf.mxu0  ;;  %v2280_v33 = vpack.c.bf16 %v2252_v50, %v2251_v7  ;;  %1913 = vmatmul.bf16.gmra.mxu2 %v1812_v57  ;;  %v1785_v7 = vld [vmem:[#allocation2 + $0x90] sm:$0xff]  ;;  %v1786_v50 = vld [vmem:[#allocation2 + $0x98] sm:$0xff] }
 0x215   : > { %v1017_v32 = vpop.f32.mrf.mxu2 }
 0x216   : > { %v1238_v40 = vpop.f32.mrf.mxu3  ;;  %2381 = vmatmul.bf16.gmra.mxu0 %v2280_v33  ;;  %v1064_v51 = vadd.f32 %v1017_v32, %v6806_v59  ;;  %v1813_v32 = vpack.c.bf16 %v1786_v50, %v1785_v7  ;;  %v2017_v50 = vld [vmem:[#allocation2 + $0x79] sm:$0xff] }
 0x217   : > { %v1293_v2 = vadd.f32 %v1238_v40, %v1059_v12 }
 0x219   : > { %v7098_v20 = vadd.f32 %v7055_v25, %v1293_v2  ;;  %v2015_v2 = vld [vmem:[#allocation2 + $0x61] sm:$0xff] }
 0x21a   : > { %v1714_v26 = vpop.f32.mrf.mxu1 }
 0x21b   : > { %2137 = vmatmul.bf16.gmra.mxu3 %v2044_v37  ;;  %v7104_v1 = vpop.f32.mrf.mxu0  ;;  %v2016_v37 = vld [vmem:[#allocation2 + $0x69] sm:$0xff] }
 0x21c   : > { %v2045_v57 = vpack.c.bf16 %v2016_v37, %v2015_v2 }
 0x21d   : > { %v1019_v40 = vpop.f32.mrf.mxu2 }
 0x21e   : > { %v1241_v12 = vpop.f32.mrf.mxu3  ;;  %v1065_v54 = vadd.f32 %v1019_v40, %v6811_v4 }
 0x21f   : > { %v1294_v6 = vadd.f32 %v1241_v12, %v1060_v11  ;;  %v2253_v12 = vld [vmem:[#allocation2 + $0x92] sm:$0xff] }
 0x221   : > { %v1528_v44 = vadd.f32 %v7063_v58, %v1294_v6  ;;  %v2254_v58 = vld [vmem:[#allocation2 + $0x9a] sm:$0xff] }
 0x222   : > { %v7110_v39 = vpop.f32.mrf.mxu1  ;;  %v2281_v6 = vpack.c.bf16 %v2254_v58, %v2253_v12  ;;  %v1787_v58 = vld [vmem:[#allocation2 + $0xa8] sm:$0xff] }
 0x223   : > { %v7107_v25 = vadd.f32 %v1709_v52, %v1528_v44  ;;  %8582 = vst [vmem:[#allocation7_spill] sm:$0xff] %v7110_v39  ;;  %v7112_v33 = vpop.f32.mrf.mxu0  ;;  %1918 = vmatmul.bf16.gmra.mxu2 %v1813_v32 }
 0x225   : > { %v1022_v4 = vpop.f32.mrf.mxu2 }
 0x226   : > { %v1243_v59 = vpop.f32.mrf.mxu3  ;;  %2386 = vmatmul.bf16.gmra.mxu0 %v2281_v6  ;;  %v1066_v38 = vadd.f32 %v1022_v4, %v6822_v13  ;;  %v1788_v6 = vld [vmem:[#allocation2 + $0xb0] sm:$0xff] }
 0x227   : > { %v1295_v11 = vadd.f32 %v1243_v59, %v1061_v18  ;;  %v2255_v4 = vld [vmem:[#allocation2 + $0xaa] sm:$0xff] }
 0x229   : > { %v7115_v52 = vadd.f32 %v7073_v5, %v1295_v11  ;;  %v2018_v5 = vld [vmem:[#allocation2 + $0x81] sm:$0xff] }
 0x22a   : > { %v1719_v40 = vpop.f32.mrf.mxu1  ;;  %v2046_v12 = vpack.c.bf16 %v2018_v5, %v2017_v50 }
 0x22b   : > { %2142 = vmatmul.bf16.gmra.mxu3 %v2045_v57  ;;  %v7118_v2 = vpop.f32.mrf.mxu0 }
 0x22d   : > { %v1024_v7 = vpop.f32.mrf.mxu2 }
 0x22e   : > { %v1246_v44 = vpop.f32.mrf.mxu3  ;;  %v1067_v11 = vadd.f32 %v1024_v7, %v6829_v29  ;;  %v6008_v7 = vld [vmem:[%s8573_s2 + $0x48] sm:$0xff] }
 0x22f   : > { %v1296_v18 = vadd.f32 %v1246_v44, %v1062_v45  ;;  %v1814_v45 = vpack.c.bf16 %v1788_v6, %v1787_v58  ;;  %v2256_v44 = vld [vmem:[#allocation2 + $0xb2] sm:$0xff]  ;;  %2915 = vmatpush.bf16.msra.mxu1 %v6008_v7 }
 0x230   : > { %v2020_v58 = vld [vmem:[#allocation2 + $0x99] sm:$0xff] }
 0x231   : > { %v1530_v37 = vadd.f32 %v7081_v10, %v1296_v18 }
 0x232   : > { %v7129_v10 = vpop.f32.mrf.mxu1 }
 0x233   : > { %v7121_v59 = vadd.f32 %v1714_v26, %v1530_v37  ;;  %v7124_v13 = vpop.f32.mrf.mxu0  ;;  %8583 = vst [vmem:[#allocation8_spill] sm:$0xff] %v7129_v10  ;;  %v2282_v26 = vpack.c.bf16 %v2256_v44, %v2255_v4  ;;  %1923 = vmatmul.bf16.gmra.mxu2 %v1814_v45  ;;  %v1789_v4 = vld [vmem:[#allocation2 + $0xc0] sm:$0xff]  ;;  %v1790_v44 = vld [vmem:[#allocation2 + $0xc8] sm:$0xff] }
 0x234   : > { %v2258_v10 = vld [vmem:[#allocation2 + $0xca] sm:$0xff] }
 0x235   : > { %v1027_v29 = vpop.f32.mrf.mxu2 }
 0x236   : > { %v1248_v32 = vpop.f32.mrf.mxu3  ;;  %2391 = vmatmul.bf16.gmra.mxu0 %v2282_v26 }
 0x237   : > { %v1297_v57 = vadd.f32 %v1248_v32, %v1063_v3  ;;  %v1068_v3 = vadd.f32 %v1027_v29, %v6834_v41  ;;  %v1815_v29 = vpack.c.bf16 %v1790_v44, %v1789_v4 }
 0x239   : > { %v7127_v39 = vadd.f32 %v7087_v56, %v1297_v57 }
 0x23a   : > { %v1724_v32 = vpop.f32.mrf.mxu1 }
 0x23b   : > { %2147 = vmatmul.bf16.gmra.mxu3 %v2046_v12  ;;  %v7135_v50 = vpop.f32.mrf.mxu0  ;;  %v2019_v12 = vld [vmem:[#allocation2 + $0x91] sm:$0xff] }
 0x23d   : > { %v1029_v57 = vpop.f32.mrf.mxu2 }
 0x23e   : > { %v1251_v18 = vpop.f32.mrf.mxu3  ;;  %v1069_v6 = vadd.f32 %v1029_v57, %v6840_v60 }
 0x23f   : > { %v1298_v37 = vadd.f32 %v1251_v18, %v1064_v51  ;;  %v2047_v51 = vpack.c.bf16 %v2020_v58, %v2019_v12  ;;  %v2257_v18 = vld [vmem:[#allocation2 + $0xc2] sm:$0xff] }
 0x241   : > { %v1532_v56 = vadd.f32 %v7095_v43, %v1298_v37 }
 0x242   : > { %v7147_v7 = vpop.f32.mrf.mxu1 }
 0x243   : > { %v7138_v5 = vadd.f32 %v1719_v40, %v1532_v56  ;;  %v7141_v26 = vpop.f32.mrf.mxu0  ;;  %v2283_v40 = vpack.c.bf16 %v2258_v10, %v2257_v18  ;;  %1928 = vmatmul.bf16.gmra.mxu2 %v1815_v29  ;;  %v1792_v18 = vld [vmem:[#allocation2 + $0xe0] sm:$0xff] }
 0x245   : > { %v1032_v37 = vpop.f32.mrf.mxu2 }
 0x246   : > { %v1253_v41 = vpop.f32.mrf.mxu3  ;;  %2396 = vmatmul.bf16.gmra.mxu0 %v2283_v40  ;;  %v1070_v60 = vadd.f32 %v1032_v37, %v6856_v27  ;;  %v1791_v27 = vld [vmem:[#allocation2 + $0xd8] sm:$0xff] }
 0x247   : > { %v1299_v45 = vadd.f32 %v1253_v41, %v1065_v54 }
 0x249   : > { %v7144_v43 = vadd.f32 %v7104_v1, %v1299_v45  ;;  %v2021_v1 = vld [vmem:[#allocation2 + $0xa9] sm:$0xff]  ;;  %v2022_v45 = vld [vmem:[#allocation2 + $0xb1] sm:$0xff] }
 0x24a   : > { %v2048_v44 = vpack.c.bf16 %v2022_v45, %v2021_v1  ;;  %v1729_v29 = vpop.f32.mrf.mxu1  ;;  %v2024_v45 = vld [vmem:[#allocation2 + $0xc9] sm:$0xff] }
 0x24b   : > { %2152 = vmatmul.bf16.gmra.mxu3 %v2047_v51  ;;  %v7149_v57 = vpop.f32.mrf.mxu0 }
 0x24d   : > { %v1034_v41 = vpop.f32.mrf.mxu2 }
 0x24e   : > { %v1256_v54 = vpop.f32.mrf.mxu3  ;;  %v1071_v10 = vadd.f32 %v1034_v41, %v6871_v34 }
 0x24f   : > { %v1300_v56 = vadd.f32 %v1256_v54, %v1066_v38  ;;  %v1816_v38 = vpack.c.bf16 %v1792_v18, %v1791_v27  ;;  %v1794_v27 = vld [vmem:[#allocation2 + $0xf8] sm:$0xff] }
 0x251   : > { %v1534_v12 = vadd.f32 %v7112_v33, %v1300_v56 }
 0x252   : > { %v7168_v41 = vpop.f32.mrf.mxu1 }
 0x253   : > { %v7152_v58 = vadd.f32 %v1724_v32, %v1534_v12  ;;  %v7155_v40 = vpop.f32.mrf.mxu0  ;;  %1933 = vmatmul.bf16.gmra.mxu2 %v1816_v38 }
 0x255   : > { %v1037_v33 = vpop.f32.mrf.mxu2 }
 0x256   : > { %v1258_v51 = vpop.f32.mrf.mxu3  ;;  %2401 = vmatmul.bf16.gmra.mxu0 %v6869_v30  ;;  %v1072_v32 = vadd.f32 %v1037_v33, %v6880_v21  ;;  %v2023_v30 = vld [vmem:[#allocation2 + $0xc1] sm:$0xff]  ;;  %v2796_v33 = vld [vmem:[#allocation3 + $0x1] sm:$0xff] }
 0x257   : > { %v1301_v4 = vadd.f32 %v1258_v51, %v1067_v11  ;;  %v6007_v11 = vld [vmem:[%s8573_s2 + $0x40] sm:$0xff] }
 0x258   : > { %2916 = vmatpush.bf16.msra.mxu1 %v6007_v11 }
 0x259   : > { %v7158_v37 = vadd.f32 %v7118_v2, %v1301_v4  ;;  %v2049_v4 = vpack.c.bf16 %v2024_v45, %v2023_v30  ;;  %v2026_v45 = vld [vmem:[#allocation2 + $0xe1] sm:$0xff] }
 0x25b   : > { %2157 = vmatmul.bf16.gmra.mxu3 %v2048_v44  ;;  %v7165_v56 = vpop.f32.mrf.mxu0  ;;  %v1793_v44 = vld [vmem:[#allocation2 + $0xf0] sm:$0xff] }
 0x25c   : > { %v1817_v38 = vpack.c.bf16 %v1794_v27, %v1793_v44 }
 0x25d   : > { %v1039_v1 = vpop.f32.mrf.mxu2 }
 0x25e   : > { %v1261_v34 = vpop.f32.mrf.mxu3  ;;  %v1073_v21 = vadd.f32 %v1039_v1, %v6893_v9 }
 0x25f   : > { %v1302_v54 = vadd.f32 %v1261_v34, %v1068_v3  ;;  %v2797_v34 = vld [vmem:[#allocation3 + $0x9] sm:$0xff] }
 0x261   : > { %v1536_v12 = vadd.f32 %v7124_v13, %v1302_v54  ;;  %v2828_v54 = vpack.c.bf16 %v2797_v34, %v2796_v33  ;;  %v1796_v33 = vld [vmem:[#allocation2 + $0x110] sm:$0xff] }
 0x263   : > { %v7170_v2 = vadd.f32 %v1729_v29, %v1536_v12  ;;  %v7173_v18 = vpop.f32.mrf.mxu0  ;;  %1938 = vmatmul.bf16.gmra.mxu2 %v1817_v38  ;;  %v1734_v29 = vpop.f32.mrf.mxu1  ;;  %2917 = vmatmul.bf16.vlgmr.msra.gmra.mxu1 %v2828_v54  ;;  %v1795_v38 = vld [vmem:[#allocation2 + $0x108] sm:$0xff] }
 0x264   : > { %v1818_v34 = vpack.c.bf16 %v1796_v33, %v1795_v38  ;;  %v2263_v54 = vld [vmem:[#allocation2 + $0x10a] sm:$0xff] }
 0x265   : > { %v2027_v33 = vld [vmem:[#allocation2 + $0xf1] sm:$0xff] }
 0x266   : > { %v1263_v51 = vpop.f32.mrf.mxu3  ;;  %2406 = vmatmul.bf16.gmra.mxu0 %v6890_v15  ;;  %v1899_v9 = vpop.f32.mrf.mxu2 }
 0x267   : > { %v1303_v3 = vadd.f32 %v1263_v51, %v1069_v6 }
 0x269   : > { %v7176_v13 = vadd.f32 %v7135_v50, %v1303_v3  ;;  %v2025_v50 = vld [vmem:[#allocation2 + $0xd9] sm:$0xff] }
 0x26a   : > { %v2050_v44 = vpack.c.bf16 %v2026_v45, %v2025_v50 }
 0x26b   : > { %2162 = vmatmul.bf16.gmra.mxu3 %v2049_v4  ;;  %v7179_v12 = vpop.f32.mrf.mxu0  ;;  %v7184_v51 = vpop.f32.mrf.mxu1 }
 0x26c   : > { %8584 = vst [vmem:[#allocation9_spill] sm:$0xff] %v7184_v51  ;;  %v2266_v51 = vld [vmem:[#allocation2 + $0x12a] sm:$0xff] }
 0x26e   : > { %v1266_v11 = vpop.f32.mrf.mxu3  ;;  %v1901_v4 = vpop.f32.mrf.mxu2 }
 0x26f   : > { %v1304_v6 = vadd.f32 %v1266_v11, %v1070_v60  ;;  %v6022_v11 = vld [vmem:[%s8573_s2 + $0xb8] sm:$0xff] }
 0x270   : > { %3248 = vmatpush.bf16.msrb.mxu3 %v6022_v11  ;;  %v1797_v11 = vld [vmem:[#allocation2 + $0x120] sm:$0xff] }
 0x271   : > { %v1538_v1 = vadd.f32 %v7141_v26, %v1304_v6  ;;  %v2264_v26 = vld [vmem:[#allocation2 + $0x112] sm:$0xff] }
 0x273   : > { %v7182_v30 = vadd.f32 %v1734_v29, %v1538_v1  ;;  %v7186_v27 = vpop.f32.mrf.mxu0  ;;  %v6006_v29 = vld [vmem:[%s8573_s2 + $0x38] sm:$0xff]  ;;  %1943 = vmatmul.bf16.gmra.mxu2 %v1818_v34  ;;  %v1739_v50 = vpop.f32.mrf.mxu1 }
 0x274   : > { %3046 = vmatpush.bf16.msrb.mxu2 %v6006_v29 }
 0x276   : > { %v1268_v3 = vpop.f32.mrf.mxu3 }
 0x277   : > { %v1305_v15 = vadd.f32 %v1268_v3, %v1071_v10  ;;  %v2286_v10 = vpack.c.bf16 %v2264_v26, %v2263_v54 }
 0x279   : > { %v7189_v60 = vadd.f32 %v7149_v57, %v1305_v15  ;;  %2411 = vmatmul.bf16.gmra.mxu0 %v2286_v10  ;;  %v1904_v57 = vpop.f32.mrf.mxu2  ;;  %v6030_v15 = vld [vmem:[%s8573_s2 + $0xf8] sm:$0xff]  ;;  %v1798_v10 = vld [vmem:[#allocation2 + $0x128] sm:$0xff] }
 0x27a   : > { %3482 = vmatpush.bf16.msrb.mxu0 %v6030_v15  ;;  %v1979_v15 = vadd.f32 %v1899_v9, %v6912_v48  ;;  %v7229_v48 = vld [vmem:[%s8575_s4 + $0x1] ss:$0 sm:$0xff] }
 0x27b   : > { %8585 = vst [vmem:[#allocation10_spill] sm:$0xff] %v7189_v60  ;;  %2167 = vmatmul.bf16.gmra.mxu3 %v2050_v44  ;;  %v7197_v45 = vpop.f32.mrf.mxu0  ;;  %v2028_v44 = vld [vmem:[#allocation2 + $0xf9] sm:$0xff]  ;;  %v2268_v60 = vld [vmem:[#allocation2 + $0x142] sm:$0xff] }
 0x27c   : > { %v2051_v29 = vpack.c.bf16 %v2028_v44, %v2027_v33 }
 0x27e   : > { %v1271_v6 = vpop.f32.mrf.mxu3 }
 0x27f   : > { %v1306_v1 = vadd.f32 %v1271_v6, %v1072_v32  ;;  %v1819_v6 = vpack.c.bf16 %v1798_v10, %v1797_v11  ;;  %v2029_v11 = vld [vmem:[#allocation2 + $0x109] sm:$0xff]  ;;  %v2030_v10 = vld [vmem:[#allocation2 + $0x111] sm:$0xff] }
 0x281   : > { %v1540_v3 = vadd.f32 %v7155_v40, %v1306_v1  ;;  %v7205_v54 = vpop.f32.mrf.mxu2  ;;  %v2265_v1 = vld [vmem:[#allocation2 + $0x122] sm:$0xff] }
 0x283   : > { %v7203_v38 = vadd.f32 %v1739_v50, %v1540_v3  ;;  %v7207_v32 = vpop.f32.mrf.mxu0  ;;  %v6038_v50 = vld [vmem:[%s8573_s2 + $0x138] sm:$0xff]  ;;  %v2287_v3 = vpack.c.bf16 %v2266_v51, %v2265_v1  ;;  %1948 = vmatmul.bf16.gmra.mxu2 %v1819_v6  ;;  %v7235_v51 = vld [vmem:[%s8575_s4 + $0x2] ss:$0 sm:$0xff] }
 0x284   : > { %3716 = vmatpush.bf16.msrb.mxu1 %v6038_v50 }
 0x285   : > { %8586 = vst [vmem:[#allocation11_spill] sm:$0xff] %v7203_v38 }
 0x286   : > { %v1273_v34 = vpop.f32.mrf.mxu3 }
 0x287   : > { %v1307_v26 = vadd.f32 %v1273_v34, %v1073_v21 }
 0x289   : > { %v7210_v40 = vadd.f32 %v7165_v56, %v1307_v26  ;;  %2416 = vmatmul.bf16.gmra.mxu0 %v2287_v3  ;;  %v7216_v33 = vpop.f32.mrf.mxu2  ;;  %v7221_v56 = vld [vmem:[%s8575_s4] ss:$0 sm:$0xff] }
 0x28b   : > { %8587 = vst [vmem:[#allocation12_spill] sm:$0xff] %v7210_v40  ;;  %2172 = vmatmul.bf16.gmra.mxu3 %v2051_v29  ;;  %v7223_v34 = vpop.f32.mrf.mxu0  ;;  %v1980_v29 = vadd.f32 %v1901_v4, %v6924_v23  ;;  %v2267_v4 = vld [vmem:[#allocation2 + $0x13a] sm:$0xff] }
 0x28e   : > { %v2133_v21 = vpop.f32.mrf.mxu3 }
 0x28f   : > { %v2213_v44 = vadd.f32 %v2133_v21, %v1979_v15  ;;  %v2052_v15 = vpack.c.bf16 %v2030_v10, %v2029_v11  ;;  %v2288_v11 = vpack.c.bf16 %v2268_v60, %v2267_v4  ;;  %v2031_v4 = vld [vmem:[#allocation2 + $0x121] sm:$0xff] }
 0x291   : > { %v2447_v26 = vadd.f32 %v7173_v18, %v2213_v44  ;;  %v7239_v18 = vpop.f32.mrf.mxu2  ;;  %v1799_v44 = vld [vmem:[#allocation2 + $0x138] sm:$0xff] }
 0x293   : > { %v2483_v9 = vmul.f32 %v7221_v56, %v2447_v26  ;;  %v7242_v21 = vpop.f32.mrf.mxu0  ;;  %v1800_v26 = vld [vmem:[#allocation2 + $0x140] sm:$0xff] }
 0x294   : > { %v1820_v23 = vpack.c.bf16 %v1800_v26, %v1799_v44 }
 0x295   : > { %v2516_v6 = vadd.f32 %v7229_v48, %v2483_v9  ;;  %v6005_v9 = vld [vmem:[%s8573_s2 + $0x30] sm:$0xff] }
 0x296   : > { %v2135_v1 = vpop.f32.mrf.mxu3  ;;  %1953 = vmatmul.bf16.gmra.mxu2 %v1820_v23  ;;  %v1982_v23 = vadd.f32 %v7205_v54, %v6945_v47 }
 0x297   : > { %vm2548_vm0 = vcmp.gt.f32.partialorder %v2516_v6, 0.0  ;;  %v2581_v50 = vmul.f32 %v7235_v51, %v2516_v6  ;;  %v2214_v3 = vadd.f32 %v2135_v1, %v1980_v29  ;;  %v6021_v29 = vld [vmem:[%s8573_s2 + $0xb0] sm:$0xff]  ;;  %3047 = vmatpush.bf16.msrb.mxu2 %v6005_v9 }
 0x298   : > { %3249 = vmatpush.bf16.msrb.mxu3 %v6021_v29  ;;  %v2032_v9 = vld [vmem:[#allocation2 + $0x129] sm:$0xff] }
 0x299   : > { %v2613_v40 = vsel %vm2548_vm0, %v2516_v6, %v2581_v50  ;;  %v2448_v38 = vadd.f32 %v7179_v12, %v2214_v3  ;;  %v1981_v6 = vadd.f32 %v1904_v57, %v6936_v53  ;;  %2421 = vmatmul.bf16.gmra.mxu0 %v2288_v11  ;;  %v7254_v50 = vpop.f32.mrf.mxu2  ;;  %v6029_v57 = vld [vmem:[%s8573_s2 + $0xf0] sm:$0xff] }
 0x29a   : > { %2700 = vst [vmem:[#allocation3 + $0x19] sm:$0xff] %v2613_v40  ;;  %3483 = vmatpush.bf16.msrb.mxu0 %v6029_v57 }
 0x29b   : > { %v2484_v10 = vmul.f32 %v7221_v56, %v2448_v38  ;;  %2177 = vmatmul.bf16.gmra.mxu3 %v2052_v15  ;;  %v7257_v26 = vpop.f32.mrf.mxu0 }
 0x29d   : > { %v2517_v12 = vadd.f32 %v7229_v48, %v2484_v10 }
 0x29e   : > { %v2138_v1 = vpop.f32.mrf.mxu3 }
 0x29f   : > { %vm2549_vm1 = vcmp.gt.f32.partialorder %v2517_v12, 0.0  ;;  %v2582_v3 = vmul.f32 %v7235_v51, %v2517_v12  ;;  %v2215_v44 = vadd.f32 %v2138_v1, %v1981_v6  ;;  %v2053_v6 = vpack.c.bf16 %v2032_v9, %v2031_v4  ;;  %v1801_v1 = vld [vmem:[#allocation2 + $0x150] sm:$0xff] }
 0x2a1   : > { %v2614_v60 = vsel %vm2549_vm1, %v2517_v12, %v2582_v3  ;;  %v2449_v38 = vadd.f32 %v7186_v27, %v2215_v44  ;;  %v7267_v10 = vpop.f32.mrf.mxu2  ;;  %v1802_v3 = vld [vmem:[#allocation2 + $0x158] sm:$0xff] }
 0x2a2   : > { %2701 = vst [vmem:[#allocation3 + $0x21] sm:$0xff] %v2614_v60  ;;  %v2829_v53 = vpack.c.bf16 %v2614_v60, %v2613_v40  ;;  %v1821_v54 = vpack.c.bf16 %v1802_v3, %v1801_v1  ;;  %v2269_v60 = vld [vmem:[#allocation2 + $0x152] sm:$0xff] }
 0x2a3   : > { %v2485_v15 = vmul.f32 %v7221_v56, %v2449_v38  ;;  %v7270_v12 = vpop.f32.mrf.mxu0  ;;  %v2270_v38 = vld [vmem:[#allocation2 + $0x15a] sm:$0xff] }
 0x2a4   : > { %2922 = vmatmul.bf16.gmra.mxu1 %v2829_v53  ;;  %v6037_v53 = vld [vmem:[%s8573_s2 + $0x130] sm:$0xff]  ;;  %v2289_v57 = vpack.c.bf16 %v2270_v38, %v2269_v60  ;;  %v2033_v3 = vld [vmem:[#allocation2 + $0x139] sm:$0xff] }
 0x2a5   : > { %v2518_v29 = vadd.f32 %v7229_v48, %v2485_v15  ;;  %3717 = vmatpush.bf16.msrb.mxu1 %v6037_v53 }
 0x2a6   : > { %v2140_v11 = vpop.f32.mrf.mxu3  ;;  %1958 = vmatmul.bf16.gmra.mxu2 %v1821_v54 }
 0x2a7   : > { %vm2550_vm2 = vcmp.gt.f32.partialorder %v2518_v29, 0.0  ;;  %v2583_v27 = vmul.f32 %v7235_v51, %v2518_v29  ;;  %v2216_v40 = vadd.f32 %v2140_v11, %v1982_v23  ;;  %v1983_v23 = vadd.f32 %v7216_v33, %v6960_v14 }
 0x2a8   : > { %v1984_v33 = vadd.f32 %v7239_v18, %v6972_v0 }
 0x2a9   : > { %v2615_v44 = vsel %vm2550_vm2, %v2518_v29, %v2583_v27  ;;  %v2450_v47 = vadd.f32 %v7197_v45, %v2216_v40  ;;  %2426 = vmatmul.bf16.gmra.mxu0 %v2289_v57  ;;  %v7280_v9 = vpop.f32.mrf.mxu2 }
 0x2aa   : > { %2702 = vst [vmem:[#allocation3 + $0x31] sm:$0xff] %v2615_v44 }
 0x2ab   : > { %v2486_v15 = vmul.f32 %v7221_v56, %v2450_v47  ;;  %2182 = vmatmul.bf16.gmra.mxu3 %v2053_v6  ;;  %v7283_v27 = vpop.f32.mrf.mxu0  ;;  %v2034_v47 = vld [vmem:[#allocation2 + $0x141] sm:$0xff] }
 0x2ad   : > { %v2519_v4 = vadd.f32 %v7229_v48, %v2486_v15 }
 0x2ae   : > { %v2143_v45 = vpop.f32.mrf.mxu3 }
 0x2af   : > { %vm2551_vm3 = vcmp.gt.f32.partialorder %v2519_v4, 0.0  ;;  %v2584_v29 = vmul.f32 %v7235_v51, %v2519_v4  ;;  %v2217_v11 = vadd.f32 %v2143_v45, %v1983_v23  ;;  %v1804_v23 = vld [vmem:[#allocation2 + $0x170] sm:$0xff] }
 0x2b0   : > { %v2271_v45 = vld [vmem:[#allocation2 + $0x16a] sm:$0xff] }
 0x2b1   : > { %v2616_v40 = vsel %vm2551_vm3, %v2519_v4, %v2584_v29  ;;  %v2451_v6 = vadd.f32 %v7207_v32, %v2217_v11  ;;  %v7290_v38 = vpop.f32.mrf.mxu2  ;;  %v2054_v32 = vpack.c.bf16 %v2034_v47, %v2033_v3  ;;  %v2272_v29 = vld [vmem:[#allocation2 + $0x172] sm:$0xff]  ;;  %v6004_v11 = vld [vmem:[%s8573_s2 + $0x28] sm:$0xff] }
 0x2b2   : > { %2703 = vst [vmem:[#allocation3 + $0x39] sm:$0xff] %v2616_v40  ;;  %v2830_v1 = vpack.c.bf16 %v2616_v40, %v2615_v44  ;;  %v1803_v44 = vld [vmem:[#allocation2 + $0x168] sm:$0xff]  ;;  %3048 = vmatpush.bf16.msrb.mxu2 %v6004_v11 }
 0x2b3   : > { %v2487_v14 = vmul.f32 %v7221_v56, %v2451_v6  ;;  %v7293_v15 = vpop.f32.mrf.mxu0  ;;  %v1822_v18 = vpack.c.bf16 %v1804_v23, %v1803_v44  ;;  %v6020_v40 = vld [vmem:[%s8573_s2 + $0xa8] sm:$0xff]  ;;  %v2290_v6 = vpack.c.bf16 %v2272_v29, %v2271_v45  ;;  %v1986_v44 = vadd.f32 %v7267_v10, %v6995_v19  ;;  %v2035_v23 = vld [vmem:[#allocation2 + $0x151] sm:$0xff] }
 0x2b4   : > { %2927 = vmatmul.bf16.gmra.mxu1 %v2830_v1  ;;  %3250 = vmatpush.bf16.msrb.mxu3 %v6020_v40 }
 0x2b5   : > { %v2520_v54 = vadd.f32 %v7229_v48, %v2487_v14  ;;  %v1985_v14 = vadd.f32 %v7254_v50, %v6986_v55  ;;  %v6028_v50 = vld [vmem:[%s8573_s2 + $0xe8] sm:$0xff] }
 0x2b6   : > { %v2145_v60 = vpop.f32.mrf.mxu3  ;;  %1963 = vmatmul.bf16.gmra.mxu2 %v1822_v18  ;;  %3484 = vmatpush.bf16.msrb.mxu0 %v6028_v50 }
 0x2b7   : > { %vm2552_vm4 = vcmp.gt.f32.partialorder %v2520_v54, 0.0  ;;  %v2585_v53 = vmul.f32 %v7235_v51, %v2520_v54  ;;  %v2218_v57 = vadd.f32 %v2145_v60, %v1984_v33 }
 0x2b9   : > { %v2617_v4 = vsel %vm2552_vm4, %v2520_v54, %v2585_v53  ;;  %v2452_v0 = vadd.f32 %v7223_v34, %v2218_v57  ;;  %2431 = vmatmul.bf16.gmra.mxu0 %v2290_v6  ;;  %v7306_v3 = vpop.f32.mrf.mxu2  ;;  %v1805_v6 = vld [vmem:[#allocation2 + $0x180] sm:$0xff] }
 0x2ba   : > { %2704 = vst [vmem:[#allocation3 + $0x49] sm:$0xff] %v2617_v4 }
 0x2bb   : > { %v2488_v1 = vmul.f32 %v7221_v56, %v2452_v0  ;;  %2187 = vmatmul.bf16.gmra.mxu3 %v2054_v32  ;;  %v7309_v60 = vpop.f32.mrf.mxu0  ;;  %v2036_v0 = vld [vmem:[#allocation2 + $0x159] sm:$0xff] }
 0x2bc   : > { %v2055_v11 = vpack.c.bf16 %v2036_v0, %v2035_v23  ;;  %v1753_v0 = vadd.f32 %v6984_v61, %v7030_v8  ;;  %v6019_v61 = vld [vmem:[%s8573_s2 + $0xa0] sm:$0xff] }
 0x2bd   : > { %v2521_v34 = vadd.f32 %v7229_v48, %v2488_v1  ;;  %v1806_v1 = vld [vmem:[#allocation2 + $0x188] sm:$0xff]  ;;  %3251 = vmatpush.bf16.msrb.mxu3 %v6019_v61 }
 0x2be   : > { %v2148_v33 = vpop.f32.mrf.mxu3  ;;  %v1823_v10 = vpack.c.bf16 %v1806_v1, %v1805_v6 }
 0x2bf   : > { %vm2553_vm5 = vcmp.gt.f32.partialorder %v2521_v34, 0.0  ;;  %v2586_v47 = vmul.f32 %v7235_v51, %v2521_v34  ;;  %v2219_v54 = vadd.f32 %v2148_v33, %v1985_v14  ;;  %v2274_v33 = vld [vmem:[#allocation2 + $0x18a] sm:$0xff] }
 0x2c1   : > { %v2618_v53 = vsel %vm2553_vm5, %v2521_v34, %v2586_v47  ;;  %v2453_v57 = vadd.f32 %v7242_v21, %v2219_v54  ;;  %v7319_v29 = vpop.f32.mrf.mxu2  ;;  %v2273_v34 = vld [vmem:[#allocation2 + $0x182] sm:$0xff] }
 0x2c2   : > { %2705 = vst [vmem:[#allocation3 + $0x51] sm:$0xff] %v2618_v53  ;;  %v2831_v55 = vpack.c.bf16 %v2618_v53, %v2617_v4  ;;  %v6036_v47 = vld [vmem:[%s8573_s2 + $0x128] sm:$0xff]  ;;  %v2291_v54 = vpack.c.bf16 %v2274_v33, %v2273_v34  ;;  %v2275_v33 = vld [vmem:[#allocation2 + $0x19a] sm:$0xff] }
 0x2c3   : > { %v2489_v32 = vmul.f32 %v7221_v56, %v2453_v57  ;;  %v7322_v40 = vpop.f32.mrf.mxu0  ;;  %v1987_v57 = vadd.f32 %v7280_v9, %v7020_v35  ;;  %3718 = vmatpush.bf16.msrb.mxu1 %v6036_v47 }
 0x2c4   : > { %2932 = vmatmul.bf16.gmra.mxu1 %v2831_v55 }
 0x2c5   : > { %v2522_v18 = vadd.f32 %v7229_v48, %v2489_v32 }
 0x2c6   : > { %v2150_v45 = vpop.f32.mrf.mxu3  ;;  %1968 = vmatmul.bf16.gmra.mxu2 %v1823_v10 }
 0x2c7   : > { %vm2554_vm6 = vcmp.gt.f32.partialorder %v2522_v18, 0.0  ;;  %v2587_v21 = vmul.f32 %v7235_v51, %v2522_v18  ;;  %v2220_v4 = vadd.f32 %v2150_v45, %v1986_v44 }
 0x2c9   : > { %v2619_v14 = vsel %vm2554_vm6, %v2522_v18, %v2587_v21  ;;  %v2454_v19 = vadd.f32 %v7257_v26, %v2220_v4  ;;  %2436 = vmatmul.bf16.gmra.mxu0 %v2291_v54  ;;  %v7332_v50 = vpop.f32.mrf.mxu2  ;;  %v1988_v21 = vadd.f32 %v7290_v38, %v1753_v0  ;;  %v2037_v4 = vld [vmem:[#allocation2 + $0x169] sm:$0xff]  ;;  %v6026_v0 = vld [vmem:[%s8573_s2 + $0xd8] sm:$0xff] }
 0x2ca   : > { %2706 = vst [vmem:[#allocation3 + $0x61] sm:$0xff] %v2619_v14 }
 0x2cb   : > { %v2490_v53 = vmul.f32 %v7221_v56, %v2454_v19  ;;  %2192 = vmatmul.bf16.gmra.mxu3 %v2055_v11  ;;  %v7335_v23 = vpop.f32.mrf.mxu0  ;;  %v2038_v11 = vld [vmem:[#allocation2 + $0x171] sm:$0xff]  ;;  %v6003_v19 = vld [vmem:[%s8573_s2 + $0x20] sm:$0xff] }
 0x2cc   : > { %v2056_v10 = vpack.c.bf16 %v2038_v11, %v2037_v4  ;;  %3049 = vmatpush.bf16.msrb.mxu2 %v6003_v19  ;;  %v6017_v4 = vld [vmem:[%s8573_s2 + $0x90] sm:$0xff] }
 0x2cd   : > { %v2523_v55 = vadd.f32 %v7229_v48, %v2490_v53  ;;  %v6140_v53 = vld [vmem:[#allocation2] sm:$0xff] }
 0x2ce   : > { %v2153_v26 = vpop.f32.mrf.mxu3 }
 0x2cf   : > { %vm2555_vm7 = vcmp.gt.f32.partialorder %v2523_v55, 0.0  ;;  %v2588_v32 = vmul.f32 %v7235_v51, %v2523_v55  ;;  %v2221_v44 = vadd.f32 %v2153_v26, %v1987_v57  ;;  %v7358_v57 = vpack.c.bf16 %v6140_v53, %v6140_v53 }
 0x2d1   : > { %v2620_v18 = vsel %vm2555_vm7, %v2523_v55, %v2588_v32  ;;  %v2455_v35 = vadd.f32 %v7270_v12, %v2221_v44  ;;  %v7349_v8 = vpop.f32.mrf.mxu2  ;;  %v6027_v12 = vld [vmem:[%s8573_s2 + $0xe0] sm:$0xff]  ;;  %v6002_v32 = vld [vmem:[%s8573_s2 + $0x18] sm:$0xff] }
 0x2d2   : > { %2707 = vst [vmem:[#allocation3 + $0x69] sm:$0xff] %v2620_v18  ;;  %v2832_v9 = vpack.c.bf16 %v2620_v18, %v2619_v14  ;;  %3485 = vmatpush.bf16.msrb.mxu0 %v6027_v12  ;;  %v2276_v55 = vld [vmem:[#allocation2 + $0x1a2] sm:$0xff]  ;;  %v6018_v44 = vld [vmem:[%s8573_s2 + $0x98] sm:$0xff]  ;;  %v1989_v18 = vadd.f32 %v7306_v3, %v7044_v62  ;;  %3050 = vmatpush.bf16.msrb.mxu2 %v6002_v32  ;;  %v6025_v62 = vld [vmem:[%s8573_s2 + $0xd0] sm:$0xff] }
 0x2d3   : > { %v2491_v45 = vmul.f32 %v7221_v56, %v2455_v35  ;;  %v7355_v34 = vpop.f32.mrf.mxu0  ;;  %v2292_v26 = vpack.c.bf16 %v2276_v55, %v2275_v33  ;;  %3252 = vmatpush.bf16.msrb.mxu3 %v6018_v44  ;;  %v2040_v33 = vld [vmem:[#allocation2 + $0x189] sm:$0xff]  ;;  %v5999_v55 = vld [vmem:[%s8573_s2] sm:$0xff] }
 0x2d4   : > { %2937 = vmatmul.bf16.gmra.mxu1 %v2832_v9 }
 0x2d5   : > { %v2524_v6 = vadd.f32 %v7229_v48, %v2491_v45 }
 0x2d6   : > { %v2155_v1 = vpop.f32.mrf.mxu3  ;;  %1973 = vmatmul.bf16.gmra.mxu2 %v7358_v57  ;;  %3486 = vmatpush.bf16.msrb.mxu0 %v6026_v0 }
 0x2d7   : > { %vm2556_vm8 = vcmp.gt.f32.partialorder %v2524_v6, 0.0  ;;  %v2589_v38 = vmul.f32 %v7235_v51, %v2524_v6  ;;  %v2222_v14 = vadd.f32 %v2155_v1, %v1988_v21  ;;  %v6001_v21 = vld [vmem:[%s8573_s2 + $0x10] sm:$0xff]  ;;  %3253 = vmatpush.bf16.msrb.mxu3 %v6017_v4  ;;  %v1755_v1 = vadd.f32 %v7018_v63, %v7051_v24  ;;  %v3369_v4 = vld [vmem:[#allocation3 + $0x18] sm:$0xff] }
 0x2d8   : > { %3051 = vmatpush.bf16.msrb.mxu2 %v6001_v21  ;;  %v6035_v21 = vld [vmem:[%s8573_s2 + $0x120] sm:$0xff] }
 0x2d9   : > { %v2621_v47 = vsel %vm2556_vm8, %v2524_v6, %v2589_v38  ;;  %v2456_v54 = vadd.f32 %v7283_v27, %v2222_v14  ;;  %2441 = vmatmul.bf16.gmra.mxu0 %v2292_v26  ;;  %v7374_v45 = vpop.f32.mrf.mxu2  ;;  %v6000_v38 = vld [vmem:[%s8573_s2 + $0x8] sm:$0xff]  ;;  %v1990_v24 = vadd.f32 %v7319_v29, %v1755_v1  ;;  %v6015_v26 = vld [vmem:[%s8573_s2 + $0x80] sm:$0xff]  ;;  %3719 = vmatpush.bf16.msrb.mxu1 %v6035_v21 }
 0x2da   : > { %2708 = vst [vmem:[#allocation3 + $0x79] sm:$0xff] %v2621_v47  ;;  %3487 = vmatpush.bf16.msrb.mxu0 %v6025_v62  ;;  %v6016_v14 = vld [vmem:[%s8573_s2 + $0x88] sm:$0xff]  ;;  %v6023_v29 = vld [vmem:[%s8573_s2 + $0xc0] sm:$0xff] }
 0x2db   : > { %v2492_v27 = vmul.f32 %v7221_v56, %v2456_v54  ;;  %2197 = vmatmul.bf16.gmra.mxu3 %v2056_v10  ;;  %v7386_v6 = vpop.f32.mrf.mxu0  ;;  %v6024_v10 = vld [vmem:[%s8573_s2 + $0xc8] sm:$0xff] }
 0x2dc   : > { %3052 = vmatpush.bf16.msrb.mxu2 %v6000_v38  ;;  %3254 = vmatpush.bf16.msrb.mxu3 %v6016_v14  ;;  %v1757_v14 = vadd.f32 %v7042_v28, %v7066_v46 }
 0x2dd   : > { %v2525_v35 = vadd.f32 %v7229_v48, %v2492_v27 }
 0x2de   : > { %v2158_v9 = vpop.f32.mrf.mxu3  ;;  %3488 = vmatpush.bf16.msrb.mxu0 %v6024_v10 }
 0x2df   : > { %vm2557_vm9 = vcmp.gt.f32.partialorder %v2525_v35, 0.0  ;;  %v2590_v3 = vmul.f32 %v7235_v51, %v2525_v35  ;;  %v2223_v11 = vadd.f32 %v2158_v9, %v1989_v18  ;;  %v3370_v18 = vld [vmem:[#allocation3 + $0x20] sm:$0xff] }
 0x2e0   : > { %3053 = vmatpush.bf16.msrb.mxu2 %v5999_v55  ;;  %3255 = vmatpush.bf16.msrb.mxu3 %v6015_v26 }
 0x2e1   : > { %v2622_v19 = vsel %vm2557_vm9, %v2525_v35, %v2590_v3  ;;  %v2457_v61 = vadd.f32 %v7293_v15, %v2223_v11  ;;  %v2039_v15 = vld [vmem:[#allocation2 + $0x181] sm:$0xff]  ;;  %v7403_v53 = vpop.f32.mrf.mxu2  ;;  %v1991_v3 = vadd.f32 %v7332_v50, %v7060_v36  ;;  %v3401_v11 = vpack.c.bf16 %v3370_v18, %v3369_v4 }
 0x2e2   : > { %2709 = vst [vmem:[#allocation3 + $0x81] sm:$0xff] %v2622_v19  ;;  %v2833_v12 = vpack.c.bf16 %v2622_v19, %v2621_v47  ;;  %v2057_v0 = vpack.c.bf16 %v2040_v33, %v2039_v15  ;;  %3489 = vmatpush.bf16.msrb.mxu0 %v6023_v29  ;;  %v2042_v15 = vld [vmem:[#allocation2 + $0x1a1] sm:$0xff] }
 0x2e3   : > { %v2493_v63 = vmul.f32 %v7221_v56, %v2457_v61  ;;  %v7415_v27 = vpop.f32.mrf.mxu0 }
 0x2e4   : > { %2942 = vmatmul.bf16.gmra.mxu1 %v2833_v12 }
 0x2e5   : > { %v2526_v47 = vadd.f32 %v7229_v48, %v2493_v63  ;;  %v1992_v63 = vadd.f32 %v7349_v8, %v1757_v14  ;;  %v3371_v8 = vld [vmem:[#allocation3 + $0x30] sm:$0xff] }
 0x2e6   : > { %v2160_v54 = vpop.f32.mrf.mxu3  ;;  %3054 = vmatmul.bf16.vlgmr.msrb.gmra.mxu2 %v7358_v57 }
 0x2e7   : > { %vm2558_vm10 = vcmp.gt.f32.partialorder %v2526_v47, 0.0  ;;  %v2591_v32 = vmul.f32 %v7235_v51, %v2526_v47  ;;  %v2224_v44 = vadd.f32 %v2160_v54, %v1990_v24  ;;  %v2041_v24 = vld [vmem:[#allocation2 + $0x199] sm:$0xff] }
 0x2e8   : > { %v2058_v55 = vpack.c.bf16 %v2042_v15, %v2041_v24 }
 0x2e9   : > { %v2623_v35 = vsel %vm2558_vm10, %v2526_v47, %v2591_v32  ;;  %v2458_v9 = vadd.f32 %v7309_v60, %v2224_v44  ;;  %3490 = vmatmul.bf16.vlgmr.msrb.gmra.mxu0 %v3401_v11  ;;  %v7426_v19 = vpop.f32.mrf.mxu2 }
 0x2ea   : > { %2710 = vst [vmem:[#allocation3 + $0x91] sm:$0xff] %v2623_v35 }
 0x2eb   : > { %v2494_v62 = vmul.f32 %v7221_v56, %v2458_v9  ;;  %2202 = vmatmul.bf16.gmra.mxu3 %v2057_v0  ;;  %v7429_v38 = vpop.f32.mrf.mxu0  ;;  %v1993_v0 = vadd.f32 %v7374_v45, %v7078_v49 }
 0x2ed   : > { %v2527_v60 = vadd.f32 %v7229_v48, %v2494_v62  ;;  %v1759_v62 = vadd.f32 %v7058_v16, %v7084_v17  ;;  %v7460_v16 = vpop.f32.mrf.mxu1 }
 0x2ee   : > { %v2163_v1 = vpop.f32.mrf.mxu3 }
 0x2ef   : > { %vm2559_vm11 = vcmp.gt.f32.partialorder %v2527_v60, 0.0  ;;  %v2592_v61 = vmul.f32 %v7235_v51, %v2527_v60  ;;  %v2225_v12 = vadd.f32 %v2163_v1, %v1991_v3  ;;  %v1994_v1 = vadd.f32 %v7403_v53, %v1759_v62  ;;  %v6034_v53 = vld [vmem:[%s8573_s2 + $0x118] sm:$0xff]  ;;  %v3137_v62 = vld [vmem:[#allocation3 + $0x1a] sm:$0xff] }
 0x2f0   : > { %3720 = vmatpush.bf16.msrb.mxu1 %v6034_v53 }
 0x2f1   : > { %v2624_v36 = vsel %vm2559_vm11, %v2527_v60, %v2592_v61  ;;  %v2459_v50 = vadd.f32 %v7322_v40, %v2225_v12  ;;  %v7437_v54 = vpop.f32.mrf.mxu2  ;;  %v3372_v40 = vld [vmem:[#allocation3 + $0x38] sm:$0xff]  ;;  %v3135_v61 = vld [vmem:[#allocation3 + $0x2] sm:$0xff]  ;;  %v3136_v12 = vld [vmem:[#allocation3 + $0xa] sm:$0xff] }
 0x2f2   : > { %2711 = vst [vmem:[#allocation3 + $0x99] sm:$0xff] %v2624_v36  ;;  %v2834_v57 = vpack.c.bf16 %v2624_v36, %v2623_v35  ;;  %v3402_v18 = vpack.c.bf16 %v3372_v40, %v3371_v8 }
 0x2f3   : > { %v2495_v10 = vmul.f32 %v7221_v56, %v2459_v50 }
 0x2f4   : > { %2947 = vmatmul.bf16.gmra.mxu1 %v2834_v57  ;;  %v3167_v57 = vpack.c.bf16 %v3136_v12, %v3135_v61  ;;  %v3375_v12 = vld [vmem:[#allocation3 + $0x60] sm:$0xff] }
 0x2f5   : > { %v2528_v33 = vadd.f32 %v7229_v48, %v2495_v10  ;;  %v3374_v10 = vld [vmem:[#allocation3 + $0x50] sm:$0xff]  ;;  %v7476_v8 = vpop.f32.mrf.mxu1 }
 0x2f6   : > { %v2165_v47 = vpop.f32.mrf.mxu3  ;;  %v7441_v32 = vpop.f32.mrf.mxu0  ;;  %3059 = vmatmul.bf16.gmra.mxu2 %v3401_v11 }
 0x2f7   : > { %vm2560_vm12 = vcmp.gt.f32.partialorder %v2528_v33, 0.0  ;;  %v2593_v28 = vmul.f32 %v7235_v51, %v2528_v33  ;;  %v2226_v46 = vadd.f32 %v2165_v47, %v1992_v63 }
 0x2f9   : > { %v2625_v26 = vsel %vm2560_vm12, %v2528_v33, %v2593_v28  ;;  %v2460_v29 = vadd.f32 %v7335_v23, %v2226_v46  ;;  %3495 = vmatmul.bf16.gmra.mxu0 %v3402_v18  ;;  %v7447_v21 = vpop.f32.mrf.mxu2  ;;  %v3373_v33 = vld [vmem:[#allocation3 + $0x48] sm:$0xff]  ;;  %v1995_v28 = vadd.f32 %v7426_v19, %v7092_v42 }
 0x2fa   : > { %2712 = vst [vmem:[#allocation3 + $0xa9] sm:$0xff] %v2625_v26  ;;  %v3403_v46 = vpack.c.bf16 %v3374_v10, %v3373_v33 }
 0x2fb   : > { %v2496_v44 = vmul.f32 %v7221_v56, %v2460_v29  ;;  %2207 = vmatmul.bf16.gmra.mxu3 %v2058_v55 }
 0x2fd   : > { %v2529_v35 = vadd.f32 %v7229_v48, %v2496_v44  ;;  %v1761_v44 = vadd.f32 %v7076_v31, %v7098_v20 }
 0x2fe   : > { %v2168_v9 = vpop.f32.mrf.mxu3  ;;  %v7453_v45 = vpop.f32.mrf.mxu0 }
 0x2ff   : > { %vm2561_vm13 = vcmp.gt.f32.partialorder %v2529_v35, 0.0  ;;  %v2594_v23 = vmul.f32 %v7235_v51, %v2529_v35  ;;  %v2227_v4 = vadd.f32 %v2168_v9, %v1993_v0  ;;  %v1996_v9 = vadd.f32 %v7437_v54, %v1761_v44  ;;  %v3378_v44 = vld [vmem:[#allocation3 + $0x80] sm:$0xff] }
 0x301   : > { %v2626_v3 = vsel %vm2561_vm13, %v2529_v35, %v2594_v23  ;;  %v2461_v60 = vadd.f32 %v7355_v34, %v2227_v4  ;;  %v7458_v50 = vpop.f32.mrf.mxu2 }
 0x302   : > { %2713 = vst [vmem:[#allocation3 + $0xb1] sm:$0xff] %v2626_v3  ;;  %v2835_v49 = vpack.c.bf16 %v2626_v3, %v2625_v26  ;;  %v3138_v3 = vld [vmem:[#allocation3 + $0x22] sm:$0xff] }
 0x303   : > { %v2497_v11 = vmul.f32 %v7221_v56, %v2461_v60  ;;  %v3168_v61 = vpack.c.bf16 %v3138_v3, %v3137_v62 }
 0x304   : > { %2952 = vmatmul.bf16.gmra.mxu1 %v2835_v49 }
 0x305   : > { %v2530_v14 = vadd.f32 %v7229_v48, %v2497_v11 }
 0x306   : > { %v2170_v36 = vpop.f32.mrf.mxu3  ;;  %v7467_v15 = vpop.f32.mrf.mxu0  ;;  %3064 = vmatmul.bf16.gmra.mxu2 %v3402_v18 }
 0x307   : > { %vm2562_vm14 = vcmp.gt.f32.partialorder %v2530_v14, 0.0  ;;  %v2595_v17 = vmul.f32 %v7235_v51, %v2530_v14  ;;  %v2228_v34 = vadd.f32 %v2170_v36, %v1994_v1  ;;  %v7490_v1 = vpop.f32.mrf.mxu1  ;;  %v1997_v36 = vadd.f32 %v7447_v21, %v7107_v25 }
 0x309   : > { %v2627_v63 = vsel %vm2562_vm14, %v2530_v14, %v2595_v17  ;;  %v2462_v24 = vadd.f32 %v7386_v6, %v2228_v34  ;;  %3500 = vmatmul.bf16.gmra.mxu0 %v3403_v46  ;;  %v7473_v40 = vpop.f32.mrf.mxu2 }
 0x30a   : > { %2714 = vst [vmem:[#allocation3 + $0xc1] sm:$0xff] %v2627_v63  ;;  %v1999_v62 = vadd.f32 %v7473_v40, %v7121_v59 }
 0x30b   : > { %v2498_v47 = vmul.f32 %v7221_v56, %v2462_v24  ;;  %3256 = vmatmul.bf16.vlgmr.msrb.gmra.mxu3 %v3167_v57  ;;  %v1763_v24 = vadd.f32 %v7090_v22, %v7115_v52 }
 0x30d   : > { %v2531_v55 = vadd.f32 %v7229_v48, %v2498_v47 }
 0x30e   : > { %v2173_v6 = vpop.f32.mrf.mxu3  ;;  %v7481_v18 = vpop.f32.mrf.mxu0 }
 0x30f   : > { %vm2563_vm15 = vcmp.gt.f32.partialorder %v2531_v55, 0.0  ;;  %v2596_v26 = vmul.f32 %v7235_v51, %v2531_v55  ;;  %v2229_v29 = vadd.f32 %v2173_v6, %v1995_v28 }
 0x311   : > { %v2628_v0 = vsel %vm2563_vm15, %v2531_v55, %v2596_v26  ;;  %v2463_v42 = vadd.f32 %v7415_v27, %v2229_v29  ;;  %v7486_v60 = vpop.f32.mrf.mxu2  ;;  %v3376_v27 = vld [vmem:[#allocation3 + $0x68] sm:$0xff]  ;;  %v3139_v26 = vld [vmem:[#allocation3 + $0x32] sm:$0xff]  ;;  %v3140_v29 = vld [vmem:[#allocation3 + $0x3a] sm:$0xff] }
 0x312   : > { %2715 = vst [vmem:[#allocation3 + $0xc9] sm:$0xff] %v2628_v0  ;;  %v2836_v19 = vpack.c.bf16 %v2628_v0, %v2627_v63  ;;  %v3404_v17 = vpack.c.bf16 %v3376_v27, %v3375_v12 }
 0x313   : > { %v2499_v35 = vmul.f32 %v7221_v56, %v2463_v42 }
 0x314   : > { %2957 = vmatmul.bf16.gmra.mxu1 %v2836_v19  ;;  %v3169_v19 = vpack.c.bf16 %v3140_v29, %v3139_v26 }
 0x315   : > { %v2532_v23 = vadd.f32 %v7229_v48, %v2499_v35 }
 0x316   : > { %v2175_v4 = vpop.f32.mrf.mxu3  ;;  %v7492_v54 = vpop.f32.mrf.mxu0  ;;  %3069 = vmatmul.bf16.gmra.mxu2 %v3403_v46  ;;  %v1998_v46 = vadd.f32 %v7458_v50, %v1763_v24  ;;  %v6033_v50 = vld [vmem:[%s8573_s2 + $0x110] sm:$0xff]  ;;  %v3142_v24 = vld [vmem:[#allocation3 + $0x52] sm:$0xff] }
 0x317   : > { %vm2564_vm0 = vcmp.gt.f32.partialorder %v2532_v23, 0.0  ;;  %v2597_v31 = vmul.f32 %v7235_v51, %v2532_v23  ;;  %v2230_v20 = vadd.f32 %v2175_v4, %v1996_v9  ;;  %3721 = vmatpush.bf16.msrb.mxu1 %v6033_v50 }
 0x319   : > { %v2629_v49 = vsel %vm2564_vm0, %v2532_v23, %v2597_v31  ;;  %v2464_v11 = vadd.f32 %v7429_v38, %v2230_v20  ;;  %3505 = vmatmul.bf16.gmra.mxu0 %v3404_v17  ;;  %v7498_v38 = vpop.f32.mrf.mxu2  ;;  %v3377_v23 = vld [vmem:[#allocation3 + $0x78] sm:$0xff] }
 0x31a   : > { %2716 = vst [vmem:[#allocation3 + $0xd9] sm:$0xff] %v2629_v49  ;;  %v3405_v3 = vpack.c.bf16 %v3378_v44, %v3377_v23  ;;  %v2001_v29 = vadd.f32 %v7498_v38, %v7138_v5 }
 0x31b   : > { %v2500_v14 = vmul.f32 %v7221_v56, %v2464_v11  ;;  %3261 = vmatmul.bf16.gmra.mxu3 %v3168_v61  ;;  %v8588_v11 = vld [vmem:[#allocation7_spill] sm:$0xff] }
 0x31c   : > { %v1765_v61 = vadd.f32 %v8588_v11, %v7127_v39  ;;  %v3144_v11 = vld [vmem:[#allocation3 + $0x6a] sm:$0xff] }
 0x31d   : > { %v2533_v34 = vadd.f32 %v7229_v48, %v2500_v14 }
 0x31e   : > { %v2178_v57 = vpop.f32.mrf.mxu3  ;;  %v7506_v21 = vpop.f32.mrf.mxu0 }
 0x31f   : > { %vm2565_vm1 = vcmp.gt.f32.partialorder %v2533_v34, 0.0  ;;  %v2598_v10 = vmul.f32 %v7235_v51, %v2533_v34  ;;  %v2231_v63 = vadd.f32 %v2178_v57, %v1997_v36 }
 0x321   : > { %v2630_v53 = vsel %vm2565_vm1, %v2533_v34, %v2598_v10  ;;  %v2465_v33 = vadd.f32 %v7441_v32, %v2231_v63  ;;  %v7504_v47 = vpop.f32.mrf.mxu1  ;;  %v7511_v22 = vpop.f32.mrf.mxu2  ;;  %v2000_v34 = vadd.f32 %v7486_v60, %v1765_v61  ;;  %v3141_v63 = vld [vmem:[#allocation3 + $0x4a] sm:$0xff] }
 0x322   : > { %2717 = vst [vmem:[#allocation3 + $0xe1] sm:$0xff] %v2630_v53  ;;  %v2837_v25 = vpack.c.bf16 %v2630_v53, %v2629_v49 }
 0x323   : > { %v2501_v28 = vmul.f32 %v7221_v56, %v2465_v33  ;;  %v3380_v33 = vld [vmem:[#allocation3 + $0x98] sm:$0xff] }
 0x324   : > { %2962 = vmatmul.bf16.gmra.mxu1 %v2837_v25 }
 0x325   : > { %v2534_v55 = vadd.f32 %v7229_v48, %v2501_v28 }
 0x326   : > { %v2180_v6 = vpop.f32.mrf.mxu3  ;;  %v7520_v9 = vpop.f32.mrf.mxu0  ;;  %3074 = vmatmul.bf16.gmra.mxu2 %v3404_v17 }
 0x327   : > { %vm2566_vm2 = vcmp.gt.f32.partialorder %v2534_v55, 0.0  ;;  %v2599_v52 = vmul.f32 %v7235_v51, %v2534_v55  ;;  %v2232_v32 = vadd.f32 %v2180_v6, %v1998_v46  ;;  %v3170_v46 = vpack.c.bf16 %v3142_v24, %v3141_v63  ;;  %v3379_v6 = vld [vmem:[#allocation3 + $0x90] sm:$0xff] }
 0x329   : > { %v2631_v0 = vsel %vm2566_vm2, %v2534_v55, %v2599_v52  ;;  %v2466_v42 = vadd.f32 %v7453_v45, %v2232_v32  ;;  %v7515_v35 = vpop.f32.mrf.mxu1  ;;  %3510 = vmatmul.bf16.gmra.mxu0 %v3405_v3  ;;  %v7526_v20 = vpop.f32.mrf.mxu2  ;;  %v3406_v52 = vpack.c.bf16 %v3380_v33, %v3379_v6 }
 0x32a   : > { %2718 = vst [vmem:[#allocation3 + $0xf1] sm:$0xff] %v2631_v0  ;;  %v2003_v24 = vadd.f32 %v7526_v20, %v7152_v58 }
 0x32b   : > { %v2502_v4 = vmul.f32 %v7221_v56, %v2466_v42  ;;  %3266 = vmatmul.bf16.gmra.mxu3 %v3169_v19  ;;  %v8589_v19 = vld [vmem:[#allocation8_spill] sm:$0xff] }
 0x32c   : > { %v1767_v50 = vadd.f32 %v8589_v19, %v7144_v43 }
 0x32d   : > { %v2535_v45 = vadd.f32 %v7229_v48, %v2502_v4 }
 0x32e   : > { %v2183_v31 = vpop.f32.mrf.mxu3  ;;  %v7534_v36 = vpop.f32.mrf.mxu0 }
 0x32f   : > { %vm2567_vm3 = vcmp.gt.f32.partialorder %v2535_v45, 0.0  ;;  %v2600_v27 = vmul.f32 %v7235_v51, %v2535_v45  ;;  %v2233_v49 = vadd.f32 %v2183_v31, %v1999_v62 }
 0x331   : > { %v2632_v12 = vsel %vm2567_vm3, %v2535_v45, %v2600_v27  ;;  %v2467_v14 = vadd.f32 %v7467_v15, %v2233_v49  ;;  %v7532_v59 = vpop.f32.mrf.mxu1  ;;  %v7539_v39 = vpop.f32.mrf.mxu2  ;;  %v2002_v45 = vadd.f32 %v7511_v22, %v1767_v50  ;;  %v3143_v49 = vld [vmem:[#allocation3 + $0x62] sm:$0xff]  ;;  %v6032_v22 = vld [vmem:[%s8573_s2 + $0x108] sm:$0xff] }
 0x332   : > { %2719 = vst [vmem:[#allocation3 + $0xf9] sm:$0xff] %v2632_v12  ;;  %v2838_v40 = vpack.c.bf16 %v2632_v12, %v2631_v0  ;;  %v3382_v12 = vld [vmem:[#allocation3 + $0xb0] sm:$0xff]  ;;  %3722 = vmatpush.bf16.msrb.mxu1 %v6032_v22 }
 0x333   : > { %v2503_v17 = vmul.f32 %v7221_v56, %v2467_v14 }
 0x334   : > { %2967 = vmatmul.bf16.gmra.mxu1 %v2838_v40 }
 0x335   : > { %v2536_v57 = vadd.f32 %v7229_v48, %v2503_v17  ;;  %v3171_v17 = vpack.c.bf16 %v3144_v11, %v3143_v49 }
 0x336   : > { %v2185_v10 = vpop.f32.mrf.mxu3  ;;  %v7545_v60 = vpop.f32.mrf.mxu0  ;;  %3079 = vmatmul.bf16.gmra.mxu2 %v3405_v3 }
 0x337   : > { %vm2568_vm4 = vcmp.gt.f32.partialorder %v2536_v57, 0.0  ;;  %v2601_v15 = vmul.f32 %v7235_v51, %v2536_v57  ;;  %v2234_v53 = vadd.f32 %v2185_v10, %v2000_v34  ;;  %v3381_v10 = vld [vmem:[#allocation3 + $0xa8] sm:$0xff] }
 0x339   : > { %v2633_v25 = vsel %vm2568_vm4, %v2536_v57, %v2601_v15  ;;  %v2468_v28 = vadd.f32 %v7481_v18, %v2234_v53  ;;  %v7543_v55 = vpop.f32.mrf.mxu1  ;;  %3515 = vmatmul.bf16.gmra.mxu0 %v3406_v52  ;;  %v7551_v18 = vpop.f32.mrf.mxu2  ;;  %v3407_v15 = vpack.c.bf16 %v3382_v12, %v3381_v10 }
 0x33a   : > { %2720 = vst [vmem:[#allocation3 + $0x109] sm:$0xff] %v2633_v25 }
 0x33b   : > { %v2504_v26 = vmul.f32 %v7221_v56, %v2468_v28  ;;  %3271 = vmatmul.bf16.gmra.mxu3 %v3170_v46  ;;  %v1769_v46 = vadd.f32 %v7147_v7, %v7158_v37  ;;  %v7597_v37 = vld [vmem:[%s8575_s4 + $0x2] ss:$0 sm:$0xff] }
 0x33d   : > { %v2537_v32 = vadd.f32 %v7229_v48, %v2504_v26 }
 0x33e   : > { %v2188_v44 = vpop.f32.mrf.mxu3  ;;  %v7559_v38 = vpop.f32.mrf.mxu0 }
 0x33f   : > { %vm2569_vm5 = vcmp.gt.f32.partialorder %v2537_v32, 0.0  ;;  %v2602_v0 = vmul.f32 %v7235_v51, %v2537_v32  ;;  %v2235_v42 = vadd.f32 %v2188_v44, %v2001_v29 }
 0x341   : > { %v2634_v23 = vsel %vm2569_vm5, %v2537_v32, %v2602_v0  ;;  %v2469_v4 = vadd.f32 %v7492_v54, %v2235_v42  ;;  %v7557_v62 = vpop.f32.mrf.mxu1  ;;  %v7564_v43 = vpop.f32.mrf.mxu2  ;;  %v2004_v32 = vadd.f32 %v7539_v39, %v1769_v46  ;;  %v3145_v0 = vld [vmem:[#allocation3 + $0x7a] sm:$0xff]  ;;  %v3146_v42 = vld [vmem:[#allocation3 + $0x82] sm:$0xff] }
 0x342   : > { %2721 = vst [vmem:[#allocation3 + $0x111] sm:$0xff] %v2634_v23  ;;  %v2839_v5 = vpack.c.bf16 %v2634_v23, %v2633_v25  ;;  %v3172_v23 = vpack.c.bf16 %v3146_v42, %v3145_v0 }
 0x343   : > { %v2505_v3 = vmul.f32 %v7221_v56, %v2469_v4 }
 0x344   : > { %2972 = vmatmul.bf16.gmra.mxu1 %v2839_v5  ;;  %v3383_v5 = vld [vmem:[#allocation3 + $0xc0] sm:$0xff] }
 0x345   : > { %v2538_v31 = vadd.f32 %v7229_v48, %v2505_v3  ;;  %v7608_v3 = vld [vmem:[%s8575_s4] ss:$0 sm:$0xff] }
 0x346   : > { %v2190_v27 = vpop.f32.mrf.mxu3  ;;  %v7573_v57 = vpop.f32.mrf.mxu0  ;;  %3084 = vmatmul.bf16.gmra.mxu2 %v3406_v52 }
 0x347   : > { %vm2570_vm6 = vcmp.gt.f32.partialorder %v2538_v31, 0.0  ;;  %v2603_v54 = vmul.f32 %v7235_v51, %v2538_v31  ;;  %v2236_v61 = vadd.f32 %v2190_v27, %v2002_v45  ;;  %v7616_v27 = vld [vmem:[%s8575_s4 + $0x1] ss:$0 sm:$0xff] }
 0x349   : > { %v2635_v14 = vsel %vm2570_vm6, %v2538_v31, %v2603_v54  ;;  %v2470_v40 = vadd.f32 %v7506_v21, %v2236_v61  ;;  %v7568_v34 = vpop.f32.mrf.mxu1  ;;  %3520 = vmatmul.bf16.gmra.mxu0 %v3407_v15  ;;  %v7579_v33 = vpop.f32.mrf.mxu2  ;;  %v2005_v31 = vadd.f32 %v7551_v18, %v7170_v2  ;;  %v1771_v2 = vadd.f32 %v7168_v41, %v7176_v13 }
 0x34a   : > { %2722 = vst [vmem:[#allocation3 + $0x121] sm:$0xff] %v2635_v14 }
 0x34b   : > { %v2506_v63 = vmul.f32 %v7221_v56, %v2470_v40  ;;  %3276 = vmatmul.bf16.gmra.mxu3 %v3171_v17 }
 0x34d   : > { %v2539_v21 = vadd.f32 %v7229_v48, %v2506_v63  ;;  %v2006_v63 = vadd.f32 %v7564_v43, %v1771_v2  ;;  %v6031_v43 = vld [vmem:[%s8573_s2 + $0x100] sm:$0xff] }
 0x34e   : > { %v2193_v53 = vpop.f32.mrf.mxu3  ;;  %v7587_v29 = vpop.f32.mrf.mxu0  ;;  %3723 = vmatpush.bf16.msrb.mxu1 %v6031_v43  ;;  %v3150_v2 = vld [vmem:[#allocation3 + $0xb2] sm:$0xff] }
 0x34f   : > { %vm2571_vm7 = vcmp.gt.f32.partialorder %v2539_v21, 0.0  ;;  %v2604_v25 = vmul.f32 %v7235_v51, %v2539_v21  ;;  %v2237_v28 = vadd.f32 %v2193_v53, %v2003_v24  ;;  %v3148_v53 = vld [vmem:[#allocation3 + $0x9a] sm:$0xff] }
 0x351   : > { %v2636_v6 = vsel %vm2571_vm7, %v2539_v21, %v2604_v25  ;;  %v2471_v26 = vadd.f32 %v7520_v9, %v2237_v28  ;;  %v7585_v58 = vpop.f32.mrf.mxu1  ;;  %v7592_v7 = vpop.f32.mrf.mxu2  ;;  %v3147_v21 = vld [vmem:[#allocation3 + $0x92] sm:$0xff]  ;;  %v3386_v25 = vld [vmem:[#allocation3 + $0xe0] sm:$0xff] }
 0x352   : > { %2723 = vst [vmem:[#allocation3 + $0x129] sm:$0xff] %v2636_v6  ;;  %v2840_v20 = vpack.c.bf16 %v2636_v6, %v2635_v14  ;;  %v3173_v6 = vpack.c.bf16 %v3148_v53, %v3147_v21  ;;  %v3387_v53 = vld [vmem:[#allocation3 + $0xf0] sm:$0xff] }
 0x353   : > { %v2507_v52 = vmul.f32 %v7221_v56, %v2471_v26  ;;  %v3384_v56 = vld [vmem:[#allocation3 + $0xc8] sm:$0xff] }
 0x354   : > { %2977 = vmatmul.bf16.gmra.mxu1 %v2840_v20 }
 0x355   : > { %v2540_v51 = vadd.f32 %v7229_v48, %v2507_v52  ;;  %v3385_v52 = vld [vmem:[#allocation3 + $0xd8] sm:$0xff] }
 0x356   : > { %v2195_v44 = vpop.f32.mrf.mxu3  ;;  %v7603_v4 = vpop.f32.mrf.mxu0  ;;  %3089 = vmatmul.bf16.gmra.mxu2 %v3407_v15 }
 0x357   : > { %vm2572_vm8 = vcmp.gt.f32.partialorder %v2540_v51, 0.0  ;;  %v2605_v9 = vmul.f32 %v7597_v37, %v2540_v51  ;;  %v2238_v19 = vadd.f32 %v2195_v44, %v2004_v32  ;;  %v3409_v44 = vpack.c.bf16 %v3386_v25, %v3385_v52 }
 0x359   : > { %v2637_v50 = vsel %vm2572_vm8, %v2540_v51, %v2605_v9  ;;  %v2472_v39 = vadd.f32 %v7534_v36, %v2238_v19  ;;  %v7601_v48 = vpop.f32.mrf.mxu1  ;;  %v3408_v36 = vpack.c.bf16 %v3384_v56, %v3383_v5  ;;  %v7619_v54 = vpop.f32.mrf.mxu2  ;;  %v2007_v51 = vadd.f32 %v7579_v33, %v7182_v30  ;;  %v8590_v56 = vld [vmem:[#allocation10_spill] sm:$0xff] }
 0x35a   : > { %2724 = vst [vmem:[#allocation3 + $0x139] sm:$0xff] %v2637_v50 }
 0x35b   : > { %v2508_v45 = vmul.f32 %v7608_v3, %v2472_v39  ;;  %3281 = vmatmul.bf16.gmra.mxu3 %v3172_v23  ;;  %3525 = vmatmul.bf16.gmra.mxu0 %v3408_v36 }
 0x35d   : > { %v2541_v49 = vadd.f32 %v7616_v27, %v2508_v45 }
 0x35e   : > { %v2198_v11 = vpop.f32.mrf.mxu3  ;;  %v7627_v22 = vpop.f32.mrf.mxu0 }
 0x35f   : > { %vm2573_vm9 = vcmp.gt.f32.partialorder %v2541_v49, 0.0  ;;  %v2606_v61 = vmul.f32 %v7597_v37, %v2541_v49  ;;  %v2239_v12 = vadd.f32 %v2198_v11, %v2005_v31  ;;  %v6046_v31 = vld [vmem:[%s8573_s2 + $0x178] sm:$0xff] }
 0x360   : > { %3950 = vmatpush.bf16.msra.mxu2 %v6046_v31 }
 0x361   : > { %v2638_v18 = vsel %vm2573_vm9, %v2541_v49, %v2606_v61  ;;  %v2473_v14 = vadd.f32 %v7545_v60, %v2239_v12  ;;  %v7625_v40 = vpop.f32.mrf.mxu1  ;;  %v7632_v41 = vpop.f32.mrf.mxu2  ;;  %v3149_v12 = vld [vmem:[#allocation3 + $0xaa] sm:$0xff] }
 0x362   : > { %2725 = vst [vmem:[#allocation3 + $0x141] sm:$0xff] %v2638_v18  ;;  %v2841_v17 = vpack.c.bf16 %v2638_v18, %v2637_v50  ;;  %v8591_v50 = vld [vmem:[#allocation9_spill] sm:$0xff] }
 0x363   : > { %v2509_v10 = vmul.f32 %v7608_v3, %v2473_v14  ;;  %v1773_v39 = vadd.f32 %v8591_v50, %v8590_v56 }
 0x364   : > { %2982 = vmatmul.bf16.gmra.mxu1 %v2841_v17 }
 0x365   : > { %v2542_v24 = vadd.f32 %v7616_v27, %v2509_v10  ;;  %v2008_v11 = vadd.f32 %v7592_v7, %v1773_v39  ;;  %v3388_v10 = vld [vmem:[#allocation3 + $0xf8] sm:$0xff] }
 0x366   : > { %v2200_v15 = vpop.f32.mrf.mxu3  ;;  %v7641_v20 = vpop.f32.mrf.mxu0  ;;  %3094 = vmatmul.bf16.gmra.mxu2 %v3408_v36  ;;  %v6054_v36 = vld [vmem:[%s8573_s2 + $0x1b8] sm:$0xff] }
 0x367   : > { %vm2574_vm10 = vcmp.gt.f32.partialorder %v2542_v24, 0.0  ;;  %v2607_v13 = vmul.f32 %v7597_v37, %v2542_v24  ;;  %v2240_v60 = vadd.f32 %v2200_v15, %v2006_v63  ;;  %4185 = vmatpush.bf16.msra.mxu3 %v6054_v36  ;;  %v3174_v15 = vpack.c.bf16 %v3150_v2, %v3149_v12  ;;  %v3389_v2 = vld [vmem:[#allocation3 + $0x108] sm:$0xff] }
 0x369   : > { %v2639_v28 = vsel %vm2574_vm10, %v2542_v24, %v2607_v13  ;;  %v2474_v46 = vadd.f32 %v7559_v38, %v2240_v60  ;;  %v7636_v26 = vpop.f32.mrf.mxu1  ;;  %v7647_v42 = vpop.f32.mrf.mxu2  ;;  %v8592_v60 = vld [vmem:[#allocation11_spill] sm:$0xff] }
 0x36a   : > { %2726 = vst [vmem:[#allocation3 + $0x151] sm:$0xff] %v2639_v28  ;;  %v2009_v25 = vadd.f32 %v7619_v54, %v8592_v60  ;;  %v6070_v54 = vld [vmem:[%s8573_s2 + $0x238] sm:$0xff] }
 0x36b   : > { %v2510_v32 = vmul.f32 %v7608_v3, %v2474_v46  ;;  %3286 = vmatmul.bf16.gmra.mxu3 %v3173_v6  ;;  %3530 = vmatmul.bf16.gmra.mxu0 %v3409_v44  ;;  %v6062_v46 = vld [vmem:[%s8573_s2 + $0x1f8] sm:$0xff] }
 0x36c   : > { %4419 = vmatpush.bf16.msra.mxu0 %v6062_v46  ;;  %4653 = vmatpush.bf16.msra.mxu1 %v6070_v54 }
 0x36d   : > { %v2543_v38 = vadd.f32 %v7616_v27, %v2510_v32 }
 0x36e   : > { %v2203_v0 = vpop.f32.mrf.mxu3  ;;  %v7655_v45 = vpop.f32.mrf.mxu0 }
 0x36f   : > { %vm2575_vm11 = vcmp.gt.f32.partialorder %v2543_v38, 0.0  ;;  %v2608_v9 = vmul.f32 %v7597_v37, %v2543_v38  ;;  %v2241_v19 = vadd.f32 %v2203_v0, %v2007_v51  ;;  %v8593_v51 = vld [vmem:[#allocation12_spill] sm:$0xff] }
 0x371   : > { %v2640_v23 = vsel %vm2575_vm11, %v2543_v38, %v2608_v9  ;;  %v2475_v5 = vadd.f32 %v7573_v57, %v2241_v19  ;;  %v7653_v30 = vpop.f32.mrf.mxu1  ;;  %v7666_v18 = vpop.f32.mrf.mxu2 }
 0x372   : > { %2727 = vst [vmem:[#allocation3 + $0x159] sm:$0xff] %v2640_v23  ;;  %v2842_v33 = vpack.c.bf16 %v2640_v23, %v2639_v28  ;;  %v3410_v28 = vpack.c.bf16 %v3388_v10, %v3387_v53  ;;  %v3058_v46 = vadd.f32 %v7666_v18, %v7490_v1 }
 0x373   : > { %v2511_v49 = vmul.f32 %v7608_v3, %v2475_v5 }
 0x374   : > { %2987 = vmatmul.bf16.gmra.mxu1 %v2842_v33  ;;  %v3151_v33 = vld [vmem:[#allocation3 + $0xc2] sm:$0xff] }
 0x375   : > { %v2544_v57 = vadd.f32 %v7616_v27, %v2511_v49  ;;  %v3390_v49 = vld [vmem:[#allocation3 + $0x110] sm:$0xff] }
 0x376   : > { %v2205_v61 = vpop.f32.mrf.mxu3  ;;  %v7672_v21 = vpop.f32.mrf.mxu0  ;;  %3099 = vmatmul.bf16.gmra.mxu2 %v3409_v44  ;;  %v1775_v44 = vadd.f32 %v7460_v16, %v8593_v51  ;;  %v3152_v16 = vld [vmem:[#allocation3 + $0xca] sm:$0xff]  ;;  %v3411_v10 = vpack.c.bf16 %v3390_v49, %v3389_v2 }
 0x377   : > { %vm2576_vm12 = vcmp.gt.f32.partialorder %v2544_v57, 0.0  ;;  %v2609_v14 = vmul.f32 %v7597_v37, %v2544_v57  ;;  %v2242_v17 = vadd.f32 %v2205_v61, %v2008_v11  ;;  %v3175_v61 = vpack.c.bf16 %v3152_v16, %v3151_v33  ;;  %v3392_v51 = vld [vmem:[#allocation3 + $0x128] sm:$0xff]  ;;  %v6069_v33 = vld [vmem:[%s8573_s2 + $0x230] sm:$0xff] }
 0x378   : > { %v2010_v39 = vadd.f32 %v7632_v41, %v1775_v44  ;;  %4654 = vmatpush.bf16.msra.mxu1 %v6069_v33 }
 0x379   : > { %v2641_v63 = vsel %vm2576_vm12, %v2544_v57, %v2609_v14  ;;  %v2476_v24 = vadd.f32 %v7587_v29, %v2242_v17  ;;  %v7670_v7 = vpop.f32.mrf.mxu1  ;;  %v7681_v43 = vpop.f32.mrf.mxu2  ;;  %v3056_v17 = vadd.f32 %v7647_v42, %v7476_v8  ;;  %v6053_v8 = vld [vmem:[%s8573_s2 + $0x1b0] sm:$0xff] }
 0x37a   : > { %2728 = vst [vmem:[#allocation3 + $0x169] sm:$0xff] %v2641_v63  ;;  %4186 = vmatpush.bf16.msra.mxu3 %v6053_v8  ;;  %v3061_v1 = vadd.f32 %v7681_v43, %v7504_v47  ;;  %v3608_v8 = vld [vmem:[#allocation3 + $0x51] sm:$0xff] }
 0x37b   : > { %v2512_v13 = vmul.f32 %v7608_v3, %v2476_v24  ;;  %3291 = vmatmul.bf16.gmra.mxu3 %v3174_v15  ;;  %3535 = vmatmul.bf16.gmra.mxu0 %v3410_v28 }
 0x37d   : > { %v2545_v29 = vadd.f32 %v7616_v27, %v2512_v13  ;;  %v3604_v13 = vld [vmem:[#allocation3 + $0x21] sm:$0xff] }
 0x37e   : > { %v2208_v6 = vpop.f32.mrf.mxu3  ;;  %v7692_v56 = vpop.f32.mrf.mxu0 }
 0x37f   : > { %vm2577_vm13 = vcmp.gt.f32.partialorder %v2545_v29, 0.0  ;;  %v2610_v52 = vmul.f32 %v7597_v37, %v2545_v29  ;;  %v2243_v32 = vadd.f32 %v2208_v6, %v2009_v25  ;;  %v3153_v6 = vld [vmem:[#allocation3 + $0xda] sm:$0xff] }
 0x381   : > { %v2642_v38 = vsel %vm2577_vm13, %v2545_v29, %v2610_v52  ;;  %v2477_v0 = vadd.f32 %v7603_v4, %v2243_v32  ;;  %v7690_v9 = vpop.f32.mrf.mxu1  ;;  %v7697_v31 = vpop.f32.mrf.mxu2  ;;  %v3154_v52 = vld [vmem:[#allocation3 + $0xe2] sm:$0xff] }
 0x382   : > { %2729 = vst [vmem:[#allocation3 + $0x171] sm:$0xff] %v2642_v38  ;;  %v2843_v19 = vpack.c.bf16 %v2642_v38, %v2641_v63  ;;  %v3176_v44 = vpack.c.bf16 %v3154_v52, %v3153_v6  ;;  %v3063_v49 = vadd.f32 %v7697_v31, %v7515_v35  ;;  %v3157_v52 = vld [vmem:[#allocation3 + $0x10a] sm:$0xff] }
 0x383   : > { %v2513_v50 = vmul.f32 %v7608_v3, %v2477_v0 }
 0x384   : > { %2992 = vmatmul.bf16.gmra.mxu1 %v2843_v19  ;;  %v3391_v19 = vld [vmem:[#allocation3 + $0x120] sm:$0xff] }
 0x385   : > { %v2546_v23 = vadd.f32 %v7616_v27, %v2513_v50  ;;  %v3412_v18 = vpack.c.bf16 %v3392_v51, %v3391_v19  ;;  %v6061_v50 = vld [vmem:[%s8573_s2 + $0x1f0] sm:$0xff]  ;;  %v3396_v19 = vld [vmem:[#allocation3 + $0x158] sm:$0xff] }
 0x386   : > { %v2210_v5 = vpop.f32.mrf.mxu3  ;;  %v7703_v41 = vpop.f32.mrf.mxu0  ;;  %3104 = vmatmul.bf16.gmra.mxu2 %v3410_v28  ;;  %4420 = vmatpush.bf16.msra.mxu0 %v6061_v50 }
 0x387   : > { %vm2578_vm14 = vcmp.gt.f32.partialorder %v2546_v23, 0.0  ;;  %v2611_v4 = vmul.f32 %v7597_v37, %v2546_v23  ;;  %v2244_v36 = vadd.f32 %v2210_v5, %v2010_v39 }
 0x389   : > { %v2643_v11 = vsel %vm2578_vm14, %v2546_v23, %v2611_v4  ;;  %v2478_v57 = vadd.f32 %v7627_v22, %v2244_v36  ;;  %v7701_v12 = vpop.f32.mrf.mxu1  ;;  %v3065_v22 = vpop.f32.mrf.mxu2  ;;  %v3605_v4 = vld [vmem:[#allocation3 + $0x31] sm:$0xff] }
 0x38a   : > { %2730 = vst [vmem:[#allocation3 + $0x181] sm:$0xff] %v2643_v11  ;;  %v3066_v35 = vadd.f32 %v3065_v22, %v7532_v59 }
 0x38b   : > { %v2514_v14 = vmul.f32 %v7608_v3, %v2478_v57  ;;  %3296 = vmatmul.bf16.gmra.mxu3 %v3175_v61  ;;  %3540 = vmatmul.bf16.gmra.mxu0 %v3411_v10  ;;  %v6045_v3 = vld [vmem:[%s8573_s2 + $0x170] sm:$0xff]  ;;  %v3155_v57 = vld [vmem:[#allocation3 + $0xf2] sm:$0xff] }
 0x38c   : > { %3951 = vmatpush.bf16.msra.mxu2 %v6045_v3  ;;  %v3156_v61 = vld [vmem:[#allocation3 + $0xfa] sm:$0xff] }
 0x38d   : > { %v2547_v63 = vadd.f32 %v7616_v27, %v2514_v14  ;;  %v3603_v27 = vld [vmem:[#allocation3 + $0x19] sm:$0xff] }
 0x38e   : > { %v3257_v24 = vpop.f32.mrf.mxu3  ;;  %v7721_v28 = vpop.f32.mrf.mxu0 }
 0x38f   : > { %vm2579_vm15 = vcmp.gt.f32.partialorder %v2547_v63, 0.0  ;;  %v2612_v15 = vmul.f32 %v7597_v37, %v2547_v63  ;;  %v3337_v53 = vadd.f32 %v3257_v24, %v3056_v17  ;;  %v3635_v37 = vpack.c.bf16 %v3604_v13, %v3603_v27  ;;  %v3394_v17 = vld [vmem:[#allocation3 + $0x140] sm:$0xff] }
 0x391   : > { %v2644_v42 = vsel %vm2579_vm15, %v2547_v63, %v2612_v15  ;;  %v7716_v60 = vpop.f32.mrf.mxu1  ;;  %v7719_v25 = vadd.f32 %v7641_v20, %v3337_v53  ;;  %v3067_v32 = vpop.f32.mrf.mxu2  ;;  %v3393_v15 = vld [vmem:[#allocation3 + $0x138] sm:$0xff] }
 0x392   : > { %2731 = vst [vmem:[#allocation3 + $0x189] sm:$0xff] %v2644_v42  ;;  %v3413_v31 = vpack.c.bf16 %v3394_v17, %v3393_v15  ;;  %v6044_v42 = vld [vmem:[%s8573_s2 + $0x168] sm:$0xff]  ;;  %v3160_v15 = vld [vmem:[#allocation3 + $0x12a] sm:$0xff] }
 0x393   : > { %3952 = vmatpush.bf16.msra.mxu2 %v6044_v42 }
 0x394   : > { %3724 = vmatmul.bf16.vlgmr.msrb.gmra.mxu1 %v3635_v37  ;;  %v3607_v37 = vld [vmem:[#allocation3 + $0x49] sm:$0xff] }
 0x395   : > { %v7771_v22 = vpack.c.bf16 %v3608_v8, %v3607_v37 }
 0x396   : > { %v3259_v29 = vpop.f32.mrf.mxu3  ;;  %v7730_v0 = vpop.f32.mrf.mxu0  ;;  %3109 = vmatmul.bf16.gmra.mxu2 %v3411_v10  ;;  %v3177_v10 = vpack.c.bf16 %v3156_v61, %v3155_v57  ;;  %v3609_v57 = vld [vmem:[#allocation3 + $0x61] sm:$0xff] }
 0x397   : > { %v3338_v54 = vadd.f32 %v3259_v29, %v3058_v46  ;;  %v3068_v29 = vadd.f32 %v3067_v32, %v7543_v55 }
 0x399   : > { %v7725_v38 = vpop.f32.mrf.mxu1  ;;  %v7728_v20 = vadd.f32 %v7655_v45, %v3338_v54  ;;  %v3070_v23 = vpop.f32.mrf.mxu2  ;;  %v3606_v45 = vld [vmem:[#allocation3 + $0x39] sm:$0xff] }
 0x39a   : > { %v7745_v43 = vpack.c.bf16 %v3606_v45, %v3605_v4  ;;  %v3158_v54 = vld [vmem:[#allocation3 + $0x112] sm:$0xff]  ;;  %v3071_v55 = vadd.f32 %v3070_v23, %v7557_v62 }
 0x39b   : > { %3301 = vmatmul.bf16.gmra.mxu3 %v3176_v44  ;;  %3545 = vmatmul.bf16.gmra.mxu0 %v3412_v18 }
 0x39e   : > { %v3262_v39 = vpop.f32.mrf.mxu3  ;;  %v7747_v36 = vpop.f32.mrf.mxu0 }
 0x39f   : > { %v3339_v5 = vadd.f32 %v3262_v39, %v3061_v1  ;;  %v3178_v1 = vpack.c.bf16 %v3158_v54, %v3157_v52  ;;  %v3395_v39 = vld [vmem:[#allocation3 + $0x150] sm:$0xff]  ;;  %v3612_v52 = vld [vmem:[#allocation3 + $0x81] sm:$0xff] }
 0x3a0   : > { %v3414_v32 = vpack.c.bf16 %v3396_v19, %v3395_v39  ;;  %v6043_v54 = vld [vmem:[%s8573_s2 + $0x160] sm:$0xff]  ;;  %v3611_v19 = vld [vmem:[#allocation3 + $0x79] sm:$0xff] }
 0x3a1   : > { %v7740_v16 = vpop.f32.mrf.mxu1  ;;  %v7743_v47 = vadd.f32 %v7672_v21, %v3339_v5  ;;  %v3072_v2 = vpop.f32.mrf.mxu2  ;;  %v6060_v5 = vld [vmem:[%s8573_s2 + $0x1e8] sm:$0xff]  ;;  %3953 = vmatpush.bf16.msra.mxu2 %v6043_v54 }
 0x3a2   : > { %4421 = vmatpush.bf16.msra.mxu0 %v6060_v5  ;;  %v3162_v5 = vld [vmem:[#allocation3 + $0x142] sm:$0xff]  ;;  %v3613_v54 = vld [vmem:[#allocation3 + $0x91] sm:$0xff] }
 0x3a4   : > { %3729 = vmatmul.bf16.gmra.mxu1 %v7745_v43 }
 0x3a6   : > { %v3264_v11 = vpop.f32.mrf.mxu3  ;;  %v7757_v24 = vpop.f32.mrf.mxu0  ;;  %3114 = vmatmul.bf16.gmra.mxu2 %v3412_v18 }
 0x3a7   : > { %v3340_v14 = vadd.f32 %v3264_v11, %v3063_v49  ;;  %v3610_v49 = vld [vmem:[#allocation3 + $0x69] sm:$0xff] }
 0x3a8   : > { %v7796_v23 = vpack.c.bf16 %v3610_v49, %v3609_v57 }
 0x3a9   : > { %v7752_v63 = vpop.f32.mrf.mxu1  ;;  %v7755_v21 = vadd.f32 %v7692_v56, %v3340_v14  ;;  %v3075_v13 = vpop.f32.mrf.mxu2  ;;  %v6052_v56 = vld [vmem:[%s8573_s2 + $0x1a8] sm:$0xff]  ;;  %v3073_v14 = vadd.f32 %v3072_v2, %v7568_v34 }
 0x3aa   : > { %4187 = vmatpush.bf16.msra.mxu3 %v6052_v56  ;;  %v3397_v56 = vld [vmem:[#allocation3 + $0x168] sm:$0xff]  ;;  %v3076_v34 = vadd.f32 %v3075_v13, %v7585_v58  ;;  %v7825_v13 = vpack.c.bf16 %v3612_v52, %v3611_v19 }
 0x3ab   : > { %3306 = vmatmul.bf16.gmra.mxu3 %v3177_v10  ;;  %3550 = vmatmul.bf16.gmra.mxu0 %v3413_v31  ;;  %v3159_v10 = vld [vmem:[#allocation3 + $0x122] sm:$0xff] }
 0x3ae   : > { %v3267_v53 = vpop.f32.mrf.mxu3  ;;  %v7773_v46 = vpop.f32.mrf.mxu0 }
 0x3af   : > { %v3341_v3 = vadd.f32 %v3267_v53, %v3066_v35  ;;  %v3398_v53 = vld [vmem:[#allocation3 + $0x170] sm:$0xff] }
 0x3b0   : > { %v3415_v2 = vpack.c.bf16 %v3398_v53, %v3397_v56  ;;  %v6041_v56 = vld [vmem:[%s8573_s2 + $0x150] sm:$0xff] }
 0x3b1   : > { %v7766_v27 = vpop.f32.mrf.mxu1  ;;  %v7769_v59 = vadd.f32 %v7703_v41, %v3341_v3  ;;  %v3077_v51 = vpop.f32.mrf.mxu2  ;;  %v3179_v3 = vpack.c.bf16 %v3160_v15, %v3159_v10  ;;  %v6050_v10 = vld [vmem:[%s8573_s2 + $0x198] sm:$0xff] }
 0x3b2   : > { %v3078_v39 = vadd.f32 %v3077_v51, %v7601_v48  ;;  %v6058_v15 = vld [vmem:[%s8573_s2 + $0x1d8] sm:$0xff] }
 0x3b4   : > { %3734 = vmatmul.bf16.gmra.mxu1 %v7771_v22 }
 0x3b6   : > { %v3269_v6 = vpop.f32.mrf.mxu3  ;;  %v7782_v50 = vpop.f32.mrf.mxu0  ;;  %3119 = vmatmul.bf16.gmra.mxu2 %v3413_v31 }
 0x3b7   : > { %v3342_v44 = vadd.f32 %v3269_v6, %v3068_v29 }
 0x3b9   : > { %v7777_v18 = vpop.f32.mrf.mxu1  ;;  %v7780_v41 = vadd.f32 %v7721_v28, %v3342_v44  ;;  %v3080_v33 = vpop.f32.mrf.mxu2  ;;  %v6068_v28 = vld [vmem:[%s8573_s2 + $0x228] sm:$0xff] }
 0x3ba   : > { %4655 = vmatpush.bf16.msra.mxu1 %v6068_v28 }
 0x3bb   : > { %3311 = vmatmul.bf16.gmra.mxu3 %v3178_v1  ;;  %3555 = vmatmul.bf16.gmra.mxu0 %v3414_v32 }
 0x3be   : > { %v3272_v45 = vpop.f32.mrf.mxu3  ;;  %v7798_v61 = vpop.f32.mrf.mxu0 }
 0x3bf   : > { %v3343_v4 = vadd.f32 %v3272_v45, %v3071_v55 }
 0x3c1   : > { %v7791_v11 = vpop.f32.mrf.mxu1  ;;  %v7794_v62 = vadd.f32 %v7730_v0, %v3343_v4  ;;  %v7802_v35 = vpop.f32.mrf.mxu2  ;;  %v6059_v4 = vld [vmem:[%s8573_s2 + $0x1e0] sm:$0xff] }
 0x3c2   : > { %4422 = vmatpush.bf16.msra.mxu0 %v6059_v4  ;;  %v3837_v4 = vld [vmem:[#allocation3 + $0x1a] sm:$0xff] }
 0x3c4   : > { %3739 = vmatmul.bf16.gmra.mxu1 %v7796_v23 }
 0x3c6   : > { %v3274_v17 = vpop.f32.mrf.mxu3  ;;  %v7809_v42 = vpop.f32.mrf.mxu0  ;;  %3124 = vmatmul.bf16.gmra.mxu2 %v3414_v32  ;;  %v3161_v32 = vld [vmem:[#allocation3 + $0x13a] sm:$0xff]  ;;  %4423 = vmatpush.bf16.msra.mxu0 %v6058_v15 }
 0x3c7   : > { %v3344_v31 = vadd.f32 %v3274_v17, %v3073_v14  ;;  %v3180_v28 = vpack.c.bf16 %v3162_v5, %v3161_v32  ;;  %v3399_v14 = vld [vmem:[#allocation3 + $0x180] sm:$0xff]  ;;  %v6042_v17 = vld [vmem:[%s8573_s2 + $0x158] sm:$0xff]  ;;  %v6056_v32 = vld [vmem:[%s8573_s2 + $0x1c8] sm:$0xff]  ;;  %v3083_v5 = vadd.f32 %v7802_v35, %v7636_v26 }
 0x3c8   : > { %3954 = vmatpush.bf16.msra.mxu2 %v6042_v17  ;;  %v6039_v17 = vld [vmem:[%s8573_s2 + $0x140] sm:$0xff] }
 0x3c9   : > { %v7804_v8 = vpop.f32.mrf.mxu1  ;;  %v7807_v0 = vadd.f32 %v7747_v36, %v3344_v31  ;;  %v7812_v29 = vpop.f32.mrf.mxu2  ;;  %v6051_v36 = vld [vmem:[%s8573_s2 + $0x1a0] sm:$0xff]  ;;  %v3081_v31 = vadd.f32 %v3080_v33, %v7625_v40  ;;  %v6057_v40 = vld [vmem:[%s8573_s2 + $0x1d0] sm:$0xff] }
 0x3ca   : > { %4188 = vmatpush.bf16.msra.mxu3 %v6051_v36  ;;  %v6048_v36 = vld [vmem:[%s8573_s2 + $0x188] sm:$0xff]  ;;  %4424 = vmatpush.bf16.msra.mxu0 %v6057_v40  ;;  %v6055_v26 = vld [vmem:[%s8573_s2 + $0x1c0] sm:$0xff] }
 0x3cb   : > { %3316 = vmatmul.bf16.gmra.mxu3 %v3179_v3  ;;  %3560 = vmatmul.bf16.gmra.mxu0 %v3415_v2 }
 0x3cc   : > { %3955 = vmatpush.bf16.msra.mxu2 %v6041_v56 }
 0x3ce   : > { %v3277_v37 = vpop.f32.mrf.mxu3  ;;  %v7827_v1 = vpop.f32.mrf.mxu0  ;;  %4189 = vmatpush.bf16.msra.mxu3 %v6050_v10  ;;  %4425 = vmatpush.bf16.msra.mxu0 %v6056_v32  ;;  %v6047_v10 = vld [vmem:[%s8573_s2 + $0x180] sm:$0xff] }
 0x3cf   : > { %v3345_v6 = vadd.f32 %v3277_v37, %v3076_v34  ;;  %v6049_v34 = vld [vmem:[%s8573_s2 + $0x190] sm:$0xff]  ;;  %v6067_v37 = vld [vmem:[%s8573_s2 + $0x220] sm:$0xff] }
 0x3d0   : > { %4656 = vmatpush.bf16.msra.mxu1 %v6067_v37  ;;  %v3616_v37 = vld [vmem:[#allocation3 + $0xb1] sm:$0xff] }
 0x3d1   : > { %v7820_v44 = vpop.f32.mrf.mxu1  ;;  %v7823_v58 = vadd.f32 %v7757_v24, %v3345_v6  ;;  %v7831_v45 = vpop.f32.mrf.mxu2  ;;  %v3400_v24 = vld [vmem:[#allocation3 + $0x188] sm:$0xff]  ;;  %v6040_v6 = vld [vmem:[%s8573_s2 + $0x148] sm:$0xff] }
 0x3d2   : > { %4190 = vmatpush.bf16.msra.mxu3 %v6049_v34  ;;  %3956 = vmatpush.bf16.msra.mxu2 %v6040_v6  ;;  %v3086_v34 = vadd.f32 %v7812_v29, %v7653_v30  ;;  %v3088_v30 = vadd.f32 %v7831_v45, %v7670_v7 }
 0x3d3   : > { %4426 = vmatpush.bf16.msra.mxu0 %v6055_v26 }
 0x3d4   : > { %3744 = vmatmul.bf16.gmra.mxu1 %v7825_v13 }
 0x3d6   : > { %v3279_v55 = vpop.f32.mrf.mxu3  ;;  %3129 = vmatmul.bf16.gmra.mxu2 %v3415_v2  ;;  %v3614_v2 = vld [vmem:[#allocation3 + $0x99] sm:$0xff]  ;;  %4191 = vmatpush.bf16.msra.mxu3 %v6048_v36 }
 0x3d7   : > { %v3346_v49 = vadd.f32 %v3279_v55, %v3078_v39  ;;  %v7878_v39 = vpack.c.bf16 %v3614_v2, %v3613_v54  ;;  %3957 = vmatpush.bf16.msra.mxu2 %v6039_v17  ;;  %v3615_v54 = vld [vmem:[#allocation3 + $0xa9] sm:$0xff] }
 0x3d8   : > { %v7841_v51 = vpop.f32.mrf.mxu0  ;;  %v7912_v36 = vpack.c.bf16 %v3616_v37, %v3615_v54  ;;  %v4073_v54 = vld [vmem:[#allocation3 + $0x38] sm:$0xff] }
 0x3d9   : > { %v7836_v57 = vpop.f32.mrf.mxu1  ;;  %v7839_v48 = vadd.f32 %v7773_v46, %v3346_v49  ;;  %v3416_v46 = vpack.c.bf16 %v3400_v24, %v3399_v14  ;;  %v7853_v3 = vpop.f32.mrf.mxu2  ;;  %v3163_v49 = vld [vmem:[#allocation3 + $0x152] sm:$0xff]  ;;  %v3164_v24 = vld [vmem:[#allocation3 + $0x15a] sm:$0xff] }
 0x3da   : > { %v3181_v15 = vpack.c.bf16 %v3164_v24, %v3163_v49  ;;  %4192 = vmatpush.bf16.msra.mxu3 %v6047_v10  ;;  %v3840_v24 = vld [vmem:[#allocation3 + $0x3a] sm:$0xff]  ;;  %v3091_v7 = vadd.f32 %v7853_v3, %v7690_v9 }
 0x3db   : > { %3321 = vmatmul.bf16.gmra.mxu3 %v3180_v28  ;;  %3565 = vmatmul.bf16.gmra.mxu0 %v3416_v46 }
 0x3de   : > { %v3282_v53 = vpop.f32.mrf.mxu3 }
 0x3df   : > { %v3347_v33 = vadd.f32 %v3282_v53, %v3081_v31 }
 0x3e0   : > { %v7880_v55 = vpop.f32.mrf.mxu0 }
 0x3e1   : > { %v7870_v52 = vpop.f32.mrf.mxu1  ;;  %v7876_v19 = vadd.f32 %v7782_v50, %v3347_v33  ;;  %v3838_v50 = vld [vmem:[#allocation3 + $0x22] sm:$0xff]  ;;  %v3092_v14 = vpop.f32.mrf.mxu2 }
 0x3e2   : > { %v3869_v46 = vpack.c.bf16 %v3838_v50, %v3837_v4  ;;  %v3166_v4 = vld [vmem:[#allocation3 + $0x172] sm:$0xff] }
 0x3e4   : > { %3749 = vmatmul.bf16.gmra.mxu1 %v7878_v39 }
 0x3e6   : > { %v3284_v28 = vpop.f32.mrf.mxu3  ;;  %3958 = vmatmul.bf16.vlgmr.msra.gmra.mxu2 %v3869_v46  ;;  %v3618_v46 = vld [vmem:[#allocation3 + $0xc9] sm:$0xff] }
 0x3e7   : > { %v3348_v35 = vadd.f32 %v3284_v28, %v3083_v5  ;;  %v3165_v5 = vld [vmem:[#allocation3 + $0x16a] sm:$0xff] }
 0x3e8   : > { %v7902_v56 = vpop.f32.mrf.mxu0  ;;  %v3182_v28 = vpack.c.bf16 %v3166_v4, %v3165_v5  ;;  %v4072_v4 = vld [vmem:[#allocation3 + $0x30] sm:$0xff] }
 0x3e9   : > { %v7897_v31 = vpop.f32.mrf.mxu1  ;;  %v7900_v53 = vadd.f32 %v7798_v61, %v3348_v35  ;;  %v3095_v33 = vpop.f32.mrf.mxu2 }
 0x3eb   : > { %3326 = vmatmul.bf16.gmra.mxu3 %v3181_v15  ;;  %4427 = vmatmul.bf16.vlgmr.msra.gmra.mxu0 %v7745_v43  ;;  %v3839_v43 = vld [vmem:[#allocation3 + $0x32] sm:$0xff] }
 0x3ee   : > { %v3287_v40 = vpop.f32.mrf.mxu3 }
 0x3ef   : > { %v3349_v2 = vadd.f32 %v3287_v40, %v3086_v34  ;;  %v6066_v34 = vld [vmem:[%s8573_s2 + $0x218] sm:$0xff] }
 0x3f0   : > { %v7914_v32 = vpop.f32.mrf.mxu0  ;;  %v3617_v40 = vld [vmem:[#allocation3 + $0xc1] sm:$0xff]  ;;  %4657 = vmatpush.bf16.msra.mxu1 %v6066_v34 }
 0x3f1   : > { %v7907_v6 = vpop.f32.mrf.mxu1  ;;  %v7910_v61 = vadd.f32 %v7809_v42, %v3349_v2  ;;  %v3097_v49 = vpop.f32.mrf.mxu2  ;;  %v7921_v42 = vpack.c.bf16 %v3840_v24, %v3839_v43  ;;  %v7940_v9 = vpack.c.bf16 %v3618_v46, %v3617_v40  ;;  %v3841_v43 = vld [vmem:[#allocation3 + $0x4a] sm:$0xff]  ;;  %v4104_v24 = vpack.c.bf16 %v4073_v54, %v4072_v4  ;;  %v3620_v46 = vld [vmem:[#allocation3 + $0xe1] sm:$0xff]  ;;  %v3619_v40 = vld [vmem:[#allocation3 + $0xd9] sm:$0xff] }
 0x3f2   : > { %v4075_v54 = vld [vmem:[#allocation3 + $0x50] sm:$0xff] }
 0x3f4   : > { %3754 = vmatmul.bf16.gmra.mxu1 %v7912_v36 }
 0x3f6   : > { %v3289_v29 = vpop.f32.mrf.mxu3  ;;  %3963 = vmatmul.bf16.gmra.mxu2 %v7921_v42 }
 0x3f7   : > { %v3350_v50 = vadd.f32 %v3289_v29, %v3088_v30  ;;  %v3842_v29 = vld [vmem:[#allocation3 + $0x52] sm:$0xff] }
 0x3f8   : > { %v7926_v26 = vpop.f32.mrf.mxu0 }
 0x3f9   : > { %v7919_v17 = vpop.f32.mrf.mxu1  ;;  %v7924_v10 = vadd.f32 %v7827_v1, %v3350_v50  ;;  %v3100_v35 = vpop.f32.mrf.mxu2 }
 0x3fb   : > { %3331 = vmatmul.bf16.gmra.mxu3 %v3182_v28  ;;  %4432 = vmatmul.bf16.gmra.mxu0 %v7771_v22  ;;  %v3093_v22 = vadd.f32 %v3092_v14, %v7701_v12  ;;  %v3096_v12 = vadd.f32 %v3095_v33, %v7716_v60  ;;  %v3098_v60 = vadd.f32 %v3097_v49, %v7725_v38 }
 0x3fc   : > { %v3101_v49 = vadd.f32 %v3100_v35, %v7740_v16 }
 0x3fe   : > { %v3292_v45 = vpop.f32.mrf.mxu3 }
 0x3ff   : > { %v3351_v15 = vadd.f32 %v3292_v45, %v3091_v7 }
 0x400   : > { %v7942_v3 = vpop.f32.mrf.mxu0 }
 0x401   : > { %v7935_v1 = vpop.f32.mrf.mxu1  ;;  %v7938_v2 = vadd.f32 %v7841_v51, %v3351_v15  ;;  %v3102_v30 = vpop.f32.mrf.mxu2  ;;  %v7948_v51 = vpack.c.bf16 %v3842_v29, %v3841_v43  ;;  %v3843_v29 = vld [vmem:[#allocation3 + $0x62] sm:$0xff] }
 0x404   : > { %3759 = vmatmul.bf16.gmra.mxu1 %v7940_v9 }
 0x406   : > { %v3294_v37 = vpop.f32.mrf.mxu3  ;;  %3968 = vmatmul.bf16.gmra.mxu2 %v7948_v51 }
 0x407   : > { %v3352_v5 = vadd.f32 %v3294_v37, %v3093_v22  ;;  %v7964_v37 = vpack.c.bf16 %v3620_v46, %v3619_v40 }
 0x408   : > { %v7953_v7 = vpop.f32.mrf.mxu0 }
 0x409   : > { %v7946_v50 = vpop.f32.mrf.mxu1  ;;  %v7951_v28 = vadd.f32 %v7880_v55, %v3352_v5  ;;  %v3105_v45 = vpop.f32.mrf.mxu2  ;;  %v3844_v5 = vld [vmem:[#allocation3 + $0x6a] sm:$0xff] }
 0x40b   : > { %4193 = vmatmul.bf16.vlgmr.msra.gmra.mxu3 %v4104_v24  ;;  %4437 = vmatmul.bf16.gmra.mxu0 %v7796_v23  ;;  %v4074_v24 = vld [vmem:[#allocation3 + $0x48] sm:$0xff] }
 0x40e   : > { %v3297_v14 = vpop.f32.mrf.mxu3 }
 0x40f   : > { %v3353_v15 = vadd.f32 %v3297_v14, %v3096_v12  ;;  %v7970_v14 = vpack.c.bf16 %v3844_v5, %v3843_v29  ;;  %v4077_v5 = vld [vmem:[#allocation3 + $0x68] sm:$0xff] }
 0x410   : > { %v7967_v33 = vpop.f32.mrf.mxu0 }
 0x411   : > { %v3725_v34 = vpop.f32.mrf.mxu1  ;;  %v7959_v22 = vadd.f32 %v7902_v56, %v3353_v15  ;;  %v3107_v43 = vpop.f32.mrf.mxu2  ;;  %v4105_v56 = vpack.c.bf16 %v4075_v54, %v4074_v24  ;;  %v3845_v24 = vld [vmem:[#allocation3 + $0x7a] sm:$0xff] }
 0x412   : > { %v7962_v55 = vadd.f32 %v3725_v34, %v7719_v25 }
 0x414   : > { %3764 = vmatmul.bf16.gmra.mxu1 %v7964_v37 }
 0x416   : > { %v3299_v23 = vpop.f32.mrf.mxu3  ;;  %3973 = vmatmul.bf16.gmra.mxu2 %v7970_v14 }
 0x417   : > { %v3354_v4 = vadd.f32 %v3299_v23, %v3098_v60  ;;  %v3622_v60 = vld [vmem:[#allocation3 + $0xf9] sm:$0xff] }
 0x418   : > { %v7980_v15 = vpop.f32.mrf.mxu0 }
 0x419   : > { %v3727_v12 = vpop.f32.mrf.mxu1  ;;  %v7973_v25 = vadd.f32 %v7914_v32, %v3354_v4  ;;  %v3110_v34 = vpop.f32.mrf.mxu2  ;;  %v6065_v32 = vld [vmem:[%s8573_s2 + $0x210] sm:$0xff] }
 0x41a   : > { %v7976_v38 = vadd.f32 %v3727_v12, %v7728_v20  ;;  %v3621_v20 = vld [vmem:[#allocation3 + $0xf1] sm:$0xff]  ;;  %4658 = vmatpush.bf16.msra.mxu1 %v6065_v32 }
 0x41b   : > { %4198 = vmatmul.bf16.gmra.mxu3 %v4105_v56  ;;  %4442 = vmatmul.bf16.gmra.mxu0 %v7825_v13  ;;  %v7992_v35 = vpack.c.bf16 %v3622_v60, %v3621_v20  ;;  %v3103_v13 = vadd.f32 %v3102_v30, %v7752_v63  ;;  %v3846_v56 = vld [vmem:[#allocation3 + $0x82] sm:$0xff]  ;;  %v3106_v30 = vadd.f32 %v3105_v45, %v7766_v27 }
 0x41c   : > { %v7998_v32 = vpack.c.bf16 %v3846_v56, %v3845_v24  ;;  %v3108_v27 = vadd.f32 %v3107_v43, %v7777_v18  ;;  %v4079_v45 = vld [vmem:[#allocation3 + $0x80] sm:$0xff]  ;;  %v3111_v18 = vadd.f32 %v3110_v34, %v7791_v11 }
 0x41e   : > { %v3302_v46 = vpop.f32.mrf.mxu3  ;;  %8594 = vst [vmem:[#allocation7_spill] sm:$0xff] %v7998_v32 }
 0x41f   : > { %v3355_v40 = vadd.f32 %v3302_v46, %v3101_v49  ;;  %v4076_v46 = vld [vmem:[#allocation3 + $0x60] sm:$0xff] }
 0x420   : > { %v7996_v49 = vpop.f32.mrf.mxu0 }
 0x421   : > { %v3730_v23 = vpop.f32.mrf.mxu1  ;;  %v7987_v54 = vadd.f32 %v7926_v26, %v3355_v40  ;;  %v3112_v4 = vpop.f32.mrf.mxu2  ;;  %v4106_v26 = vpack.c.bf16 %v4077_v5, %v4076_v46  ;;  %v3623_v5 = vld [vmem:[#allocation3 + $0x109] sm:$0xff]  ;;  %v3847_v46 = vld [vmem:[#allocation3 + $0x92] sm:$0xff] }
 0x422   : > { %v7990_v16 = vadd.f32 %v3730_v23, %v7743_v47 }
 0x424   : > { %3769 = vmatmul.bf16.gmra.mxu1 %v7992_v35 }
 0x426   : > { %v3304_v29 = vpop.f32.mrf.mxu3  ;;  %3978 = vmatmul.bf16.gmra.mxu2 %v7998_v32 }
 0x427   : > { %v3356_v12 = vadd.f32 %v3304_v29, %v3103_v13  ;;  %v3624_v13 = vld [vmem:[#allocation3 + $0x111] sm:$0xff] }
 0x428   : > { %v3551_v24 = vpop.f32.mrf.mxu0  ;;  %v8015_v56 = vpack.c.bf16 %v3624_v13, %v3623_v5 }
 0x429   : > { %v3732_v40 = vpop.f32.mrf.mxu1  ;;  %v8001_v47 = vadd.f32 %v7942_v3, %v3356_v12  ;;  %v3115_v23 = vpop.f32.mrf.mxu2 }
 0x42a   : > { %v8004_v63 = vadd.f32 %v3732_v40, %v7755_v21 }
 0x42b   : > { %4203 = vmatmul.bf16.gmra.mxu3 %v4106_v26  ;;  %4447 = vmatmul.bf16.gmra.mxu0 %v7878_v39  ;;  %v3848_v26 = vld [vmem:[#allocation3 + $0x9a] sm:$0xff] }
 0x42e   : > { %v3307_v60 = vpop.f32.mrf.mxu3 }
 0x42f   : > { %v3357_v20 = vadd.f32 %v3307_v60, %v3106_v30  ;;  %v4078_v30 = vld [vmem:[#allocation3 + $0x78] sm:$0xff] }
 0x430   : > { %v4107_v60 = vpack.c.bf16 %v4079_v45, %v4078_v30  ;;  %v3553_v43 = vpop.f32.mrf.mxu0  ;;  %v3625_v45 = vld [vmem:[#allocation3 + $0x121] sm:$0xff]  ;;  %v3849_v30 = vld [vmem:[#allocation3 + $0xaa] sm:$0xff] }
 0x431   : > { %v3735_v29 = vpop.f32.mrf.mxu1  ;;  %v8010_v3 = vadd.f32 %v7953_v7, %v3357_v20  ;;  %v3117_v12 = vpop.f32.mrf.mxu2  ;;  %v8019_v7 = vpack.c.bf16 %v3848_v26, %v3847_v46  ;;  %v4081_v26 = vld [vmem:[#allocation3 + $0x98] sm:$0xff] }
 0x432   : > { %v8013_v21 = vadd.f32 %v3735_v29, %v7769_v59 }
 0x434   : > { %3774 = vmatmul.bf16.gmra.mxu1 %v8015_v56 }
 0x436   : > { %v3309_v39 = vpop.f32.mrf.mxu3  ;;  %3983 = vmatmul.bf16.gmra.mxu2 %v8019_v7 }
 0x437   : > { %v3358_v40 = vadd.f32 %v3309_v39, %v3108_v27  ;;  %v3626_v27 = vld [vmem:[#allocation3 + $0x129] sm:$0xff] }
 0x438   : > { %v8039_v34 = vpack.c.bf16 %v3626_v27, %v3625_v45 }
 0x439   : > { %v3737_v32 = vpop.f32.mrf.mxu1  ;;  %v8022_v59 = vadd.f32 %v7967_v33, %v3358_v40  ;;  %v3120_v29 = vpop.f32.mrf.mxu2  ;;  %v6064_v33 = vld [vmem:[%s8573_s2 + $0x208] sm:$0xff] }
 0x43a   : > { %v8025_v20 = vadd.f32 %v3737_v32, %v7780_v41  ;;  %4659 = vmatpush.bf16.msra.mxu1 %v6064_v33  ;;  %v3556_v32 = vpop.f32.mrf.mxu0 }
 0x43b   : > { %4208 = vmatmul.bf16.gmra.mxu3 %v4107_v60  ;;  %4452 = vmatmul.bf16.gmra.mxu0 %v7912_v36  ;;  %v3113_v36 = vadd.f32 %v3112_v4, %v7804_v8  ;;  %v3850_v60 = vld [vmem:[#allocation3 + $0xb2] sm:$0xff]  ;;  %v3116_v8 = vadd.f32 %v3115_v23, %v7820_v44  ;;  %v3118_v44 = vadd.f32 %v3117_v12, %v7836_v57 }
 0x43c   : > { %v3121_v57 = vadd.f32 %v3120_v29, %v7870_v52 }
 0x43e   : > { %v3312_v13 = vpop.f32.mrf.mxu3 }
 0x43f   : > { %v3359_v5 = vadd.f32 %v3312_v13, %v3111_v18  ;;  %v4080_v13 = vld [vmem:[#allocation3 + $0x90] sm:$0xff] }
 0x440   : > { %v4108_v33 = vpack.c.bf16 %v4081_v26, %v4080_v13  ;;  %v3851_v13 = vld [vmem:[#allocation3 + $0xc2] sm:$0xff] }
 0x441   : > { %v3740_v39 = vpop.f32.mrf.mxu1  ;;  %v8034_v41 = vadd.f32 %v7980_v15, %v3359_v5  ;;  %v3122_v40 = vpop.f32.mrf.mxu2  ;;  %v8043_v5 = vpack.c.bf16 %v3850_v60, %v3849_v30  ;;  %v3627_v30 = vld [vmem:[#allocation3 + $0x139] sm:$0xff] }
 0x442   : > { %v8037_v11 = vadd.f32 %v3740_v39, %v7794_v62 }
 0x443   : > { %8595 = vst [vmem:[#allocation8_spill] sm:$0xff] %v8043_v5 }
 0x444   : > { %3779 = vmatmul.bf16.gmra.mxu1 %v8039_v34 }
 0x446   : > { %v3314_v46 = vpop.f32.mrf.mxu3  ;;  %3988 = vmatmul.bf16.gmra.mxu2 %v8043_v5 }
 0x447   : > { %v3360_v18 = vadd.f32 %v3314_v46, %v3113_v36  ;;  %v3628_v36 = vld [vmem:[#allocation3 + $0x141] sm:$0xff]  ;;  %v3558_v46 = vpop.f32.mrf.mxu0 }
 0x449   : > { %v3742_v15 = vpop.f32.mrf.mxu1  ;;  %v8046_v62 = vadd.f32 %v7996_v49, %v3360_v18  ;;  %v3125_v39 = vpop.f32.mrf.mxu2 }
 0x44a   : > { %v8049_v27 = vadd.f32 %v3742_v15, %v7807_v0  ;;  %v8059_v0 = vpack.c.bf16 %v3628_v36, %v3627_v30 }
 0x44b   : > { %4213 = vmatmul.bf16.gmra.mxu3 %v4108_v33  ;;  %4457 = vmatmul.bf16.gmra.mxu0 %v7940_v9  ;;  %v4083_v9 = vld [vmem:[#allocation3 + $0xb0] sm:$0xff] }
 0x44c   : > { %v3852_v33 = vld [vmem:[#allocation3 + $0xca] sm:$0xff] }
 0x44e   : > { %v3317_v4 = vpop.f32.mrf.mxu3 }
 0x44f   : > { %v3361_v45 = vadd.f32 %v3317_v4, %v3116_v8  ;;  %v4082_v8 = vld [vmem:[#allocation3 + $0xa8] sm:$0xff] }
 0x450   : > { %v4109_v4 = vpack.c.bf16 %v4083_v9, %v4082_v8  ;;  %v3629_v9 = vld [vmem:[#allocation3 + $0x151] sm:$0xff]  ;;  %v3853_v8 = vld [vmem:[#allocation3 + $0xda] sm:$0xff] }
 0x451   : > { %v3745_v26 = vpop.f32.mrf.mxu1  ;;  %v8054_v60 = vadd.f32 %v3551_v24, %v3361_v45  ;;  %v3127_v18 = vpop.f32.mrf.mxu2  ;;  %v8063_v45 = vpack.c.bf16 %v3852_v33, %v3851_v13  ;;  %v4085_v33 = vld [vmem:[#allocation3 + $0xc8] sm:$0xff] }
 0x452   : > { %v8057_v49 = vadd.f32 %v3745_v26, %v7823_v58  ;;  %v3561_v24 = vpop.f32.mrf.mxu0 }
 0x454   : > { %3784 = vmatmul.bf16.gmra.mxu1 %v8059_v0 }
 0x456   : > { %v3319_v23 = vpop.f32.mrf.mxu3  ;;  %3993 = vmatmul.bf16.gmra.mxu2 %v8063_v45 }
 0x457   : > { %v3362_v15 = vadd.f32 %v3319_v23, %v3118_v44  ;;  %v3630_v44 = vld [vmem:[#allocation3 + $0x159] sm:$0xff]  ;;  %v6063_v23 = vld [vmem:[%s8573_s2 + $0x200] sm:$0xff] }
 0x458   : > { %4660 = vmatpush.bf16.msra.mxu1 %v6063_v23  ;;  %v8081_v52 = vpack.c.bf16 %v3630_v44, %v3629_v9 }
 0x459   : > { %v3747_v5 = vpop.f32.mrf.mxu1  ;;  %v8065_v58 = vadd.f32 %v3553_v43, %v3362_v15  ;;  %v3130_v26 = vpop.f32.mrf.mxu2 }
 0x45a   : > { %v8068_v36 = vadd.f32 %v3747_v5, %v7839_v48  ;;  %v3563_v29 = vpop.f32.mrf.mxu0 }
 0x45b   : > { %4218 = vmatmul.bf16.gmra.mxu3 %v4109_v4  ;;  %4462 = vmatmul.bf16.gmra.mxu0 %v7964_v37  ;;  %v3123_v37 = vadd.f32 %v3122_v40, %v7897_v31  ;;  %v3854_v4 = vld [vmem:[#allocation3 + $0xe2] sm:$0xff]  ;;  %v3126_v31 = vadd.f32 %v3125_v39, %v7907_v6  ;;  %v3128_v6 = vadd.f32 %v3127_v18, %v7919_v17 }
 0x45c   : > { %v4087_v39 = vld [vmem:[#allocation3 + $0xe0] sm:$0xff]  ;;  %v3131_v18 = vadd.f32 %v3130_v26, %v7935_v1  ;;  %v4089_v26 = vld [vmem:[#allocation3 + $0xf8] sm:$0xff] }
 0x45e   : > { %v3322_v12 = vpop.f32.mrf.mxu3 }
 0x45f   : > { %v3363_v30 = vadd.f32 %v3322_v12, %v3121_v57  ;;  %v4084_v12 = vld [vmem:[#allocation3 + $0xc0] sm:$0xff] }
 0x460   : > { %v4110_v23 = vpack.c.bf16 %v4085_v33, %v4084_v12 }
 0x461   : > { %v3750_v43 = vpop.f32.mrf.mxu1  ;;  %v8076_v48 = vadd.f32 %v3556_v32, %v3363_v30  ;;  %v3132_v15 = vpop.f32.mrf.mxu2  ;;  %v8085_v30 = vpack.c.bf16 %v3854_v4, %v3853_v8 }
 0x462   : > { %v8079_v5 = vadd.f32 %v3750_v43, %v7876_v19  ;;  %v3566_v40 = vpop.f32.mrf.mxu0  ;;  %v3133_v1 = vadd.f32 %v3132_v15, %v7946_v50 }
 0x464   : > { %3789 = vmatmul.bf16.gmra.mxu1 %v8081_v52 }
 0x466   : > { %v3324_v13 = vpop.f32.mrf.mxu3  ;;  %3998 = vmatmul.bf16.gmra.mxu2 %v8085_v30 }
 0x467   : > { %v3364_v57 = vadd.f32 %v3324_v13, %v3123_v37  ;;  %v3632_v13 = vld [vmem:[#allocation3 + $0x171] sm:$0xff] }
 0x469   : > { %v3752_v32 = vpop.f32.mrf.mxu1  ;;  %v8087_v19 = vadd.f32 %v3558_v46, %v3364_v57  ;;  %v3959_v9 = vpop.f32.mrf.mxu2  ;;  %v3631_v46 = vld [vmem:[#allocation3 + $0x169] sm:$0xff] }
 0x46a   : > { %v8090_v44 = vadd.f32 %v3752_v32, %v7900_v53  ;;  %v4039_v33 = vadd.f32 %v3959_v9, %v7962_v55  ;;  %v8101_v57 = vpack.c.bf16 %v3632_v13, %v3631_v46  ;;  %v3856_v32 = vld [vmem:[#allocation3 + $0xfa] sm:$0xff]  ;;  %v3568_v55 = vpop.f32.mrf.mxu0 }
 0x46b   : > { %4223 = vmatmul.bf16.gmra.mxu3 %v4110_v23  ;;  %4467 = vmatmul.bf16.gmra.mxu0 %v7992_v35  ;;  %v3855_v23 = vld [vmem:[#allocation3 + $0xf2] sm:$0xff] }
 0x46e   : > { %v3327_v43 = vpop.f32.mrf.mxu3 }
 0x46f   : > { %v3365_v37 = vadd.f32 %v3327_v43, %v3126_v31 }
 0x471   : > { %v3755_v8 = vpop.f32.mrf.mxu1  ;;  %v8096_v4 = vadd.f32 %v3561_v24, %v3365_v37  ;;  %v3961_v12 = vpop.f32.mrf.mxu2  ;;  %v4086_v24 = vld [vmem:[#allocation3 + $0xd8] sm:$0xff] }
 0x472   : > { %v8099_v53 = vadd.f32 %v3755_v8, %v7910_v61  ;;  %v4040_v43 = vadd.f32 %v3961_v12, %v7976_v38  ;;  %v4111_v9 = vpack.c.bf16 %v4087_v39, %v4086_v24  ;;  %v8106_v61 = vpack.c.bf16 %v3856_v32, %v3855_v23  ;;  %v4428_v39 = vpop.f32.mrf.mxu0  ;;  %v3857_v24 = vld [vmem:[#allocation3 + $0x10a] sm:$0xff] }
 0x474   : > { %3794 = vmatmul.bf16.gmra.mxu1 %v8101_v57 }
 0x476   : > { %v3329_v35 = vpop.f32.mrf.mxu3  ;;  %4003 = vmatmul.bf16.gmra.mxu2 %v8106_v61 }
 0x477   : > { %v3366_v31 = vadd.f32 %v3329_v35, %v3128_v6  ;;  %v3634_v6 = vld [vmem:[#allocation3 + $0x189] sm:$0xff] }
 0x479   : > { %v3757_v37 = vpop.f32.mrf.mxu1  ;;  %v8108_v13 = vadd.f32 %v3563_v29, %v3366_v31  ;;  %v3964_v46 = vpop.f32.mrf.mxu2  ;;  %v3633_v29 = vld [vmem:[#allocation3 + $0x181] sm:$0xff] }
 0x47a   : > { %v8111_v17 = vadd.f32 %v3757_v37, %v7924_v10  ;;  %v4041_v35 = vadd.f32 %v3964_v46, %v7990_v16  ;;  %v8122_v32 = vpack.c.bf16 %v3634_v6, %v3633_v29  ;;  %v4430_v50 = vpop.f32.mrf.mxu0 }
 0x47b   : > { %4228 = vmatmul.bf16.gmra.mxu3 %v4111_v9  ;;  %4472 = vmatmul.bf16.gmra.mxu0 %v8015_v56  ;;  %v3858_v9 = vld [vmem:[#allocation3 + $0x112] sm:$0xff] }
 0x47c   : > { %v8127_v46 = vpack.c.bf16 %v3858_v9, %v3857_v24  ;;  %v3859_v24 = vld [vmem:[#allocation3 + $0x122] sm:$0xff]  ;;  %v3860_v9 = vld [vmem:[#allocation3 + $0x12a] sm:$0xff] }
 0x47e   : > { %v3332_v8 = vpop.f32.mrf.mxu3 }
 0x47f   : > { %v3367_v38 = vadd.f32 %v3332_v8, %v3131_v18  ;;  %v4088_v18 = vld [vmem:[#allocation3 + $0xf0] sm:$0xff] }
 0x481   : > { %v3760_v12 = vpop.f32.mrf.mxu1  ;;  %v8117_v23 = vadd.f32 %v3566_v40, %v3367_v38  ;;  %v3966_v31 = vpop.f32.mrf.mxu2  ;;  %v4112_v40 = vpack.c.bf16 %v4089_v26, %v4088_v18  ;;  %v4091_v26 = vld [vmem:[#allocation3 + $0x110] sm:$0xff] }
 0x482   : > { %v8120_v10 = vadd.f32 %v3760_v12, %v7938_v2  ;;  %v4042_v37 = vadd.f32 %v3966_v31, %v8004_v63 }
 0x484   : > { %3799 = vmatmul.bf16.gmra.mxu1 %v8122_v32 }
 0x486   : > { %v3334_v56 = vpop.f32.mrf.mxu3  ;;  %4008 = vmatmul.bf16.gmra.mxu2 %v8127_v46 }
 0x487   : > { %v3368_v16 = vadd.f32 %v3334_v56, %v3133_v1 }
 0x489   : > { %v3762_v8 = vpop.f32.mrf.mxu1  ;;  %v8129_v2 = vadd.f32 %v3568_v55, %v3368_v16  ;;  %v3969_v6 = vpop.f32.mrf.mxu2 }
 0x48a   : > { %v8132_v38 = vadd.f32 %v3762_v8, %v7951_v28  ;;  %v4043_v63 = vadd.f32 %v3969_v6, %v8013_v21  ;;  %v4433_v28 = vpop.f32.mrf.mxu0 }
 0x48b   : > { %4233 = vmatmul.bf16.gmra.mxu3 %v4112_v40  ;;  %4477 = vmatmul.bf16.gmra.mxu0 %v8039_v34  ;;  %v8144_v40 = vpack.c.bf16 %v3860_v9, %v3859_v24 }
 0x48e   : > { %v4194_v15 = vpop.f32.mrf.mxu3 }
 0x48f   : > { %v4274_v12 = vadd.f32 %v4194_v15, %v4039_v33  ;;  %v4090_v33 = vld [vmem:[#allocation3 + $0x108] sm:$0xff] }
 0x490   : > { %v4113_v18 = vpack.c.bf16 %v4091_v26, %v4090_v33  ;;  %v3861_v26 = vld [vmem:[#allocation3 + $0x13a] sm:$0xff] }
 0x491   : > { %v3765_v29 = vpop.f32.mrf.mxu1  ;;  %v8137_v1 = vadd.f32 %v4428_v39, %v4274_v12  ;;  %v3971_v31 = vpop.f32.mrf.mxu2 }
 0x492   : > { %v8140_v55 = vadd.f32 %v3765_v29, %v7959_v22  ;;  %v4044_v16 = vadd.f32 %v3971_v31, %v8025_v20  ;;  %v4435_v15 = vpop.f32.mrf.mxu0  ;;  %v4093_v29 = vld [vmem:[#allocation3 + $0x128] sm:$0xff] }
 0x493   : > { %v3862_v31 = vld [vmem:[#allocation3 + $0x142] sm:$0xff] }
 0x494   : > { %4661 = vmatmul.bf16.vlgmr.msra.gmra.mxu1 %v7921_v42 }
 0x496   : > { %v4196_v56 = vpop.f32.mrf.mxu3  ;;  %4013 = vmatmul.bf16.gmra.mxu2 %v8144_v40 }
 0x497   : > { %v4275_v34 = vadd.f32 %v4196_v56, %v4040_v43 }
 0x499   : > { %v3767_v21 = vpop.f32.mrf.mxu1  ;;  %v8146_v39 = vadd.f32 %v4430_v50, %v4275_v34  ;;  %v3974_v8 = vpop.f32.mrf.mxu2  ;;  %v8161_v34 = vpack.c.bf16 %v3862_v31, %v3861_v26 }
 0x49a   : > { %v8149_v22 = vadd.f32 %v3767_v21, %v7973_v25  ;;  %v4045_v20 = vadd.f32 %v3974_v8, %v8037_v11  ;;  %v4438_v33 = vpop.f32.mrf.mxu0 }
 0x49b   : > { %4238 = vmatmul.bf16.gmra.mxu3 %v4113_v18  ;;  %4482 = vmatmul.bf16.gmra.mxu0 %v8059_v0 }
 0x49e   : > { %v4199_v42 = vpop.f32.mrf.mxu3 }
 0x49f   : > { %v4276_v43 = vadd.f32 %v4199_v42, %v4041_v35  ;;  %v4092_v35 = vld [vmem:[#allocation3 + $0x120] sm:$0xff] }
 0x4a0   : > { %v4114_v9 = vpack.c.bf16 %v4093_v29, %v4092_v35 }
 0x4a1   : > { %v3770_v6 = vpop.f32.mrf.mxu1  ;;  %v8154_v12 = vadd.f32 %v4433_v28, %v4276_v43  ;;  %v3976_v56 = vpop.f32.mrf.mxu2  ;;  %v4095_v43 = vld [vmem:[#allocation3 + $0x140] sm:$0xff] }
 0x4a2   : > { %v8157_v50 = vadd.f32 %v3770_v6, %v7987_v54  ;;  %v4046_v24 = vadd.f32 %v3976_v56, %v8049_v27  ;;  %v4440_v42 = vpop.f32.mrf.mxu0 }
 0x4a4   : > { %4666 = vmatmul.bf16.gmra.mxu1 %v7948_v51 }
 0x4a6   : > { %v4201_v25 = vpop.f32.mrf.mxu3  ;;  %4018 = vmatmul.bf16.gmra.mxu2 %v8161_v34 }
 0x4a7   : > { %v4277_v0 = vadd.f32 %v4201_v25, %v4042_v37  ;;  %v4094_v25 = vld [vmem:[#allocation3 + $0x138] sm:$0xff] }
 0x4a8   : > { %v4115_v29 = vpack.c.bf16 %v4095_v43, %v4094_v25  ;;  %v3868_v25 = vld [vmem:[#allocation3 + $0x18a] sm:$0xff] }
 0x4a9   : > { %v3772_v11 = vpop.f32.mrf.mxu1  ;;  %v8163_v28 = vadd.f32 %v4435_v15, %v4277_v0  ;;  %v3864_v15 = vld [vmem:[#allocation3 + $0x15a] sm:$0xff] }
 0x4aa   : > { %v8166_v54 = vadd.f32 %v3772_v11, %v8001_v47  ;;  %v3863_v47 = vld [vmem:[#allocation3 + $0x152] sm:$0xff] }
 0x4ab   : > { %4243 = vmatmul.bf16.gmra.mxu3 %v4114_v9  ;;  %4487 = vmatmul.bf16.gmra.mxu0 %v8081_v52  ;;  %v8176_v52 = vpack.c.bf16 %v3864_v15, %v3863_v47  ;;  %v8596_v9 = vld [vmem:[#allocation7_spill] sm:$0xff] }
 0x4ae   : > { %v4204_v51 = vpop.f32.mrf.mxu3 }
 0x4af   : > { %v4278_v37 = vadd.f32 %v4204_v51, %v4043_v63  ;;  %v3866_v51 = vld [vmem:[#allocation3 + $0x172] sm:$0xff] }
 0x4b1   : > { %v3775_v18 = vpop.f32.mrf.mxu1  ;;  %v8170_v27 = vadd.f32 %v4438_v33, %v4278_v37  ;;  %v4097_v33 = vld [vmem:[#allocation3 + $0x158] sm:$0xff] }
 0x4b2   : > { %v8173_v21 = vadd.f32 %v3775_v18, %v8010_v3 }
 0x4b4   : > { %4671 = vmatmul.bf16.gmra.mxu1 %v7970_v14  ;;  %v4443_v14 = vpop.f32.mrf.mxu0 }
 0x4b6   : > { %v4206_v8 = vpop.f32.mrf.mxu3  ;;  %4023 = vmatmul.bf16.gmra.mxu2 %v8176_v52 }
 0x4b7   : > { %v4279_v6 = vadd.f32 %v4206_v8, %v4044_v16 }
 0x4b9   : > { %v3777_v56 = vpop.f32.mrf.mxu1  ;;  %v8178_v63 = vadd.f32 %v4440_v42, %v4279_v6  ;;  %v4096_v42 = vld [vmem:[#allocation3 + $0x150] sm:$0xff]  ;;  %v3867_v6 = vld [vmem:[#allocation3 + $0x182] sm:$0xff] }
 0x4ba   : > { %v8181_v26 = vadd.f32 %v3777_v56, %v8022_v59  ;;  %v3865_v59 = vld [vmem:[#allocation3 + $0x16a] sm:$0xff]  ;;  %v4116_v8 = vpack.c.bf16 %v4097_v33, %v4096_v42  ;;  %v4100_v33 = vld [vmem:[#allocation3 + $0x180] sm:$0xff] }
 0x4bb   : > { %4248 = vmatmul.bf16.gmra.mxu3 %v4115_v29  ;;  %4492 = vmatmul.bf16.gmra.mxu0 %v8101_v57  ;;  %v8191_v43 = vpack.c.bf16 %v3866_v51, %v3865_v59  ;;  %v4098_v29 = vld [vmem:[#allocation3 + $0x168] sm:$0xff] }
 0x4bc   : > { %v4445_v18 = vpop.f32.mrf.mxu0 }
 0x4be   : > { %v4209_v3 = vpop.f32.mrf.mxu3 }
 0x4bf   : > { %v4280_v31 = vadd.f32 %v4209_v3, %v4045_v20  ;;  %v8204_v3 = vpack.c.bf16 %v3868_v25, %v3867_v6  ;;  %v8240_v25 = vld [vmem:[%s8576_s5 + $0x1] ss:$0 sm:$0xff] }
 0x4c1   : > { %v3780_v0 = vpop.f32.mrf.mxu1  ;;  %v8185_v16 = vadd.f32 %v4443_v14, %v4280_v31  ;;  %v4337_v31 = vld [vmem:[#allocation3 + $0x1a1] sm:$0xff] }
 0x4c2   : > { %v8188_v35 = vadd.f32 %v3780_v0, %v8034_v41 }
 0x4c4   : > { %4676 = vmatmul.bf16.gmra.mxu1 %v8596_v9  ;;  %v8597_v9 = vld [vmem:[#allocation8_spill] sm:$0xff] }
 0x4c6   : > { %v4211_v11 = vpop.f32.mrf.mxu3  ;;  %4028 = vmatmul.bf16.gmra.mxu2 %v8191_v43 }
 0x4c7   : > { %v4281_v37 = vadd.f32 %v4211_v11, %v4046_v24  ;;  %v4099_v24 = vld [vmem:[#allocation3 + $0x170] sm:$0xff]  ;;  %v4101_v11 = vld [vmem:[#allocation3 + $0x188] sm:$0xff] }
 0x4c8   : > { %v4117_v56 = vpack.c.bf16 %v4099_v24, %v4098_v29  ;;  %v4118_v59 = vpack.c.bf16 %v4101_v11, %v4100_v33  ;;  %v8251_v29 = vpop.f32.mrf.mxu2  ;;  %v8265_v11 = vpop.f32.mrf.mxu0  ;;  %v6146_v33 = vld [vmem:[%s6447_s15 + $0x8] sm:$0xff] }
 0x4c9   : > { %v3782_v57 = vpop.f32.mrf.mxu1  ;;  %v8193_v20 = vadd.f32 %v4445_v18, %v4281_v37 }
 0x4ca   : > { %v8196_v47 = vadd.f32 %v3782_v57, %v8046_v62 }
 0x4cb   : > { %4253 = vmatmul.bf16.gmra.mxu3 %v4116_v8  ;;  %4497 = vmatmul.bf16.gmra.mxu0 %v8122_v32  ;;  %v4336_v32 = vld [vmem:[#allocation3 + $0x199] sm:$0xff] }
 0x4d1   : > { %v3785_v41 = vpop.f32.mrf.mxu1 }
 0x4d2   : > { %v8201_v15 = vadd.f32 %v3785_v41, %v8054_v60  ;;  %v4353_v60 = vpack.c.bf16 %v4337_v31, %v4336_v32 }
 0x4d4   : > { %4681 = vmatmul.bf16.gmra.mxu1 %v8019_v7 }
 0x4d6   : > { %4033 = vmatmul.bf16.gmra.mxu2 %v8204_v3 }
 0x4d9   : > { %v3787_v14 = vpop.f32.mrf.mxu1 }
 0x4da   : > { %v8207_v62 = vadd.f32 %v3787_v14, %v8065_v58 }
 0x4db   : > { %4258 = vmatmul.bf16.gmra.mxu3 %v4117_v56  ;;  %4502 = vmatmul.bf16.gmra.mxu0 %v4353_v60 }
 0x4e1   : > { %v3790_v0 = vpop.f32.mrf.mxu1 }
 0x4e2   : > { %v8211_v7 = vadd.f32 %v3790_v0, %v8076_v48  ;;  %v6144_v48 = vld [vmem:[#allocation2] sm:$0xff]  ;;  %v8259_v0 = vpop.f32.mrf.mxu3 }
 0x4e3   : > { %v4119_v42 = vpack.c.bf16 %v6144_v48, %v6144_v48 }
 0x4e4   : > { %4686 = vmatmul.bf16.gmra.mxu1 %v8597_v9 }
 0x4e9   : > { %v3792_v51 = vpop.f32.mrf.mxu1 }
 0x4ea   : > { %v8215_v58 = vadd.f32 %v3792_v51, %v8087_v19  ;;  %v8268_v51 = vpop.f32.mrf.mxu2 }
 0x4eb   : > { %4263 = vmatmul.bf16.gmra.mxu3 %v4118_v59 }
 0x4f1   : > { %v3795_v37 = vpop.f32.mrf.mxu1 }
 0x4f2   : > { %v8218_v18 = vadd.f32 %v3795_v37, %v8096_v4 }
 0x4f4   : > { %4691 = vmatmul.bf16.gmra.mxu1 %v8063_v45  ;;  %v8234_v45 = vld [vmem:[%s8576_s5] ss:$0 sm:$0xff] }
 0x4f9   : > { %v3797_v8 = vpop.f32.mrf.mxu1 }
 0x4fa   : > { %v8222_v57 = vadd.f32 %v3797_v8, %v8108_v13 }
 0x4fb   : > { %4268 = vmatmul.bf16.gmra.mxu3 %v4119_v42 }
 0x501   : > { %v3800_v41 = vpop.f32.mrf.mxu1 }
 0x502   : > { %v8225_v19 = vadd.f32 %v3800_v41, %v8117_v23 }
 0x504   : > { %4696 = vmatmul.bf16.gmra.mxu1 %v8085_v30 }
 0x509   : > { %v3802_v4 = vpop.f32.mrf.mxu1 }
 0x50a   : > { %v8229_v24 = vadd.f32 %v3802_v4, %v8129_v2  ;;  %v8249_v2 = vld [vmem:[%s8576_s5 + $0x2] ss:$0 sm:$0xff]  ;;  %v8276_v4 = vpop.f32.mrf.mxu3 }
 0x511   : > { %v4662_v13 = vpop.f32.mrf.mxu1 }
 0x512   : > { %v4742_v6 = vadd.f32 %v4662_v13, %v8137_v1  ;;  %v6145_v1 = vld [vmem:[%s6447_s15] sm:$0xff]  ;;  %v6147_v13 = vld [vmem:[%s6447_s15 + $0x10] sm:$0xff] }
 0x514   : > { %v4778_v30 = vmul.f32 %v8234_v45, %v4742_v6  ;;  %4701 = vmatmul.bf16.gmra.mxu1 %v8106_v61 }
 0x516   : > { %v4811_v23 = vadd.f32 %v8240_v25, %v4778_v30 }
 0x518   : > { %v4843_v56 = vadd.f32 %v6145_v1, %v4811_v23  ;;  %v8279_v23 = vpop.f32.mrf.mxu0 }
 0x519   : > { %v4664_v14 = vpop.f32.mrf.mxu1 }
 0x51a   : > { %vm4875_vm0 = vcmp.gt.f32.partialorder %v4843_v56, 0.0  ;;  %v4908_v32 = vmul.f32 %v8249_v2, %v4843_v56  ;;  %v4743_v61 = vadd.f32 %v4664_v14, %v8146_v39 }
 0x51c   : > { %v4940_v31 = vsel %vm4875_vm0, %v4843_v56, %v4908_v32  ;;  %v4779_v60 = vmul.f32 %v8234_v45, %v4743_v61  ;;  %v8283_v56 = vpop.f32.mrf.mxu2  ;;  %v6148_v61 = vld [vmem:[%s6447_s15 + $0x18] sm:$0xff] }
 0x51d   : > { %4972 = vst [vmem:[%s8261_s20] sm:$0xff] %v4940_v31 }
 0x51e   : > { %v4812_v9 = vadd.f32 %v8240_v25, %v4779_v60  ;;  %v8289_v60 = vpop.f32.mrf.mxu3 }
 0x520   : > { %v4844_v59 = vadd.f32 %v6146_v33, %v4812_v9 }
 0x521   : > { %v4667_v39 = vpop.f32.mrf.mxu1 }
 0x522   : > { %vm4876_vm1 = vcmp.gt.f32.partialorder %v4844_v59, 0.0  ;;  %v4909_v37 = vmul.f32 %v8249_v2, %v4844_v59  ;;  %v4744_v48 = vadd.f32 %v4667_v39, %v8154_v12 }
 0x524   : > { %v4941_v42 = vsel %vm4876_vm1, %v4844_v59, %v4909_v37  ;;  %v4780_v8 = vmul.f32 %v8234_v45, %v4744_v48  ;;  %4706 = vmatmul.bf16.gmra.mxu1 %v8127_v46  ;;  %v8293_v59 = vpop.f32.mrf.mxu0  ;;  %v8297_v48 = vpop.f32.mrf.mxu2 }
 0x525   : > { %4973 = vst [vmem:[%s8261_s20 + $0x8] sm:$0xff] %v4941_v42 }
 0x526   : > { %v4813_v41 = vadd.f32 %v8240_v25, %v4780_v8  ;;  %v6149_v8 = vld [vmem:[%s6447_s15 + $0x20] sm:$0xff] }
 0x528   : > { %v4845_v6 = vadd.f32 %v6147_v13, %v4813_v41 }
 0x529   : > { %v4669_v30 = vpop.f32.mrf.mxu1 }
 0x52a   : > { %vm4877_vm2 = vcmp.gt.f32.partialorder %v4845_v6, 0.0  ;;  %v4910_v12 = vmul.f32 %v8249_v2, %v4845_v6  ;;  %v4745_v1 = vadd.f32 %v4669_v30, %v8163_v28  ;;  %v8304_v30 = vpop.f32.mrf.mxu3 }
 0x52c   : > { %v4942_v14 = vsel %vm4877_vm2, %v4845_v6, %v4910_v12  ;;  %v4781_v46 = vmul.f32 %v8234_v45, %v4745_v1  ;;  %v8308_v1 = vpop.f32.mrf.mxu0 }
 0x52d   : > { %4974 = vst [vmem:[%s8261_s20 + $0x10] sm:$0xff] %v4942_v14 }
 0x52e   : > { %v4814_v32 = vadd.f32 %v8240_v25, %v4781_v46  ;;  %v8311_v46 = vpop.f32.mrf.mxu2 }
 0x530   : > { %v4846_v31 = vadd.f32 %v6148_v61, %v4814_v32  ;;  %v6150_v32 = vld [vmem:[%s6447_s15 + $0x28] sm:$0xff] }
 0x531   : > { %v4672_v9 = vpop.f32.mrf.mxu1 }
 0x532   : > { %vm4878_vm3 = vcmp.gt.f32.partialorder %v4846_v31, 0.0  ;;  %v4911_v33 = vmul.f32 %v8249_v2, %v4846_v31  ;;  %v4746_v28 = vadd.f32 %v4672_v9, %v8170_v27 }
 0x534   : > { %v4943_v39 = vsel %vm4878_vm3, %v4846_v31, %v4911_v33  ;;  %v4782_v37 = vmul.f32 %v8234_v45, %v4746_v28  ;;  %4711 = vmatmul.bf16.gmra.mxu1 %v8144_v40 }
 0x535   : > { %4975 = vst [vmem:[%s8261_s20 + $0x18] sm:$0xff] %v4943_v39  ;;  %v8318_v39 = vpop.f32.mrf.mxu3 }
 0x536   : > { %v4815_v42 = vadd.f32 %v8240_v25, %v4782_v37 }
 0x538   : > { %v4847_v41 = vadd.f32 %v6149_v8, %v4815_v42  ;;  %v4047_v42 = vadd.f32 %v8251_v29, %v8057_v49  ;;  %v8324_v8 = vpop.f32.mrf.mxu0 }
 0x539   : > { %v4674_v13 = vpop.f32.mrf.mxu1 }
 0x53a   : > { %vm4879_vm4 = vcmp.gt.f32.partialorder %v4847_v41, 0.0  ;;  %v4912_v27 = vmul.f32 %v8249_v2, %v4847_v41  ;;  %v4747_v6 = vadd.f32 %v4674_v13, %v8178_v63 }
 0x53c   : > { %v4944_v12 = vsel %vm4879_vm4, %v4847_v41, %v4912_v27  ;;  %v4783_v40 = vmul.f32 %v8234_v45, %v4747_v6  ;;  %v6151_v41 = vld [vmem:[%s6447_s15 + $0x30] sm:$0xff] }
 0x53d   : > { %4976 = vst [vmem:[%s8261_s20 + $0x20] sm:$0xff] %v4944_v12  ;;  %v4282_v12 = vadd.f32 %v8259_v0, %v4047_v42  ;;  %v8335_v29 = vpop.f32.mrf.mxu3 }
 0x53e   : > { %v4816_v14 = vadd.f32 %v8240_v25, %v4783_v40 }
 0x540   : > { %v4848_v61 = vadd.f32 %v6150_v32, %v4816_v14  ;;  %v4048_v32 = vadd.f32 %v8268_v51, %v8068_v36  ;;  %v6153_v51 = vld [vmem:[%s6447_s15 + $0x40] sm:$0xff] }
 0x541   : > { %v4677_v31 = vpop.f32.mrf.mxu1 }
 0x542   : > { %vm4880_vm5 = vcmp.gt.f32.partialorder %v4848_v61, 0.0  ;;  %v4913_v63 = vmul.f32 %v8249_v2, %v4848_v61  ;;  %v4748_v9 = vadd.f32 %v4677_v31, %v8185_v16  ;;  %v8327_v16 = vpop.f32.mrf.mxu2 }
 0x544   : > { %v4945_v33 = vsel %vm4880_vm5, %v4848_v61, %v4913_v63  ;;  %v4784_v28 = vmul.f32 %v8234_v45, %v4748_v9  ;;  %4716 = vmatmul.bf16.gmra.mxu1 %v8161_v34  ;;  %v6152_v61 = vld [vmem:[%s6447_s15 + $0x38] sm:$0xff]  ;;  %v4516_v63 = vadd.f32 %v8265_v11, %v4282_v12  ;;  %v8341_v9 = vpop.f32.mrf.mxu0  ;;  %v4049_v11 = vadd.f32 %v8283_v56, %v8079_v5 }
 0x545   : > { %4977 = vst [vmem:[%s8261_s20 + $0x28] sm:$0xff] %v4945_v33  ;;  %v4050_v56 = vadd.f32 %v8297_v48, %v8090_v44 }
 0x546   : > { %v4817_v37 = vadd.f32 %v8240_v25, %v4784_v28 }
 0x548   : > { %v4849_v13 = vadd.f32 %v6151_v41, %v4817_v37  ;;  %v4283_v37 = vadd.f32 %v8276_v4, %v4048_v32  ;;  %v6154_v32 = vld [vmem:[%s6447_s15 + $0x48] sm:$0xff] }
 0x549   : > { %v4679_v27 = vpop.f32.mrf.mxu1 }
 0x54a   : > { %vm4881_vm6 = vcmp.gt.f32.partialorder %v4849_v13, 0.0  ;;  %v4914_v34 = vmul.f32 %v8249_v2, %v4849_v13  ;;  %v4749_v6 = vadd.f32 %v4679_v27, %v8193_v20  ;;  %v8344_v28 = vpop.f32.mrf.mxu2  ;;  %v4517_v27 = vadd.f32 %v8279_v23, %v4283_v37 }
 0x54c   : > { %v4946_v40 = vsel %vm4881_vm6, %v4849_v13, %v4914_v34  ;;  %v4785_v14 = vmul.f32 %v8234_v45, %v4749_v6  ;;  %v8355_v34 = vpop.f32.mrf.mxu3 }
 0x54d   : > { %4978 = vst [vmem:[%s8261_s20 + $0x30] sm:$0xff] %v4946_v40  ;;  %v8359_v40 = vpop.f32.mrf.mxu0 }
 0x54e   : > { %v4818_v49 = vadd.f32 %v8240_v25, %v4785_v14 }
 0x550   : > { %v4850_v31 = vadd.f32 %v6152_v61, %v4818_v49 }
 0x551   : > { %v4682_v20 = vpop.f32.mrf.mxu1 }
 0x552   : > { %vm4882_vm7 = vcmp.gt.f32.partialorder %v4850_v31, 0.0  ;;  %v4915_v0 = vmul.f32 %v8249_v2, %v4850_v31  ;;  %v4750_v33 = vadd.f32 %v4682_v20, %v4516_v63  ;;  %v8362_v5 = vpop.f32.mrf.mxu2 }
 0x554   : > { %v4947_v42 = vsel %vm4882_vm7, %v4850_v31, %v4915_v0  ;;  %v4786_v41 = vmul.f32 %v8234_v45, %v4750_v33  ;;  %4721 = vmatmul.bf16.gmra.mxu1 %v8176_v52  ;;  %v4284_v52 = vadd.f32 %v8289_v60, %v4049_v11  ;;  %v8371_v0 = vpop.f32.mrf.mxu3  ;;  %v4285_v33 = vadd.f32 %v8304_v30, %v4050_v56 }
 0x555   : > { %4979 = vst [vmem:[%s8261_s20 + $0x38] sm:$0xff] %v4947_v42  ;;  %v8377_v44 = vpop.f32.mrf.mxu0 }
 0x556   : > { %v4819_v36 = vadd.f32 %v8240_v25, %v4786_v41  ;;  %v4518_v31 = vadd.f32 %v8293_v59, %v4284_v52  ;;  %v4051_v41 = vadd.f32 %v8311_v46, %v8099_v53  ;;  %v4519_v30 = vadd.f32 %v8308_v1, %v4285_v33  ;;  %v6156_v52 = vld [vmem:[%s6447_s15 + $0x58] sm:$0xff] }
 0x557   : > { %v4052_v46 = vadd.f32 %v8327_v16, %v8111_v17 }
 0x558   : > { %v4851_v13 = vadd.f32 %v6153_v51, %v4819_v36  ;;  %v6155_v36 = vld [vmem:[%s6447_s15 + $0x50] sm:$0xff] }
 0x559   : > { %v4684_v4 = vpop.f32.mrf.mxu1 }
 0x55a   : > { %vm4883_vm8 = vcmp.gt.f32.partialorder %v4851_v13, 0.0  ;;  %v4916_v6 = vmul.f32 %v8249_v2, %v4851_v13  ;;  %v4751_v12 = vadd.f32 %v4684_v4, %v4517_v27  ;;  %v8380_v48 = vpop.f32.mrf.mxu2  ;;  %v4286_v27 = vadd.f32 %v8318_v39, %v4051_v41 }
 0x55c   : > { %v4948_v14 = vsel %vm4883_vm8, %v4851_v13, %v4916_v6  ;;  %v4787_v49 = vmul.f32 %v8234_v45, %v4751_v12  ;;  %v8389_v12 = vpop.f32.mrf.mxu3 }
 0x55d   : > { %4980 = vst [vmem:[%s8261_s20 + $0x40] sm:$0xff] %v4948_v14  ;;  %v8395_v1 = vpop.f32.mrf.mxu0 }
 0x55e   : > { %v4820_v23 = vadd.f32 %v8240_v25, %v4787_v49  ;;  %v4520_v49 = vadd.f32 %v8324_v8, %v4286_v27  ;;  %v4053_v8 = vadd.f32 %v8344_v28, %v8120_v10  ;;  %v4570_v10 = vld [vmem:[#allocation3 + $0x19a] sm:$0xff]  ;;  %v4571_v28 = vld [vmem:[#allocation3 + $0x1a2] sm:$0xff] }
 0x55f   : > { %v4587_v27 = vpack.c.bf16 %v4571_v28, %v4570_v10 }
 0x560   : > { %v4852_v61 = vadd.f32 %v6154_v32, %v4820_v23  ;;  %v4288_v41 = vadd.f32 %v8355_v34, %v4053_v8 }
 0x561   : > { %v4687_v60 = vpop.f32.mrf.mxu1 }
 0x562   : > { %vm4884_vm9 = vcmp.gt.f32.partialorder %v4852_v61, 0.0  ;;  %v4917_v63 = vmul.f32 %v8249_v2, %v4852_v61  ;;  %v4752_v20 = vadd.f32 %v4687_v60, %v4518_v31  ;;  %v8399_v39 = vpop.f32.mrf.mxu2 }
 0x564   : > { %v4949_v37 = vsel %vm4884_vm9, %v4852_v61, %v4917_v63  ;;  %v4788_v42 = vmul.f32 %v8234_v45, %v4752_v20  ;;  %4726 = vmatmul.bf16.gmra.mxu1 %v8191_v43  ;;  %v4287_v61 = vadd.f32 %v8335_v29, %v4052_v46  ;;  %v4236_v16 = vpop.f32.mrf.mxu3  ;;  %v6157_v63 = vld [vmem:[%s6447_s15 + $0x60] sm:$0xff] }
 0x565   : > { %4981 = vst [vmem:[%s8261_s20 + $0x48] sm:$0xff] %v4949_v37  ;;  %v8411_v29 = vpop.f32.mrf.mxu0 }
 0x566   : > { %v4821_v59 = vadd.f32 %v8240_v25, %v4788_v42  ;;  %v4521_v33 = vadd.f32 %v8341_v9, %v4287_v61  ;;  %v4054_v9 = vadd.f32 %v8362_v5, %v8132_v38  ;;  %v4055_v5 = vadd.f32 %v8380_v48, %v8140_v55 }
 0x568   : > { %v4853_v11 = vadd.f32 %v6155_v36, %v4821_v59  ;;  %v4289_v46 = vadd.f32 %v8371_v0, %v4054_v9  ;;  %v6161_v9 = vld [vmem:[%s6447_s15 + $0x80] sm:$0xff] }
 0x569   : > { %v4689_v51 = vpop.f32.mrf.mxu1 }
 0x56a   : > { %vm4885_vm10 = vcmp.gt.f32.partialorder %v4853_v11, 0.0  ;;  %v4918_v43 = vmul.f32 %v8249_v2, %v4853_v11  ;;  %v4753_v13 = vadd.f32 %v4689_v51, %v4519_v30  ;;  %v4004_v59 = vpop.f32.mrf.mxu2  ;;  %v6158_v51 = vld [vmem:[%s6447_s15 + $0x68] sm:$0xff] }
 0x56c   : > { %v4950_v4 = vsel %vm4885_vm10, %v4853_v11, %v4918_v43  ;;  %v4789_v6 = vmul.f32 %v8234_v45, %v4753_v13  ;;  %v4522_v13 = vadd.f32 %v8359_v40, %v4288_v41 }
 0x56d   : > { %4982 = vst [vmem:[%s8261_s20 + $0x50] sm:$0xff] %v4950_v4  ;;  %v4239_v4 = vpop.f32.mrf.mxu3 }
 0x56e   : > { %v4822_v53 = vadd.f32 %v8240_v25, %v4789_v6 }
 0x570   : > { %v4854_v14 = vadd.f32 %v6156_v52, %v4822_v53  ;;  %v4473_v52 = vpop.f32.mrf.mxu0 }
 0x571   : > { %v4692_v23 = vpop.f32.mrf.mxu1 }
 0x572   : > { %vm4886_vm11 = vcmp.gt.f32.partialorder %v4854_v14, 0.0  ;;  %v4919_v56 = vmul.f32 %v8249_v2, %v4854_v14  ;;  %v4754_v32 = vadd.f32 %v4692_v23, %v4520_v49  ;;  %v4006_v38 = vpop.f32.mrf.mxu2  ;;  %v6159_v23 = vld [vmem:[%s6447_s15 + $0x70] sm:$0xff] }
 0x574   : > { %v4951_v31 = vsel %vm4886_vm11, %v4854_v14, %v4919_v56  ;;  %v4790_v60 = vmul.f32 %v8234_v45, %v4754_v32  ;;  %4731 = vmatmul.bf16.gmra.mxu1 %v8204_v3  ;;  %v4523_v32 = vadd.f32 %v8377_v44, %v4289_v46  ;;  %v4056_v44 = vadd.f32 %v8399_v39, %v8149_v22 }
 0x575   : > { %4983 = vst [vmem:[%s8261_s20 + $0x58] sm:$0xff] %v4951_v31  ;;  %v4057_v22 = vadd.f32 %v4004_v59, %v8157_v50  ;;  %v4058_v46 = vadd.f32 %v4006_v38, %v8166_v54  ;;  %v6163_v38 = vld [vmem:[%s6447_s15 + $0x90] sm:$0xff] }
 0x576   : > { %v4823_v17 = vadd.f32 %v8240_v25, %v4790_v60  ;;  %v4241_v60 = vpop.f32.mrf.mxu3 }
 0x578   : > { %v4855_v20 = vadd.f32 %v6157_v63, %v4823_v17  ;;  %v4290_v17 = vadd.f32 %v8389_v12, %v4055_v5 }
 0x579   : > { %v4694_v37 = vpop.f32.mrf.mxu1 }
 0x57a   : > { %vm4887_vm12 = vcmp.gt.f32.partialorder %v4855_v20, 0.0  ;;  %v4920_v42 = vmul.f32 %v8249_v2, %v4855_v20  ;;  %v4755_v3 = vadd.f32 %v4694_v37, %v4521_v33  ;;  %v4009_v48 = vpop.f32.mrf.mxu2  ;;  %v6160_v33 = vld [vmem:[%s6447_s15 + $0x78] sm:$0xff] }
 0x57b   : > { %v4059_v54 = vadd.f32 %v4009_v48, %v8173_v21 }
 0x57c   : > { %v4952_v36 = vsel %vm4887_vm12, %v4855_v20, %v4920_v42  ;;  %v4791_v11 = vmul.f32 %v8234_v45, %v4755_v3  ;;  %v4475_v20 = vpop.f32.mrf.mxu0  ;;  %v4524_v42 = vadd.f32 %v8395_v1, %v4290_v17 }
 0x57d   : > { %4984 = vst [vmem:[%s8261_s20 + $0x60] sm:$0xff] %v4952_v36  ;;  %v4291_v36 = vadd.f32 %v4236_v16, %v4056_v44 }
 0x57e   : > { %v4824_v30 = vadd.f32 %v8240_v25, %v4791_v11  ;;  %v4244_v28 = vpop.f32.mrf.mxu3 }
 0x580   : > { %v4856_v43 = vadd.f32 %v6158_v51, %v4824_v30  ;;  %v4525_v51 = vadd.f32 %v8411_v29, %v4291_v36 }
 0x581   : > { %v4697_v34 = vpop.f32.mrf.mxu1 }
 0x582   : > { %vm4888_vm13 = vcmp.gt.f32.partialorder %v4856_v43, 0.0  ;;  %v4921_v6 = vmul.f32 %v8249_v2, %v4856_v43  ;;  %v4756_v53 = vadd.f32 %v4697_v34, %v4522_v13  ;;  %v4292_v34 = vadd.f32 %v4239_v4, %v4057_v22 }
 0x584   : > { %v4953_v14 = vsel %vm4888_vm13, %v4856_v43, %v4921_v6  ;;  %v4792_v49 = vmul.f32 %v8234_v45, %v4756_v53  ;;  %4736 = vmatmul.bf16.gmra.mxu1 %v4587_v27  ;;  %v4478_v39 = vpop.f32.mrf.mxu0  ;;  %v4011_v43 = vpop.f32.mrf.mxu2 }
 0x585   : > { %4985 = vst [vmem:[%s8261_s20 + $0x68] sm:$0xff] %v4953_v14  ;;  %v6162_v14 = vld [vmem:[%s6447_s15 + $0x88] sm:$0xff]  ;;  %v4060_v48 = vadd.f32 %v4011_v43, %v8181_v26 }
 0x586   : > { %v4825_v40 = vadd.f32 %v8240_v25, %v4792_v49  ;;  %v4246_v59 = vpop.f32.mrf.mxu3  ;;  %v4526_v49 = vadd.f32 %v4473_v52, %v4292_v34 }
 0x588   : > { %v4857_v56 = vadd.f32 %v6159_v23, %v4825_v40 }
 0x589   : > { %v4699_v61 = vpop.f32.mrf.mxu1 }
 0x58a   : > { %vm4889_vm14 = vcmp.gt.f32.partialorder %v4857_v56, 0.0  ;;  %v4922_v0 = vmul.f32 %v8249_v2, %v4857_v56  ;;  %v4757_v31 = vadd.f32 %v4699_v61, %v4523_v32  ;;  %v4293_v32 = vadd.f32 %v4241_v60, %v4058_v46 }
 0x58b   : > { %v4294_v60 = vadd.f32 %v4244_v28, %v4059_v54 }
 0x58c   : > { %v4954_v8 = vsel %vm4889_vm14, %v4857_v56, %v4922_v0  ;;  %v4793_v63 = vmul.f32 %v8234_v45, %v4757_v31  ;;  %v4480_v5 = vpop.f32.mrf.mxu0  ;;  %v4014_v56 = vpop.f32.mrf.mxu2  ;;  %v4527_v17 = vadd.f32 %v4475_v20, %v4293_v32 }
 0x58d   : > { %4986 = vst [vmem:[%s8261_s20 + $0x70] sm:$0xff] %v4954_v8  ;;  %v4061_v43 = vadd.f32 %v4014_v56, %v8188_v35 }
 0x58e   : > { %v4826_v55 = vadd.f32 %v8240_v25, %v4793_v63  ;;  %v4249_v8 = vpop.f32.mrf.mxu3 }
 0x590   : > { %v4858_v37 = vadd.f32 %v6160_v33, %v4826_v55 }
 0x591   : > { %v4702_v3 = vpop.f32.mrf.mxu1 }
 0x592   : > { %vm4890_vm15 = vcmp.gt.f32.partialorder %v4858_v37, 0.0  ;;  %v4923_v12 = vmul.f32 %v8249_v2, %v4858_v37  ;;  %v4758_v41 = vadd.f32 %v4702_v3, %v4524_v42 }
 0x594   : > { %v4955_v11 = vsel %vm4890_vm15, %v4858_v37, %v4923_v12  ;;  %v4794_v10 = vmul.f32 %v8234_v45, %v4758_v41  ;;  %v4483_v33 = vpop.f32.mrf.mxu0  ;;  %v4016_v3 = vpop.f32.mrf.mxu2  ;;  %v6164_v12 = vld [vmem:[%s6447_s15 + $0x98] sm:$0xff]  ;;  %v4528_v41 = vadd.f32 %v4478_v39, %v4294_v60  ;;  %v6165_v39 = vld [vmem:[%s6447_s15 + $0xa0] sm:$0xff] }
 0x595   : > { %4987 = vst [vmem:[%s8261_s20 + $0x78] sm:$0xff] %v4955_v11  ;;  %v4062_v35 = vadd.f32 %v4016_v3, %v8196_v47 }
 0x596   : > { %v4827_v30 = vadd.f32 %v8240_v25, %v4794_v10  ;;  %v4251_v28 = vpop.f32.mrf.mxu3 }
 0x598   : > { %v4859_v1 = vadd.f32 %v6161_v9, %v4827_v30  ;;  %v4295_v30 = vadd.f32 %v4246_v59, %v4060_v48  ;;  %v6168_v48 = vld [vmem:[%s6447_s15 + $0xb8] sm:$0xff] }
 0x599   : > { %v4704_v13 = vpop.f32.mrf.mxu1 }
 0x59a   : > { %vm4891_vm0 = vcmp.gt.f32.partialorder %v4859_v1, 0.0  ;;  %v4924_v16 = vmul.f32 %v8249_v2, %v4859_v1  ;;  %v4759_v27 = vadd.f32 %v4704_v13, %v4525_v51 }
 0x59c   : > { %v4956_v6 = vsel %vm4891_vm0, %v4859_v1, %v4924_v16  ;;  %v4795_v53 = vmul.f32 %v8234_v45, %v4759_v27  ;;  %v4485_v1 = vpop.f32.mrf.mxu0  ;;  %v4019_v26 = vpop.f32.mrf.mxu2  ;;  %v4529_v16 = vadd.f32 %v4480_v5, %v4295_v30 }
 0x59d   : > { %4988 = vst [vmem:[%s8261_s20 + $0x80] sm:$0xff] %v4956_v6 }
 0x59e   : > { %v4828_v50 = vadd.f32 %v8240_v25, %v4795_v53  ;;  %v4296_v53 = vadd.f32 %v4249_v8, %v4061_v43  ;;  %v4254_v46 = vpop.f32.mrf.mxu3 }
 0x5a0   : > { %v4860_v29 = vadd.f32 %v6162_v14, %v4828_v50  ;;  %v4530_v5 = vadd.f32 %v4483_v33, %v4296_v53 }
 0x5a1   : > { %v4707_v40 = vpop.f32.mrf.mxu1 }
 0x5a2   : > { %vm4892_vm1 = vcmp.gt.f32.partialorder %v4860_v29, 0.0  ;;  %v4925_v23 = vmul.f32 %v8249_v2, %v4860_v29  ;;  %v4760_v4 = vadd.f32 %v4707_v40, %v4526_v49  ;;  %v6166_v49 = vld [vmem:[%s6447_s15 + $0xa8] sm:$0xff] }
 0x5a4   : > { %v4957_v61 = vsel %vm4892_vm1, %v4860_v29, %v4925_v23  ;;  %v4796_v0 = vmul.f32 %v8234_v45, %v4760_v4  ;;  %v4488_v29 = vpop.f32.mrf.mxu0  ;;  %v4021_v23 = vpop.f32.mrf.mxu2 }
 0x5a5   : > { %4989 = vst [vmem:[%s8261_s20 + $0x88] sm:$0xff] %v4957_v61  ;;  %v4297_v61 = vadd.f32 %v4251_v28, %v4062_v35  ;;  %v6170_v35 = vld [vmem:[%s6447_s15 + $0xc8] sm:$0xff] }
 0x5a6   : > { %v4829_v31 = vadd.f32 %v8240_v25, %v4796_v0  ;;  %v4256_v47 = vpop.f32.mrf.mxu3 }
 0x5a7   : > { %v4531_v8 = vadd.f32 %v4485_v1, %v4297_v61 }
 0x5a8   : > { %v4861_v52 = vadd.f32 %v6163_v38, %v4829_v31  ;;  %v4063_v38 = vadd.f32 %v4019_v26, %v8201_v15  ;;  %v4064_v15 = vadd.f32 %v4021_v23, %v8207_v62  ;;  %v6169_v26 = vld [vmem:[%s6447_s15 + $0xc0] sm:$0xff] }
 0x5a9   : > { %v4709_v63 = vpop.f32.mrf.mxu1 }
 0x5aa   : > { %vm4893_vm2 = vcmp.gt.f32.partialorder %v4861_v52, 0.0  ;;  %v4926_v55 = vmul.f32 %v8249_v2, %v4861_v52  ;;  %v4761_v44 = vadd.f32 %v4709_v63, %v4527_v17  ;;  %v4299_v28 = vadd.f32 %v4256_v47, %v4064_v15 }
 0x5ac   : > { %v4958_v37 = vsel %vm4893_vm2, %v4861_v52, %v4926_v55  ;;  %v4797_v42 = vmul.f32 %v8234_v45, %v4761_v44  ;;  %v6167_v52 = vld [vmem:[%s6447_s15 + $0xb0] sm:$0xff]  ;;  %v4490_v55 = vpop.f32.mrf.mxu0  ;;  %v4024_v33 = vpop.f32.mrf.mxu2 }
 0x5ad   : > { %4990 = vst [vmem:[%s8261_s20 + $0x90] sm:$0xff] %v4958_v37  ;;  %v4298_v37 = vadd.f32 %v4254_v46, %v4063_v38 }
 0x5ae   : > { %v4830_v21 = vadd.f32 %v8240_v25, %v4797_v42 }
 0x5b0   : > { %v4862_v20 = vadd.f32 %v6164_v12, %v4830_v21 }
 0x5b1   : > { %v4712_v36 = vpop.f32.mrf.mxu1 }
 0x5b2   : > { %vm4894_vm3 = vcmp.gt.f32.partialorder %v4862_v20, 0.0  ;;  %v4927_v11 = vmul.f32 %v8249_v2, %v4862_v20  ;;  %v4762_v10 = vadd.f32 %v4712_v36, %v4528_v41  ;;  %v4259_v41 = vpop.f32.mrf.mxu3 }
 0x5b4   : > { %v4959_v22 = vsel %vm4894_vm3, %v4862_v20, %v4927_v11  ;;  %v4798_v9 = vmul.f32 %v8234_v45, %v4762_v10  ;;  %v4532_v20 = vadd.f32 %v4488_v29, %v4298_v37  ;;  %v4493_v30 = vpop.f32.mrf.mxu0  ;;  %v4026_v1 = vpop.f32.mrf.mxu2 }
 0x5b5   : > { %4991 = vst [vmem:[%s8261_s20 + $0x98] sm:$0xff] %v4959_v22 }
 0x5b6   : > { %v4831_v51 = vadd.f32 %v8240_v25, %v4798_v9 }
 0x5b8   : > { %v4863_v13 = vadd.f32 %v6165_v39, %v4831_v51  ;;  %v4065_v51 = vadd.f32 %v4024_v33, %v8211_v7  ;;  %v4533_v39 = vadd.f32 %v4490_v55, %v4299_v28 }
 0x5b9   : > { %v4714_v27 = vpop.f32.mrf.mxu1 }
 0x5ba   : > { %vm4895_vm4 = vcmp.gt.f32.partialorder %v4863_v13, 0.0  ;;  %v4928_v34 = vmul.f32 %v8249_v2, %v4863_v13  ;;  %v4763_v6 = vadd.f32 %v4714_v27, %v4529_v16 }
 0x5bc   : > { %v4960_v50 = vsel %vm4895_vm4, %v4863_v13, %v4928_v34  ;;  %v4799_v59 = vmul.f32 %v8234_v45, %v4763_v6  ;;  %v4261_v34 = vpop.f32.mrf.mxu3  ;;  %v4300_v6 = vadd.f32 %v4259_v41, %v4065_v51  ;;  %v4029_v7 = vpop.f32.mrf.mxu2 }
 0x5bd   : > { %4992 = vst [vmem:[%s8261_s20 + $0xa0] sm:$0xff] %v4960_v50 }
 0x5be   : > { %v4832_v14 = vadd.f32 %v8240_v25, %v4799_v59  ;;  %v4495_v59 = vpop.f32.mrf.mxu0 }
 0x5c0   : > { %v4864_v40 = vadd.f32 %v6166_v49, %v4832_v14  ;;  %v4066_v14 = vadd.f32 %v4026_v1, %v8215_v58  ;;  %v4534_v49 = vadd.f32 %v4493_v30, %v4300_v6  ;;  %v4067_v58 = vadd.f32 %v4029_v7, %v8218_v18 }
 0x5c1   : > { %v4717_v4 = vpop.f32.mrf.mxu1 }
 0x5c2   : > { %vm4896_vm5 = vcmp.gt.f32.partialorder %v4864_v40, 0.0  ;;  %v4929_v56 = vmul.f32 %v8249_v2, %v4864_v40  ;;  %v4764_v32 = vadd.f32 %v4717_v4, %v4530_v5  ;;  %v4301_v4 = vadd.f32 %v4261_v34, %v4066_v14 }
 0x5c4   : > { %v4961_v0 = vsel %vm4896_vm5, %v4864_v40, %v4929_v56  ;;  %v4800_v31 = vmul.f32 %v8234_v45, %v4764_v32  ;;  %v4264_v61 = vpop.f32.mrf.mxu3  ;;  %v4535_v38 = vadd.f32 %v4495_v59, %v4301_v4 }
 0x5c5   : > { %4993 = vst [vmem:[%s8261_s20 + $0xa8] sm:$0xff] %v4961_v0  ;;  %v4302_v55 = vadd.f32 %v4264_v61, %v4067_v58 }
 0x5c6   : > { %v4833_v54 = vadd.f32 %v8240_v25, %v4800_v31  ;;  %v4498_v31 = vpop.f32.mrf.mxu0 }
 0x5c8   : > { %v4865_v17 = vadd.f32 %v6167_v52, %v4833_v54  ;;  %v6171_v54 = vld [vmem:[%s6447_s15 + $0xd0] sm:$0xff]  ;;  %v4031_v52 = vpop.f32.mrf.mxu2 }
 0x5c9   : > { %v4719_v63 = vpop.f32.mrf.mxu1  ;;  %v4068_v18 = vadd.f32 %v4031_v52, %v8222_v57 }
 0x5ca   : > { %vm4897_vm6 = vcmp.gt.f32.partialorder %v4865_v17, 0.0  ;;  %v4930_v44 = vmul.f32 %v8249_v2, %v4865_v17  ;;  %v4765_v60 = vadd.f32 %v4719_v63, %v4531_v8 }
 0x5cc   : > { %v4962_v42 = vsel %vm4897_vm6, %v4865_v17, %v4930_v44  ;;  %v4801_v3 = vmul.f32 %v8234_v45, %v4765_v60  ;;  %v4266_v37 = vpop.f32.mrf.mxu3 }
 0x5cd   : > { %4994 = vst [vmem:[%s8261_s20 + $0xb0] sm:$0xff] %v4962_v42  ;;  %v6172_v42 = vld [vmem:[%s6447_s15 + $0xd8] sm:$0xff] }
 0x5ce   : > { %v4834_v21 = vadd.f32 %v8240_v25, %v4801_v3 }
 0x5d0   : > { %v4866_v12 = vadd.f32 %v6168_v48, %v4834_v21  ;;  %v4536_v21 = vadd.f32 %v4498_v31, %v4302_v55  ;;  %v4034_v41 = vpop.f32.mrf.mxu2 }
 0x5d1   : > { %v4722_v36 = vpop.f32.mrf.mxu1  ;;  %v4069_v30 = vadd.f32 %v4034_v41, %v8225_v19 }
 0x5d2   : > { %vm4898_vm7 = vcmp.gt.f32.partialorder %v4866_v12, 0.0  ;;  %v4931_v11 = vmul.f32 %v8249_v2, %v4866_v12  ;;  %v4766_v10 = vadd.f32 %v4722_v36, %v4532_v20  ;;  %v4500_v20 = vpop.f32.mrf.mxu0  ;;  %v4303_v36 = vadd.f32 %v4266_v37, %v4068_v18 }
 0x5d4   : > { %v4963_v22 = vsel %vm4898_vm7, %v4866_v12, %v4931_v11  ;;  %v4802_v9 = vmul.f32 %v8234_v45, %v4766_v10  ;;  %v4269_v57 = vpop.f32.mrf.mxu3  ;;  %v4537_v1 = vadd.f32 %v4500_v20, %v4303_v36 }
 0x5d5   : > { %4995 = vst [vmem:[%s8261_s20 + $0xb8] sm:$0xff] %v4963_v22  ;;  %v6173_v22 = vld [vmem:[%s6447_s15 + $0xe0] sm:$0xff] }
 0x5d6   : > { %v4835_v62 = vadd.f32 %v8240_v25, %v4802_v9 }
 0x5d8   : > { %v4867_v43 = vadd.f32 %v6169_v26, %v4835_v62 }
 0x5d9   : > { %v4724_v13 = vpop.f32.mrf.mxu1 }
 0x5da   : > { %vm4899_vm8 = vcmp.gt.f32.partialorder %v4867_v43, 0.0  ;;  %v4932_v16 = vmul.f32 %v8249_v2, %v4867_v43  ;;  %v4767_v27 = vadd.f32 %v4724_v13, %v4533_v39  ;;  %v4304_v39 = vadd.f32 %v4269_v57, %v4069_v30 }
 0x5dc   : > { %v4964_v53 = vsel %vm4899_vm8, %v4867_v43, %v4932_v16  ;;  %v4803_v50 = vmul.f32 %v8234_v45, %v4767_v27  ;;  %v4503_v43 = vpop.f32.mrf.mxu0  ;;  %v4036_v27 = vpop.f32.mrf.mxu2 }
 0x5dd   : > { %4996 = vst [vmem:[%s8261_s20 + $0xc0] sm:$0xff] %v4964_v53  ;;  %v4538_v19 = vadd.f32 %v4503_v43, %v4304_v39  ;;  %v4070_v6 = vadd.f32 %v4036_v27, %v8229_v24  ;;  %v6174_v53 = vld [vmem:[%s6447_s15 + $0xe8] sm:$0xff]  ;;  %v4271_v59 = vpop.f32.mrf.mxu3 }
 0x5de   : > { %v4836_v46 = vadd.f32 %v8240_v25, %v4803_v50 }
 0x5e0   : > { %v4868_v29 = vadd.f32 %v6170_v35, %v4836_v46  ;;  %v4305_v35 = vadd.f32 %v4271_v59, %v4070_v6 }
 0x5e1   : > { %v4727_v40 = vpop.f32.mrf.mxu1 }
 0x5e2   : > { %vm4900_vm9 = vcmp.gt.f32.partialorder %v4868_v29, 0.0  ;;  %v4933_v5 = vmul.f32 %v8249_v2, %v4868_v29  ;;  %v4768_v23 = vadd.f32 %v4727_v40, %v4534_v49 }
 0x5e4   : > { %v4965_v56 = vsel %vm4900_vm9, %v4868_v29, %v4933_v5  ;;  %v4804_v32 = vmul.f32 %v8234_v45, %v4768_v23  ;;  %v4505_v40 = vpop.f32.mrf.mxu0  ;;  %v6175_v23 = vld [vmem:[%s6447_s15 + $0xf0] sm:$0xff] }
 0x5e5   : > { %4997 = vst [vmem:[%s8261_s20 + $0xc8] sm:$0xff] %v4965_v56  ;;  %v4539_v24 = vadd.f32 %v4505_v40, %v4305_v35 }
 0x5e6   : > { %v4837_v0 = vadd.f32 %v8240_v25, %v4804_v32 }
 0x5e8   : > { %v4869_v47 = vadd.f32 %v6171_v54, %v4837_v0  ;;  %v6176_v54 = vld [vmem:[%s6447_s15 + $0xf8] sm:$0xff]  ;;  %s6197_s15 = scalar_lea.hbm %s8577_s6, 512 }
 0x5e9   : > { %v4729_v17 = vpop.f32.mrf.mxu1  ;;  %p6199_p1 = scmp.lt.s32.totalorder %s6197_s15, %s6193_s13 }
 0x5ea   : > { %vm4901_vm10 = vcmp.gt.f32.partialorder %v4869_v47, 0.0  ;;  %v4934_v8 = vmul.f32 %v8249_v2, %v4869_v47  ;;  %v4769_v63 = vadd.f32 %v4729_v17, %v4535_v38 }
 0x5eb   : > { %p6200_p2 = por %p6199_p1, %p6198_p0 }
 0x5ec   : > { %v4966_v44 = vsel %vm4901_vm10, %v4869_v47, %v4934_v8  ;;  %v4805_v60 = vmul.f32 %v8234_v45, %v4769_v63 }
 0x5ed   : > { %4998 = vst [vmem:[%s8261_s20 + $0xd0] sm:$0xff] %v4966_v44  ;;  %p6201_p3 = pnand %p6200_p2, %p6196_p13 }
 0x5ee   : > { %v4838_v33 = vadd.f32 %v8240_v25, %v4805_v60 }
 0x5f0   : > { %v4870_v3 = vadd.f32 %v6172_v42, %v4838_v33 }
 0x5f1   : > { %v4732_v15 = vpop.f32.mrf.mxu1 }
 0x5f2   : > { %vm4902_vm11 = vcmp.gt.f32.partialorder %v4870_v3, 0.0  ;;  %v4935_v48 = vmul.f32 %v8249_v2, %v4870_v3  ;;  %v4770_v12 = vadd.f32 %v4732_v15, %v4536_v21 }
 0x5f4   : > { %v4967_v11 = vsel %vm4902_vm11, %v4870_v3, %v4935_v48  ;;  %v4806_v10 = vmul.f32 %v8234_v45, %v4770_v12 }
 0x5f5   : > { %4999 = vst [vmem:[%s8261_s20 + $0xd8] sm:$0xff] %v4967_v11 }
 0x5f6   : > { %v4839_v28 = vadd.f32 %v8240_v25, %v4806_v10 }
 0x5f8   : > { %v4871_v9 = vadd.f32 %v6173_v22, %v4839_v28 }
 0x5f9   : > { %v4734_v62 = vpop.f32.mrf.mxu1 }
 0x5fa   : > { %vm4903_vm12 = vcmp.gt.f32.partialorder %v4871_v9, 0.0  ;;  %v4936_v51 = vmul.f32 %v8249_v2, %v4871_v9  ;;  %v4771_v26 = vadd.f32 %v4734_v62, %v4537_v1 }
 0x5fc   : > { %v4968_v13 = vsel %vm4903_vm12, %v4871_v9, %v4936_v51  ;;  %v4807_v16 = vmul.f32 %v8234_v45, %v4771_v26 }
 0x5fd   : > { %5000 = vst [vmem:[%s8261_s20 + $0xe0] sm:$0xff] %v4968_v13 }
 0x5fe   : > { %v4840_v34 = vadd.f32 %v8240_v25, %v4807_v16 }
 0x600   : > { %v4872_v50 = vadd.f32 %v6174_v53, %v4840_v34 }
 0x601   : > { %v4737_v46 = vpop.f32.mrf.mxu1 }
 0x602   : > { %vm4904_vm13 = vcmp.gt.f32.partialorder %v4872_v50, 0.0  ;;  %v4937_v7 = vmul.f32 %v8249_v2, %v4872_v50  ;;  %v4772_v14 = vadd.f32 %v4737_v46, %v4538_v19 }
 0x604   : > { %v4969_v29 = vsel %vm4904_vm13, %v4872_v50, %v4937_v7  ;;  %v4808_v49 = vmul.f32 %v8234_v45, %v4772_v14 }
 0x605   : > { %5001 = vst [vmem:[%s8261_s20 + $0xe8] sm:$0xff] %v4969_v29 }
 0x606   : > { %v4841_v5 = vadd.f32 %v8240_v25, %v4808_v49 }
 0x608   : > { %v4873_v4 = vadd.f32 %v6175_v23, %v4841_v5 }
 0x609   : > { %v4739_v56 = vpop.f32.mrf.mxu1 }
 0x60a   : > { %vm4905_vm14 = vcmp.gt.f32.partialorder %v4873_v4, 0.0  ;;  %v4938_v32 = vmul.f32 %v8249_v2, %v4873_v4  ;;  %v4773_v61 = vadd.f32 %v4739_v56, %v4539_v24 }
 0x60c   : > { %v4970_v0 = vsel %vm4905_vm14, %v4873_v4, %v4938_v32  ;;  %v4809_v31 = vmul.f32 %v8234_v45, %v4773_v61 }
 0x60d   : > { %5002 = vst [vmem:[%s8261_s20 + $0xf0] sm:$0xff] %v4970_v0 }
 0x60e   : > { %v4842_v58 = vadd.f32 %v8240_v25, %v4809_v31 }
 0x610   : > { %v4874_v47 = vadd.f32 %v6176_v54, %v4842_v58 }
 0x612   : > { %vm4906_vm15 = vcmp.gt.f32.partialorder %v4874_v47, 0.0  ;;  %v4939_v38 = vmul.f32 %v8249_v2, %v4874_v47 }
 0x614   : > { %v4971_v52 = vsel %vm4906_vm15, %v4874_v47, %v4939_v38 }
 0x615   : > { %5003 = vst [vmem:[%s8261_s20 + $0xf8] sm:$0xff] %v4971_v52 }
 0x616   : > { %6204 = shalt.err (!%p6201_p3)
}
 0x617   : > { %s6243_s16 = smov 128   ;;  %s6244_s20 = smov 8  }
 0x618   : > { %6088 = dma.vmem_to_hbm [thread:$0]  (%p6318_p5), %s5018_s10, 4096, %s5020_s11, %s5005_s25, %s6243_s16, %s6243_s16, %s6244_s20  }
 0x619 PF: > { %p6094_p4 = scmp.ge.s32.totalorder %s6239_s24, 2  ;;  %s5034_s26 = sand.u32 1, %s6227_s21  }
 0x61a   : > { %s5035_s28 = scalar_lea.sflag [#allocation5], %s5034_s26 }
 0x61b   : > { %p6091_p7 = pnand %p6094_p4, %p6322_p6 }
 0x61d   : > { %p6092_p8 = pneg %p6091_p7 }
 0x61f   : > { %6222 = dma.done.wait (%p6092_p8), %s5035_s28, 4096  }
 0x620   : > { %6224 = vsyncadd (%p6092_p8), %s5035_s28, 4294963200  ;;  %p16_p9 = scmp.ge.s32.totalorder %s6305_s27, 4   ;;  %s8598_s21 = smov %s6231_s22 }
 0x621   : > { %s8599_s22 = smov %s6235_s23  ;;  %s8600_s23 = smov %s6316_s30 }
 0x622   : > { %s8601_s24 = smov %s6305_s27  ;;  %18 = sbr.rel (!%p16_p9) target bundleno = 3 (0x3), region = 99 }
 0x627   :  { %5041 = vsyncpa [#allocation5], 1 }
 0x628   :  { %5043 = vsyncpa [#allocation5 + $0x1], 1 }

</bundles_post_ra>
